<compile_context>
chip_gen: v6e
topology: v6e:2x2x1
jax: 0.10.0
libtpu: 0.0.40
codegen_flags: <defaults>
</compile_context>

<pallas_src>
import math
import functools

import jax
import jax.numpy as jnp
from jax import lax
from jax.experimental import pallas as pl
from jax.experimental.pallas import tpu as pltpu


# ----------------------------------------------------------------------------
# Fused transformer-layer kernel (one grid step == one batch element)
# ----------------------------------------------------------------------------
def _fused_layer_kernel(
    gamma_ref,            # scalar prefetch: (H,) = -softplus(gammas), in SMEM
    qk_ref, v_ref,        # (1, S, D) activations (query == key input; values)
    kw_ref, kb_ref,       # shared k/q projection (kq_same=True)
    vw_ref, vb_ref,       # v projection
    ow_ref, ob_ref,       # output projection
    ln1w_ref, ln1b_ref,   # layer norm 1
    w1_ref, b1_ref,       # FFN linear 1
    w2_ref, b2_ref,       # FFN linear 2
    ln2w_ref, ln2b_ref,   # layer norm 2
    o_ref,                # (1, S, D) output
    *, mask_flag, zero_pad, n_heads, apply_pos,
):
    S = qk_ref.shape[1]
    D = qk_ref.shape[2]
    d_k = D // n_heads
    inv_sqrt_dk = 1.0 / math.sqrt(d_k)

    qk_in = qk_ref[0]          # (S, D)
    v_in = v_ref[0]            # (S, D)

    # --- projections (query == key and kq_same=True -> single shared proj) ---
    kq = jnp.dot(qk_in, kw_ref[...], preferred_element_type=jnp.float32) + kb_ref[...]
    vp = jnp.dot(v_in, vw_ref[...], preferred_element_type=jnp.float32) + vb_ref[...]

    # --- S x S constants, built once per grid step, shared across all heads ---
    row = lax.broadcasted_iota(jnp.int32, (S, S), 0)   # query index i
    col = lax.broadcasted_iota(jnp.int32, (S, S), 1)   # key index j
    # torch: src_mask = (triu(ones, k=mask_flag) == 0)  -> j < i + mask_flag
    if mask_flag == 1:
        mask = col <= row
    else:
        mask = col < row
    maskf = mask.astype(jnp.float32)
    cum_mat = (row <= col).astype(jnp.float32)         # inclusive cumsum via matmul
    pos_eff = jnp.abs(col - row).astype(jnp.float32)

    def softmax_last(x):
        m = jnp.max(x, axis=-1, keepdims=True)
        e = jnp.exp(x - m)
        return e * pl.reciprocal(jnp.sum(e, axis=-1, keepdims=True), approx=True)

    # --- AKT monotonic attention, heads unrolled, fused with output projection
    #     (concat-then-project == sum of per-head pieces @ out_w row-blocks) ---
    attn_out = ob_ref[...]                             # (1, D) broadcasts over S
    for h in range(n_heads):
        lo = h * d_k
        qh = kq[:, lo:lo + d_k]                        # (S, d_k); q == k exactly
        vh = vp[:, lo:lo + d_k]
        scores = lax.dot_general(
            qh, qh, (((1,), (1,)), ((), ())), preferred_element_type=jnp.float32
        ) * inv_sqrt_dk

        # distance statistics (reference quirk: softmax of UNMASKED scores, then * mask)
        scores_ = softmax_last(scores) * maskf
        distcum = jnp.dot(scores_, cum_mat, preferred_element_type=jnp.float32)
        disttotal = jnp.sum(scores_, axis=-1, keepdims=True)
        dist_scores = jnp.sqrt(jnp.maximum((disttotal - distcum) * pos_eff, 0.0))

        gamma = gamma_ref[h]                           # scalar -softplus(gamma_h)
        total_effect = jnp.clip(jnp.exp(dist_scores * gamma), 1e-5, 1e5)

        sc = jnp.where(mask, scores * total_effect, jnp.float32(-1e32))
        attn = softmax_last(sc)
        if zero_pad:
            attn = jnp.where(row == 0, 0.0, attn)      # zero first query row
        # TODO(synk): dropout on attn is identity (eval mode)
        head_out = jnp.dot(attn, vh, preferred_element_type=jnp.float32)   # (S, d_k)
        attn_out = attn_out + jnp.dot(
            head_out, ow_ref[lo:lo + d_k, :], preferred_element_type=jnp.float32
        )

    def layer_norm(x, w, b):
        mean = jnp.mean(x, axis=-1, keepdims=True)
        var = jnp.mean((x - mean) ** 2, axis=-1, keepdims=True)
        return (x - mean) * lax.rsqrt(var + 1e-5) * w + b

    # residual + LN1
    x = layer_norm(qk_in + attn_out, ln1w_ref[...], ln1b_ref[...])

    if apply_pos:
        h1 = jnp.maximum(
            jnp.dot(x, w1_ref[...], preferred_element_type=jnp.float32) + b1_ref[...],
            0.0,
        )
        ffn_out = jnp.dot(h1, w2_ref[...], preferred_element_type=jnp.float32) + b2_ref[...]
        x = layer_norm(x + ffn_out, ln2w_ref[...], ln2b_ref[...])

    o_ref[0] = x


def transformer_layer(p, mask_flag, query_key, values, n_heads, apply_pos=True):
    """One fused AKT transformer layer. query == key at all call sites of this model."""
    B, S, D = query_key.shape
    F_ = p["w1"].shape[1]
    ap = p["attn"]
    zero_pad = (mask_flag == 0)
    gamma_neg = -jax.nn.softplus(ap["gammas"])         # (H,), tiny host-side op

    kernel = functools.partial(
        _fused_layer_kernel,
        mask_flag=mask_flag, zero_pad=zero_pad,
        n_heads=n_heads, apply_pos=apply_pos,
    )
    seq_spec = pl.BlockSpec((1, S, D), lambda b, g: (b, 0, 0))

    def w_spec(shape):
        return pl.BlockSpec(shape, lambda b, g: (0, 0))

    return pl.pallas_call(
        kernel,
        out_shape=jax.ShapeDtypeStruct((B, S, D), jnp.float32),
        grid_spec=pltpu.PrefetchScalarGridSpec(
            num_scalar_prefetch=1,
            grid=(B,),
            in_specs=[
                seq_spec, seq_spec,
                w_spec((D, D)), w_spec((1, D)),        # k/q proj
                w_spec((D, D)), w_spec((1, D)),        # v proj
                w_spec((D, D)), w_spec((1, D)),        # out proj
                w_spec((1, D)), w_spec((1, D)),        # LN1
                w_spec((D, F_)), w_spec((1, F_)),      # FFN 1
                w_spec((F_, D)), w_spec((1, D)),       # FFN 2
                w_spec((1, D)), w_spec((1, D)),        # LN2
            ],
            out_specs=seq_spec,
        ),
        compiler_params=pltpu.CompilerParams(
            dimension_semantics=("parallel",)
        ),
    )(
        gamma_neg, query_key, values,
        ap["k_w"], ap["k_b"].reshape(1, D),
        ap["v_w"], ap["v_b"].reshape(1, D),
        ap["out_w"], ap["out_b"].reshape(1, D),
        p["ln1_w"].reshape(1, D), p["ln1_b"].reshape(1, D),
        p["w1"], p["b1"].reshape(1, F_),
        p["w2"], p["b2"].reshape(1, D),
        p["ln2_w"].reshape(1, D), p["ln2_b"].reshape(1, D),
    )


# ----------------------------------------------------------------------------
# Architecture forward (AKT block stacking)
# ----------------------------------------------------------------------------
def architecture_forward(params, s_embed_data, sa_embed_data, n_heads):
    y = sa_embed_data
    x = s_embed_data
    for bp in params["blocks_1"]:
        y = transformer_layer(bp, 1, y, y, n_heads, apply_pos=True)   # (y, y, y)
    flag_first = True
    for bp in params["blocks_2"]:
        if flag_first:
            x = transformer_layer(bp, 1, x, x, n_heads, apply_pos=False)  # (x, x, x)
            flag_first = False
        else:
            x = transformer_layer(bp, 0, x, y, n_heads, apply_pos=True)   # (x, x, y)
            flag_first = True
    return x


# ----------------------------------------------------------------------------
# Deterministic parameter init
# ----------------------------------------------------------------------------
def _xavier(key, din, dout):
    bound = math.sqrt(6.0 / (din + dout))
    return jax.random.uniform(key, (din, dout), jnp.float32, -bound, bound)


def init_mha_params(key, d_model, n_heads):
    ks = jax.random.split(key, 4)
    return dict(
        k_w=_xavier(ks[0], d_model, d_model), k_b=jnp.zeros((d_model,), jnp.float32),
        v_w=_xavier(ks[1], d_model, d_model), v_b=jnp.zeros((d_model,), jnp.float32),
        out_w=_xavier(ks[2], d_model, d_model), out_b=jnp.zeros((d_model,), jnp.float32),
        gammas=jax.random.uniform(ks[3], (n_heads,), jnp.float32,
                                  -math.sqrt(3.0), math.sqrt(3.0)),
    )


def init_layer_params(key, d_model, d_ff, n_heads):
    ks = jax.random.split(key, 3)
    return dict(
        attn=init_mha_params(ks[0], d_model, n_heads),
        ln1_w=jnp.ones((d_model,), jnp.float32), ln1_b=jnp.zeros((d_model,), jnp.float32),
        w1=_xavier(ks[1], d_model, d_ff), b1=jnp.zeros((d_ff,), jnp.float32),
        w2=_xavier(ks[2], d_ff, d_model), b2=jnp.zeros((d_model,), jnp.float32),
        ln2_w=jnp.ones((d_model,), jnp.float32), ln2_b=jnp.zeros((d_model,), jnp.float32),
    )


def init_architecture_params(key, n_blocks, d_model, d_ff, n_heads):
    keys = jax.random.split(key, 3 * n_blocks)
    return dict(
        blocks_1=[init_layer_params(keys[i], d_model, d_ff, n_heads)
                  for i in range(n_blocks)],
        blocks_2=[init_layer_params(keys[n_blocks + i], d_model, d_ff, n_heads)
                  for i in range(2 * n_blocks)],
    )


# ----------------------------------------------------------------------------
if __name__ == "__main__":
    # small AKT config: n_blocks=1, d_model=32, n_heads=4 (d_k=8), d_ff=64
    B, S, D, H, DFF, NBLOCKS = 2, 8, 32, 4, 64, 1

    root = jax.random.PRNGKey(0)
    kp, ks, ksa = jax.random.split(root, 3)
    params = init_architecture_params(kp, NBLOCKS, D, DFF, H)

    s_embed_data = jax.random.normal(ks, (B, S, D), jnp.float32)
    sa_embed_data = jax.random.normal(ksa, (B, S, D), jnp.float32)

    fwd = jax.jit(architecture_forward, static_argnums=(3,))
    out = jax.block_until_ready(fwd(params, s_embed_data, sa_embed_data, H))
    assert out.shape == (B, S, D)
    assert bool(jnp.all(jnp.isfinite(out)))
    print("KERNEL_OK")
</pallas_src>

<mosaic_0001>
module attributes {stable_mosaic.version = 11 : i64} {
  func.func @_fused_layer_kernel(%arg0: i32, %arg1: memref<4xf32, #tpu.memory_space<smem>>, %arg2: memref<1x8x32xf32, #tpu.memory_space<vmem>>, %arg3: memref<1x8x32xf32, #tpu.memory_space<vmem>>, %arg4: memref<32x32xf32, #tpu.memory_space<vmem>>, %arg5: memref<1x32xf32, #tpu.memory_space<vmem>>, %arg6: memref<32x32xf32, #tpu.memory_space<vmem>>, %arg7: memref<1x32xf32, #tpu.memory_space<vmem>>, %arg8: memref<32x32xf32, #tpu.memory_space<vmem>>, %arg9: memref<1x32xf32, #tpu.memory_space<vmem>>, %arg10: memref<1x32xf32, #tpu.memory_space<vmem>>, %arg11: memref<1x32xf32, #tpu.memory_space<vmem>>, %arg12: memref<32x64xf32, #tpu.memory_space<vmem>>, %arg13: memref<1x64xf32, #tpu.memory_space<vmem>>, %arg14: memref<64x32xf32, #tpu.memory_space<vmem>>, %arg15: memref<1x32xf32, #tpu.memory_space<vmem>>, %arg16: memref<1x32xf32, #tpu.memory_space<vmem>>, %arg17: memref<1x32xf32, #tpu.memory_space<vmem>>, %arg18: memref<1x8x32xf32, #tpu.memory_space<vmem>>) attributes {dimension_semantics = [#tpu.dimension_semantics<parallel>], iteration_bounds = array<i64: 2>, scalar_prefetch = 1 : i64, scratch_operands = 0 : i64, tpu.core_type = #tpu.core_type<tc>, window_params = [{transform_indices = @transform_0, window_bounds = array<i64: 1, 8, 32>}, {transform_indices = @transform_1, window_bounds = array<i64: 1, 8, 32>}, {pipeline_mode = #tpu.pipeline_mode<synchronous>, transform_indices = @transform_2, window_bounds = array<i64: 32, 32>}, {pipeline_mode = #tpu.pipeline_mode<synchronous>, transform_indices = @transform_3, window_bounds = array<i64: 1, 32>}, {pipeline_mode = #tpu.pipeline_mode<synchronous>, transform_indices = @transform_4, window_bounds = array<i64: 32, 32>}, {pipeline_mode = #tpu.pipeline_mode<synchronous>, transform_indices = @transform_5, window_bounds = array<i64: 1, 32>}, {pipeline_mode = #tpu.pipeline_mode<synchronous>, transform_indices = @transform_6, window_bounds = array<i64: 32, 32>}, {pipeline_mode = #tpu.pipeline_mode<synchronous>, transform_indices = @transform_7, window_bounds = array<i64: 1, 32>}, {pipeline_mode = #tpu.pipeline_mode<synchronous>, transform_indices = @transform_8, window_bounds = array<i64: 1, 32>}, {pipeline_mode = #tpu.pipeline_mode<synchronous>, transform_indices = @transform_9, window_bounds = array<i64: 1, 32>}, {pipeline_mode = #tpu.pipeline_mode<synchronous>, transform_indices = @transform_10, window_bounds = array<i64: 32, 64>}, {pipeline_mode = #tpu.pipeline_mode<synchronous>, transform_indices = @transform_11, window_bounds = array<i64: 1, 64>}, {pipeline_mode = #tpu.pipeline_mode<synchronous>, transform_indices = @transform_12, window_bounds = array<i64: 64, 32>}, {pipeline_mode = #tpu.pipeline_mode<synchronous>, transform_indices = @transform_13, window_bounds = array<i64: 1, 32>}, {pipeline_mode = #tpu.pipeline_mode<synchronous>, transform_indices = @transform_14, window_bounds = array<i64: 1, 32>}, {pipeline_mode = #tpu.pipeline_mode<synchronous>, transform_indices = @transform_15, window_bounds = array<i64: 1, 32>}, {transform_indices = @transform_16, window_bounds = array<i64: 1, 8, 32>}]} {
    %c0 = arith.constant 0 : index
    %c0_0 = arith.constant 0 : index
    %c0_1 = arith.constant 0 : index
    %0 = vector.load %arg2[%c0, %c0_0, %c0_1] : memref<1x8x32xf32, #tpu.memory_space<vmem>>, vector<1x8x32xf32>
    %1 = vector.shape_cast %0 : vector<1x8x32xf32> to vector<8x32xf32>
    %c0_2 = arith.constant 0 : index
    %c0_3 = arith.constant 0 : index
    %c0_4 = arith.constant 0 : index
    %2 = vector.load %arg3[%c0_2, %c0_3, %c0_4] : memref<1x8x32xf32, #tpu.memory_space<vmem>>, vector<1x8x32xf32>
    %3 = vector.shape_cast %2 : vector<1x8x32xf32> to vector<8x32xf32>
    %c0_5 = arith.constant 0 : index
    %c0_6 = arith.constant 0 : index
    %4 = vector.load %arg4[%c0_5, %c0_6] : memref<32x32xf32, #tpu.memory_space<vmem>>, vector<32x32xf32>
    %cst = arith.constant dense<0.000000e+00> : vector<8x32xf32>
    %5 = tpu.matmul %1, %4, %cst {dimension_numbers = #tpu.dot_dimension_numbers<[1], [0], [0], [1], [0, 0, 1, 1], [], []>} : vector<8x32xf32>, vector<32x32xf32>, vector<8x32xf32> -> vector<8x32xf32>
    %c0_7 = arith.constant 0 : index
    %c0_8 = arith.constant 0 : index
    %6 = vector.load %arg5[%c0_7, %c0_8] : memref<1x32xf32, #tpu.memory_space<vmem>>, vector<1x32xf32>
    %7 = vector.broadcast %6 : vector<1x32xf32> to vector<8x32xf32>
    %8 = arith.addf %5, %7 : vector<8x32xf32>
    %c0_9 = arith.constant 0 : index
    %c0_10 = arith.constant 0 : index
    %9 = vector.load %arg6[%c0_9, %c0_10] : memref<32x32xf32, #tpu.memory_space<vmem>>, vector<32x32xf32>
    %cst_11 = arith.constant dense<0.000000e+00> : vector<8x32xf32>
    %10 = tpu.matmul %3, %9, %cst_11 {dimension_numbers = #tpu.dot_dimension_numbers<[1], [0], [0], [1], [0, 0, 1, 1], [], []>} : vector<8x32xf32>, vector<32x32xf32>, vector<8x32xf32> -> vector<8x32xf32>
    %c0_12 = arith.constant 0 : index
    %c0_13 = arith.constant 0 : index
    %11 = vector.load %arg7[%c0_12, %c0_13] : memref<1x32xf32, #tpu.memory_space<vmem>>, vector<1x32xf32>
    %12 = vector.broadcast %11 : vector<1x32xf32> to vector<8x32xf32>
    %13 = arith.addf %10, %12 : vector<8x32xf32>
    %14 = tpu.iota {dimensions = array<i32: 0>} : vector<8x8xi32>
    %15 = tpu.iota {dimensions = array<i32: 1>} : vector<8x8xi32>
    %16 = arith.cmpi sle, %15, %14 : vector<8x8xi32>
    %17 = arith.extui %16 : vector<8x8xi1> to vector<8x8xi32>
    %18 = arith.sitofp %17 : vector<8x8xi32> to vector<8x8xf32>
    %19 = arith.cmpi sle, %14, %15 : vector<8x8xi32>
    %20 = arith.extui %19 : vector<8x8xi1> to vector<8x8xi32>
    %21 = arith.sitofp %20 : vector<8x8xi32> to vector<8x8xf32>
    %22 = arith.subi %15, %14 : vector<8x8xi32>
    %23 = math.absi %22 : vector<8x8xi32>
    %24 = arith.sitofp %23 : vector<8x8xi32> to vector<8x8xf32>
    %c0_14 = arith.constant 0 : index
    %c0_15 = arith.constant 0 : index
    %25 = vector.load %arg9[%c0_14, %c0_15] : memref<1x32xf32, #tpu.memory_space<vmem>>, vector<1x32xf32>
    %26 = vector.extract_strided_slice %8 {offsets = [0, 0], sizes = [8, 8], strides = [1, 1]} : vector<8x32xf32> to vector<8x8xf32>
    %27 = vector.extract_strided_slice %13 {offsets = [0, 0], sizes = [8, 8], strides = [1, 1]} : vector<8x32xf32> to vector<8x8xf32>
    %cst_16 = arith.constant dense<0.000000e+00> : vector<8x8xf32>
    %28 = tpu.matmul %26, %26, %cst_16 {dimension_numbers = #tpu.dot_dimension_numbers<[1], [1], [0], [0], [0, 0, 1, 0], [], []>} : vector<8x8xf32>, vector<8x8xf32>, vector<8x8xf32> -> vector<8x8xf32>
    %cst_17 = arith.constant 0.353553385 : f32
    %29 = vector.broadcast %cst_17 : f32 to vector<8x8xf32>
    %30 = arith.mulf %28, %29 : vector<8x8xf32>
    %cst_18 = arith.constant dense<0xFF800000> : vector<8xf32>
    %31 = vector.multi_reduction <maximumf>, %30, %cst_18 [1] : vector<8x8xf32> to vector<8xf32>
    %32 = vector.shape_cast %31 : vector<8xf32> to vector<8x1xf32>
    %33 = vector.broadcast %32 : vector<8x1xf32> to vector<8x8xf32>
    %34 = arith.subf %30, %33 : vector<8x8xf32>
    %35 = math.exp %34 : vector<8x8xf32>
    %cst_19 = arith.constant dense<0.000000e+00> : vector<8xf32>
    %36 = vector.multi_reduction <add>, %35, %cst_19 [1] : vector<8x8xf32> to vector<8xf32>
    %37 = vector.shape_cast %36 : vector<8xf32> to vector<8x1xf32>
    %38 = tpu.reciprocal %37 {approx = true} : vector<8x1xf32> -> vector<8x1xf32>
    %39 = vector.broadcast %38 : vector<8x1xf32> to vector<8x8xf32>
    %40 = arith.mulf %35, %39 : vector<8x8xf32>
    %41 = arith.mulf %40, %18 : vector<8x8xf32>
    %cst_20 = arith.constant dense<0.000000e+00> : vector<8x8xf32>
    %42 = tpu.matmul %41, %21, %cst_20 {dimension_numbers = #tpu.dot_dimension_numbers<[1], [0], [0], [1], [0, 0, 1, 1], [], []>} : vector<8x8xf32>, vector<8x8xf32>, vector<8x8xf32> -> vector<8x8xf32>
    %cst_21 = arith.constant dense<0.000000e+00> : vector<8xf32>
    %43 = vector.multi_reduction <add>, %41, %cst_21 [1] : vector<8x8xf32> to vector<8xf32>
    %44 = vector.shape_cast %43 : vector<8xf32> to vector<8x1xf32>
    %45 = vector.broadcast %44 : vector<8x1xf32> to vector<8x8xf32>
    %46 = arith.subf %45, %42 : vector<8x8xf32>
    %47 = arith.mulf %46, %24 : vector<8x8xf32>
    %cst_22 = arith.constant 0.000000e+00 : f32
    %48 = vector.broadcast %cst_22 : f32 to vector<8x8xf32>
    %49 = arith.maximumf %47, %48 : vector<8x8xf32>
    %50 = math.sqrt %49 : vector<8x8xf32>
    %c0_23 = arith.constant 0 : index
    %51 = memref.load %arg1[%c0_23] : memref<4xf32, #tpu.memory_space<smem>>
    %52 = vector.broadcast %51 : f32 to vector<8x8xf32>
    %53 = arith.mulf %50, %52 : vector<8x8xf32>
    %54 = math.exp %53 : vector<8x8xf32>
    %cst_24 = arith.constant 9.99999974E-6 : f32
    %cst_25 = arith.constant 1.000000e+05 : f32
    %55 = vector.broadcast %cst_24 : f32 to vector<8x8xf32>
    %56 = arith.maximumf %55, %54 : vector<8x8xf32>
    %57 = vector.broadcast %cst_25 : f32 to vector<8x8xf32>
    %58 = arith.minimumf %57, %56 : vector<8x8xf32>
    %59 = arith.mulf %30, %58 : vector<8x8xf32>
    %cst_26 = arith.constant -1.000000e+32 : f32
    %60 = vector.broadcast %cst_26 : f32 to vector<8x8xf32>
    %61 = arith.select %16, %59, %60 : vector<8x8xi1>, vector<8x8xf32>
    %cst_27 = arith.constant dense<0xFF800000> : vector<8xf32>
    %62 = vector.multi_reduction <maximumf>, %61, %cst_27 [1] : vector<8x8xf32> to vector<8xf32>
    %63 = vector.shape_cast %62 : vector<8xf32> to vector<8x1xf32>
    %64 = vector.broadcast %63 : vector<8x1xf32> to vector<8x8xf32>
    %65 = arith.subf %61, %64 : vector<8x8xf32>
    %66 = math.exp %65 : vector<8x8xf32>
    %cst_28 = arith.constant dense<0.000000e+00> : vector<8xf32>
    %67 = vector.multi_reduction <add>, %66, %cst_28 [1] : vector<8x8xf32> to vector<8xf32>
    %68 = vector.shape_cast %67 : vector<8xf32> to vector<8x1xf32>
    %69 = tpu.reciprocal %68 {approx = true} : vector<8x1xf32> -> vector<8x1xf32>
    %70 = vector.broadcast %69 : vector<8x1xf32> to vector<8x8xf32>
    %71 = arith.mulf %66, %70 : vector<8x8xf32>
    %cst_29 = arith.constant dense<0.000000e+00> : vector<8x8xf32>
    %72 = tpu.matmul %71, %27, %cst_29 {dimension_numbers = #tpu.dot_dimension_numbers<[1], [0], [0], [1], [0, 0, 1, 1], [], []>} : vector<8x8xf32>, vector<8x8xf32>, vector<8x8xf32> -> vector<8x8xf32>
    %c0_30 = arith.constant 0 : index
    %c0_31 = arith.constant 0 : index
    %73 = vector.load %arg8[%c0_30, %c0_31] : memref<32x32xf32, #tpu.memory_space<vmem>>, vector<8x32xf32>
    %cst_32 = arith.constant dense<0.000000e+00> : vector<8x32xf32>
    %74 = tpu.matmul %72, %73, %cst_32 {dimension_numbers = #tpu.dot_dimension_numbers<[1], [0], [0], [1], [0, 0, 1, 1], [], []>} : vector<8x8xf32>, vector<8x32xf32>, vector<8x32xf32> -> vector<8x32xf32>
    %75 = vector.broadcast %25 : vector<1x32xf32> to vector<8x32xf32>
    %76 = arith.addf %75, %74 : vector<8x32xf32>
    %77 = vector.extract_strided_slice %8 {offsets = [0, 8], sizes = [8, 8], strides = [1, 1]} : vector<8x32xf32> to vector<8x8xf32>
    %78 = vector.extract_strided_slice %13 {offsets = [0, 8], sizes = [8, 8], strides = [1, 1]} : vector<8x32xf32> to vector<8x8xf32>
    %cst_33 = arith.constant dense<0.000000e+00> : vector<8x8xf32>
    %79 = tpu.matmul %77, %77, %cst_33 {dimension_numbers = #tpu.dot_dimension_numbers<[1], [1], [0], [0], [0, 0, 1, 0], [], []>} : vector<8x8xf32>, vector<8x8xf32>, vector<8x8xf32> -> vector<8x8xf32>
    %cst_34 = arith.constant 0.353553385 : f32
    %80 = vector.broadcast %cst_34 : f32 to vector<8x8xf32>
    %81 = arith.mulf %79, %80 : vector<8x8xf32>
    %cst_35 = arith.constant dense<0xFF800000> : vector<8xf32>
    %82 = vector.multi_reduction <maximumf>, %81, %cst_35 [1] : vector<8x8xf32> to vector<8xf32>
    %83 = vector.shape_cast %82 : vector<8xf32> to vector<8x1xf32>
    %84 = vector.broadcast %83 : vector<8x1xf32> to vector<8x8xf32>
    %85 = arith.subf %81, %84 : vector<8x8xf32>
    %86 = math.exp %85 : vector<8x8xf32>
    %cst_36 = arith.constant dense<0.000000e+00> : vector<8xf32>
    %87 = vector.multi_reduction <add>, %86, %cst_36 [1] : vector<8x8xf32> to vector<8xf32>
    %88 = vector.shape_cast %87 : vector<8xf32> to vector<8x1xf32>
    %89 = tpu.reciprocal %88 {approx = true} : vector<8x1xf32> -> vector<8x1xf32>
    %90 = vector.broadcast %89 : vector<8x1xf32> to vector<8x8xf32>
    %91 = arith.mulf %86, %90 : vector<8x8xf32>
    %92 = arith.mulf %91, %18 : vector<8x8xf32>
    %cst_37 = arith.constant dense<0.000000e+00> : vector<8x8xf32>
    %93 = tpu.matmul %92, %21, %cst_37 {dimension_numbers = #tpu.dot_dimension_numbers<[1], [0], [0], [1], [0, 0, 1, 1], [], []>} : vector<8x8xf32>, vector<8x8xf32>, vector<8x8xf32> -> vector<8x8xf32>
    %cst_38 = arith.constant dense<0.000000e+00> : vector<8xf32>
    %94 = vector.multi_reduction <add>, %92, %cst_38 [1] : vector<8x8xf32> to vector<8xf32>
    %95 = vector.shape_cast %94 : vector<8xf32> to vector<8x1xf32>
    %96 = vector.broadcast %95 : vector<8x1xf32> to vector<8x8xf32>
    %97 = arith.subf %96, %93 : vector<8x8xf32>
    %98 = arith.mulf %97, %24 : vector<8x8xf32>
    %cst_39 = arith.constant 0.000000e+00 : f32
    %99 = vector.broadcast %cst_39 : f32 to vector<8x8xf32>
    %100 = arith.maximumf %98, %99 : vector<8x8xf32>
    %101 = math.sqrt %100 : vector<8x8xf32>
    %c1 = arith.constant 1 : index
    %102 = memref.load %arg1[%c1] : memref<4xf32, #tpu.memory_space<smem>>
    %103 = vector.broadcast %102 : f32 to vector<8x8xf32>
    %104 = arith.mulf %101, %103 : vector<8x8xf32>
    %105 = math.exp %104 : vector<8x8xf32>
    %cst_40 = arith.constant 9.99999974E-6 : f32
    %cst_41 = arith.constant 1.000000e+05 : f32
    %106 = vector.broadcast %cst_40 : f32 to vector<8x8xf32>
    %107 = arith.maximumf %106, %105 : vector<8x8xf32>
    %108 = vector.broadcast %cst_41 : f32 to vector<8x8xf32>
    %109 = arith.minimumf %108, %107 : vector<8x8xf32>
    %110 = arith.mulf %81, %109 : vector<8x8xf32>
    %cst_42 = arith.constant -1.000000e+32 : f32
    %111 = vector.broadcast %cst_42 : f32 to vector<8x8xf32>
    %112 = arith.select %16, %110, %111 : vector<8x8xi1>, vector<8x8xf32>
    %cst_43 = arith.constant dense<0xFF800000> : vector<8xf32>
    %113 = vector.multi_reduction <maximumf>, %112, %cst_43 [1] : vector<8x8xf32> to vector<8xf32>
    %114 = vector.shape_cast %113 : vector<8xf32> to vector<8x1xf32>
    %115 = vector.broadcast %114 : vector<8x1xf32> to vector<8x8xf32>
    %116 = arith.subf %112, %115 : vector<8x8xf32>
    %117 = math.exp %116 : vector<8x8xf32>
    %cst_44 = arith.constant dense<0.000000e+00> : vector<8xf32>
    %118 = vector.multi_reduction <add>, %117, %cst_44 [1] : vector<8x8xf32> to vector<8xf32>
    %119 = vector.shape_cast %118 : vector<8xf32> to vector<8x1xf32>
    %120 = tpu.reciprocal %119 {approx = true} : vector<8x1xf32> -> vector<8x1xf32>
    %121 = vector.broadcast %120 : vector<8x1xf32> to vector<8x8xf32>
    %122 = arith.mulf %117, %121 : vector<8x8xf32>
    %cst_45 = arith.constant dense<0.000000e+00> : vector<8x8xf32>
    %123 = tpu.matmul %122, %78, %cst_45 {dimension_numbers = #tpu.dot_dimension_numbers<[1], [0], [0], [1], [0, 0, 1, 1], [], []>} : vector<8x8xf32>, vector<8x8xf32>, vector<8x8xf32> -> vector<8x8xf32>
    %c8 = arith.constant 8 : index
    %c0_46 = arith.constant 0 : index
    %124 = vector.load %arg8[%c8, %c0_46] : memref<32x32xf32, #tpu.memory_space<vmem>>, vector<8x32xf32>
    %cst_47 = arith.constant dense<0.000000e+00> : vector<8x32xf32>
    %125 = tpu.matmul %123, %124, %cst_47 {dimension_numbers = #tpu.dot_dimension_numbers<[1], [0], [0], [1], [0, 0, 1, 1], [], []>} : vector<8x8xf32>, vector<8x32xf32>, vector<8x32xf32> -> vector<8x32xf32>
    %126 = arith.addf %76, %125 : vector<8x32xf32>
    %127 = vector.extract_strided_slice %8 {offsets = [0, 16], sizes = [8, 8], strides = [1, 1]} : vector<8x32xf32> to vector<8x8xf32>
    %128 = vector.extract_strided_slice %13 {offsets = [0, 16], sizes = [8, 8], strides = [1, 1]} : vector<8x32xf32> to vector<8x8xf32>
    %cst_48 = arith.constant dense<0.000000e+00> : vector<8x8xf32>
    %129 = tpu.matmul %127, %127, %cst_48 {dimension_numbers = #tpu.dot_dimension_numbers<[1], [1], [0], [0], [0, 0, 1, 0], [], []>} : vector<8x8xf32>, vector<8x8xf32>, vector<8x8xf32> -> vector<8x8xf32>
    %cst_49 = arith.constant 0.353553385 : f32
    %130 = vector.broadcast %cst_49 : f32 to vector<8x8xf32>
    %131 = arith.mulf %129, %130 : vector<8x8xf32>
    %cst_50 = arith.constant dense<0xFF800000> : vector<8xf32>
    %132 = vector.multi_reduction <maximumf>, %131, %cst_50 [1] : vector<8x8xf32> to vector<8xf32>
    %133 = vector.shape_cast %132 : vector<8xf32> to vector<8x1xf32>
    %134 = vector.broadcast %133 : vector<8x1xf32> to vector<8x8xf32>
    %135 = arith.subf %131, %134 : vector<8x8xf32>
    %136 = math.exp %135 : vector<8x8xf32>
    %cst_51 = arith.constant dense<0.000000e+00> : vector<8xf32>
    %137 = vector.multi_reduction <add>, %136, %cst_51 [1] : vector<8x8xf32> to vector<8xf32>
    %138 = vector.shape_cast %137 : vector<8xf32> to vector<8x1xf32>
    %139 = tpu.reciprocal %138 {approx = true} : vector<8x1xf32> -> vector<8x1xf32>
    %140 = vector.broadcast %139 : vector<8x1xf32> to vector<8x8xf32>
    %141 = arith.mulf %136, %140 : vector<8x8xf32>
    %142 = arith.mulf %141, %18 : vector<8x8xf32>
    %cst_52 = arith.constant dense<0.000000e+00> : vector<8x8xf32>
    %143 = tpu.matmul %142, %21, %cst_52 {dimension_numbers = #tpu.dot_dimension_numbers<[1], [0], [0], [1], [0, 0, 1, 1], [], []>} : vector<8x8xf32>, vector<8x8xf32>, vector<8x8xf32> -> vector<8x8xf32>
    %cst_53 = arith.constant dense<0.000000e+00> : vector<8xf32>
    %144 = vector.multi_reduction <add>, %142, %cst_53 [1] : vector<8x8xf32> to vector<8xf32>
    %145 = vector.shape_cast %144 : vector<8xf32> to vector<8x1xf32>
    %146 = vector.broadcast %145 : vector<8x1xf32> to vector<8x8xf32>
    %147 = arith.subf %146, %143 : vector<8x8xf32>
    %148 = arith.mulf %147, %24 : vector<8x8xf32>
    %cst_54 = arith.constant 0.000000e+00 : f32
    %149 = vector.broadcast %cst_54 : f32 to vector<8x8xf32>
    %150 = arith.maximumf %148, %149 : vector<8x8xf32>
    %151 = math.sqrt %150 : vector<8x8xf32>
    %c2 = arith.constant 2 : index
    %152 = memref.load %arg1[%c2] : memref<4xf32, #tpu.memory_space<smem>>
    %153 = vector.broadcast %152 : f32 to vector<8x8xf32>
    %154 = arith.mulf %151, %153 : vector<8x8xf32>
    %155 = math.exp %154 : vector<8x8xf32>
    %cst_55 = arith.constant 9.99999974E-6 : f32
    %cst_56 = arith.constant 1.000000e+05 : f32
    %156 = vector.broadcast %cst_55 : f32 to vector<8x8xf32>
    %157 = arith.maximumf %156, %155 : vector<8x8xf32>
    %158 = vector.broadcast %cst_56 : f32 to vector<8x8xf32>
    %159 = arith.minimumf %158, %157 : vector<8x8xf32>
    %160 = arith.mulf %131, %159 : vector<8x8xf32>
    %cst_57 = arith.constant -1.000000e+32 : f32
    %161 = vector.broadcast %cst_57 : f32 to vector<8x8xf32>
    %162 = arith.select %16, %160, %161 : vector<8x8xi1>, vector<8x8xf32>
    %cst_58 = arith.constant dense<0xFF800000> : vector<8xf32>
    %163 = vector.multi_reduction <maximumf>, %162, %cst_58 [1] : vector<8x8xf32> to vector<8xf32>
    %164 = vector.shape_cast %163 : vector<8xf32> to vector<8x1xf32>
    %165 = vector.broadcast %164 : vector<8x1xf32> to vector<8x8xf32>
    %166 = arith.subf %162, %165 : vector<8x8xf32>
    %167 = math.exp %166 : vector<8x8xf32>
    %cst_59 = arith.constant dense<0.000000e+00> : vector<8xf32>
    %168 = vector.multi_reduction <add>, %167, %cst_59 [1] : vector<8x8xf32> to vector<8xf32>
    %169 = vector.shape_cast %168 : vector<8xf32> to vector<8x1xf32>
    %170 = tpu.reciprocal %169 {approx = true} : vector<8x1xf32> -> vector<8x1xf32>
    %171 = vector.broadcast %170 : vector<8x1xf32> to vector<8x8xf32>
    %172 = arith.mulf %167, %171 : vector<8x8xf32>
    %cst_60 = arith.constant dense<0.000000e+00> : vector<8x8xf32>
    %173 = tpu.matmul %172, %128, %cst_60 {dimension_numbers = #tpu.dot_dimension_numbers<[1], [0], [0], [1], [0, 0, 1, 1], [], []>} : vector<8x8xf32>, vector<8x8xf32>, vector<8x8xf32> -> vector<8x8xf32>
    %c16 = arith.constant 16 : index
    %c0_61 = arith.constant 0 : index
    %174 = vector.load %arg8[%c16, %c0_61] : memref<32x32xf32, #tpu.memory_space<vmem>>, vector<8x32xf32>
    %cst_62 = arith.constant dense<0.000000e+00> : vector<8x32xf32>
    %175 = tpu.matmul %173, %174, %cst_62 {dimension_numbers = #tpu.dot_dimension_numbers<[1], [0], [0], [1], [0, 0, 1, 1], [], []>} : vector<8x8xf32>, vector<8x32xf32>, vector<8x32xf32> -> vector<8x32xf32>
    %176 = arith.addf %126, %175 : vector<8x32xf32>
    %177 = vector.extract_strided_slice %8 {offsets = [0, 24], sizes = [8, 8], strides = [1, 1]} : vector<8x32xf32> to vector<8x8xf32>
    %178 = vector.extract_strided_slice %13 {offsets = [0, 24], sizes = [8, 8], strides = [1, 1]} : vector<8x32xf32> to vector<8x8xf32>
    %cst_63 = arith.constant dense<0.000000e+00> : vector<8x8xf32>
    %179 = tpu.matmul %177, %177, %cst_63 {dimension_numbers = #tpu.dot_dimension_numbers<[1], [1], [0], [0], [0, 0, 1, 0], [], []>} : vector<8x8xf32>, vector<8x8xf32>, vector<8x8xf32> -> vector<8x8xf32>
    %cst_64 = arith.constant 0.353553385 : f32
    %180 = vector.broadcast %cst_64 : f32 to vector<8x8xf32>
    %181 = arith.mulf %179, %180 : vector<8x8xf32>
    %cst_65 = arith.constant dense<0xFF800000> : vector<8xf32>
    %182 = vector.multi_reduction <maximumf>, %181, %cst_65 [1] : vector<8x8xf32> to vector<8xf32>
    %183 = vector.shape_cast %182 : vector<8xf32> to vector<8x1xf32>
    %184 = vector.broadcast %183 : vector<8x1xf32> to vector<8x8xf32>
    %185 = arith.subf %181, %184 : vector<8x8xf32>
    %186 = math.exp %185 : vector<8x8xf32>
    %cst_66 = arith.constant dense<0.000000e+00> : vector<8xf32>
    %187 = vector.multi_reduction <add>, %186, %cst_66 [1] : vector<8x8xf32> to vector<8xf32>
    %188 = vector.shape_cast %187 : vector<8xf32> to vector<8x1xf32>
    %189 = tpu.reciprocal %188 {approx = true} : vector<8x1xf32> -> vector<8x1xf32>
    %190 = vector.broadcast %189 : vector<8x1xf32> to vector<8x8xf32>
    %191 = arith.mulf %186, %190 : vector<8x8xf32>
    %192 = arith.mulf %191, %18 : vector<8x8xf32>
    %cst_67 = arith.constant dense<0.000000e+00> : vector<8x8xf32>
    %193 = tpu.matmul %192, %21, %cst_67 {dimension_numbers = #tpu.dot_dimension_numbers<[1], [0], [0], [1], [0, 0, 1, 1], [], []>} : vector<8x8xf32>, vector<8x8xf32>, vector<8x8xf32> -> vector<8x8xf32>
    %cst_68 = arith.constant dense<0.000000e+00> : vector<8xf32>
    %194 = vector.multi_reduction <add>, %192, %cst_68 [1] : vector<8x8xf32> to vector<8xf32>
    %195 = vector.shape_cast %194 : vector<8xf32> to vector<8x1xf32>
    %196 = vector.broadcast %195 : vector<8x1xf32> to vector<8x8xf32>
    %197 = arith.subf %196, %193 : vector<8x8xf32>
    %198 = arith.mulf %197, %24 : vector<8x8xf32>
    %cst_69 = arith.constant 0.000000e+00 : f32
    %199 = vector.broadcast %cst_69 : f32 to vector<8x8xf32>
    %200 = arith.maximumf %198, %199 : vector<8x8xf32>
    %201 = math.sqrt %200 : vector<8x8xf32>
    %c3 = arith.constant 3 : index
    %202 = memref.load %arg1[%c3] : memref<4xf32, #tpu.memory_space<smem>>
    %203 = vector.broadcast %202 : f32 to vector<8x8xf32>
    %204 = arith.mulf %201, %203 : vector<8x8xf32>
    %205 = math.exp %204 : vector<8x8xf32>
    %cst_70 = arith.constant 9.99999974E-6 : f32
    %cst_71 = arith.constant 1.000000e+05 : f32
    %206 = vector.broadcast %cst_70 : f32 to vector<8x8xf32>
    %207 = arith.maximumf %206, %205 : vector<8x8xf32>
    %208 = vector.broadcast %cst_71 : f32 to vector<8x8xf32>
    %209 = arith.minimumf %208, %207 : vector<8x8xf32>
    %210 = arith.mulf %181, %209 : vector<8x8xf32>
    %cst_72 = arith.constant -1.000000e+32 : f32
    %211 = vector.broadcast %cst_72 : f32 to vector<8x8xf32>
    %212 = arith.select %16, %210, %211 : vector<8x8xi1>, vector<8x8xf32>
    %cst_73 = arith.constant dense<0xFF800000> : vector<8xf32>
    %213 = vector.multi_reduction <maximumf>, %212, %cst_73 [1] : vector<8x8xf32> to vector<8xf32>
    %214 = vector.shape_cast %213 : vector<8xf32> to vector<8x1xf32>
    %215 = vector.broadcast %214 : vector<8x1xf32> to vector<8x8xf32>
    %216 = arith.subf %212, %215 : vector<8x8xf32>
    %217 = math.exp %216 : vector<8x8xf32>
    %cst_74 = arith.constant dense<0.000000e+00> : vector<8xf32>
    %218 = vector.multi_reduction <add>, %217, %cst_74 [1] : vector<8x8xf32> to vector<8xf32>
    %219 = vector.shape_cast %218 : vector<8xf32> to vector<8x1xf32>
    %220 = tpu.reciprocal %219 {approx = true} : vector<8x1xf32> -> vector<8x1xf32>
    %221 = vector.broadcast %220 : vector<8x1xf32> to vector<8x8xf32>
    %222 = arith.mulf %217, %221 : vector<8x8xf32>
    %cst_75 = arith.constant dense<0.000000e+00> : vector<8x8xf32>
    %223 = tpu.matmul %222, %178, %cst_75 {dimension_numbers = #tpu.dot_dimension_numbers<[1], [0], [0], [1], [0, 0, 1, 1], [], []>} : vector<8x8xf32>, vector<8x8xf32>, vector<8x8xf32> -> vector<8x8xf32>
    %c24 = arith.constant 24 : index
    %c0_76 = arith.constant 0 : index
    %224 = vector.load %arg8[%c24, %c0_76] : memref<32x32xf32, #tpu.memory_space<vmem>>, vector<8x32xf32>
    %cst_77 = arith.constant dense<0.000000e+00> : vector<8x32xf32>
    %225 = tpu.matmul %223, %224, %cst_77 {dimension_numbers = #tpu.dot_dimension_numbers<[1], [0], [0], [1], [0, 0, 1, 1], [], []>} : vector<8x8xf32>, vector<8x32xf32>, vector<8x32xf32> -> vector<8x32xf32>
    %226 = arith.addf %176, %225 : vector<8x32xf32>
    %227 = arith.addf %1, %226 : vector<8x32xf32>
    %c0_78 = arith.constant 0 : index
    %c0_79 = arith.constant 0 : index
    %228 = vector.load %arg10[%c0_78, %c0_79] : memref<1x32xf32, #tpu.memory_space<vmem>>, vector<1x32xf32>
    %c0_80 = arith.constant 0 : index
    %c0_81 = arith.constant 0 : index
    %229 = vector.load %arg11[%c0_80, %c0_81] : memref<1x32xf32, #tpu.memory_space<vmem>>, vector<1x32xf32>
    %cst_82 = arith.constant dense<0.000000e+00> : vector<8xf32>
    %230 = vector.multi_reduction <add>, %227, %cst_82 [1] : vector<8x32xf32> to vector<8xf32>
    %231 = vector.shape_cast %230 : vector<8xf32> to vector<8x1xf32>
    %cst_83 = arith.constant 3.200000e+01 : f32
    %232 = vector.broadcast %cst_83 : f32 to vector<8x1xf32>
    %233 = arith.divf %231, %232 : vector<8x1xf32>
    %234 = vector.broadcast %233 : vector<8x1xf32> to vector<8x32xf32>
    %235 = arith.subf %227, %234 : vector<8x32xf32>
    %236 = arith.mulf %235, %235 : vector<8x32xf32>
    %cst_84 = arith.constant dense<0.000000e+00> : vector<8xf32>
    %237 = vector.multi_reduction <add>, %236, %cst_84 [1] : vector<8x32xf32> to vector<8xf32>
    %238 = vector.shape_cast %237 : vector<8xf32> to vector<8x1xf32>
    %cst_85 = arith.constant 3.200000e+01 : f32
    %239 = vector.broadcast %cst_85 : f32 to vector<8x1xf32>
    %240 = arith.divf %238, %239 : vector<8x1xf32>
    %241 = vector.broadcast %233 : vector<8x1xf32> to vector<8x32xf32>
    %242 = arith.subf %227, %241 : vector<8x32xf32>
    %cst_86 = arith.constant 9.99999974E-6 : f32
    %243 = vector.broadcast %cst_86 : f32 to vector<8x1xf32>
    %244 = arith.addf %240, %243 : vector<8x1xf32>
    %245 = math.rsqrt %244 : vector<8x1xf32>
    %246 = vector.broadcast %245 : vector<8x1xf32> to vector<8x32xf32>
    %247 = arith.mulf %242, %246 : vector<8x32xf32>
    %248 = vector.broadcast %228 : vector<1x32xf32> to vector<8x32xf32>
    %249 = arith.mulf %247, %248 : vector<8x32xf32>
    %250 = vector.broadcast %229 : vector<1x32xf32> to vector<8x32xf32>
    %251 = arith.addf %249, %250 : vector<8x32xf32>
    %c0_87 = arith.constant 0 : index
    %c0_88 = arith.constant 0 : index
    %c0_89 = arith.constant 0 : index
    %252 = vector.load %arg18[%c0_87, %c0_88, %c0_89] : memref<1x8x32xf32, #tpu.memory_space<vmem>>, vector<1x8x32xf32>
    %253 = vector.shape_cast %252 : vector<1x8x32xf32> to vector<8x32xf32>
    %254 = vector.shape_cast %251 : vector<8x32xf32> to vector<1x8x32xf32>
    tpu.vector_store %arg18[%c0_87, %c0_88, %c0_89], %254 {strides = array<i32>} : memref<1x8x32xf32, #tpu.memory_space<vmem>>, vector<1x8x32xf32>,
    return
  }
  func.func @transform_0(%arg0: i32, %arg1: memref<4xf32, #tpu.memory_space<smem>>) -> (i32, i32, i32) {
    %c0_i32 = arith.constant 0 : i32
    %c0_i32_0 = arith.constant 0 : i32
    %c0_i32_1 = arith.constant 0 : i32
    return %arg0, %c0_i32, %c0_i32_0 : i32, i32, i32
  }
  func.func @transform_1(%arg0: i32, %arg1: memref<4xf32, #tpu.memory_space<smem>>) -> (i32, i32, i32) {
    %c0_i32 = arith.constant 0 : i32
    %c0_i32_0 = arith.constant 0 : i32
    %c0_i32_1 = arith.constant 0 : i32
    return %arg0, %c0_i32, %c0_i32_0 : i32, i32, i32
  }
  func.func @transform_2(%arg0: i32, %arg1: memref<4xf32, #tpu.memory_space<smem>>) -> (i32, i32) {
    %c0_i32 = arith.constant 0 : i32
    %c0_i32_0 = arith.constant 0 : i32
    %c0_i32_1 = arith.constant 0 : i32
    return %c0_i32, %c0_i32_0 : i32, i32
  }
  func.func @transform_3(%arg0: i32, %arg1: memref<4xf32, #tpu.memory_space<smem>>) -> (i32, i32) {
    %c0_i32 = arith.constant 0 : i32
    %c0_i32_0 = arith.constant 0 : i32
    %c0_i32_1 = arith.constant 0 : i32
    return %c0_i32, %c0_i32_0 : i32, i32
  }
  func.func @transform_4(%arg0: i32, %arg1: memref<4xf32, #tpu.memory_space<smem>>) -> (i32, i32) {
    %c0_i32 = arith.constant 0 : i32
    %c0_i32_0 = arith.constant 0 : i32
    %c0_i32_1 = arith.constant 0 : i32
    return %c0_i32, %c0_i32_0 : i32, i32
  }
  func.func @transform_5(%arg0: i32, %arg1: memref<4xf32, #tpu.memory_space<smem>>) -> (i32, i32) {
    %c0_i32 = arith.constant 0 : i32
    %c0_i32_0 = arith.constant 0 : i32
    %c0_i32_1 = arith.constant 0 : i32
    return %c0_i32, %c0_i32_0 : i32, i32
  }
  func.func @transform_6(%arg0: i32, %arg1: memref<4xf32, #tpu.memory_space<smem>>) -> (i32, i32) {
    %c0_i32 = arith.constant 0 : i32
    %c0_i32_0 = arith.constant 0 : i32
    %c0_i32_1 = arith.constant 0 : i32
    return %c0_i32, %c0_i32_0 : i32, i32
  }
  func.func @transform_7(%arg0: i32, %arg1: memref<4xf32, #tpu.memory_space<smem>>) -> (i32, i32) {
    %c0_i32 = arith.constant 0 : i32
    %c0_i32_0 = arith.constant 0 : i32
    %c0_i32_1 = arith.constant 0 : i32
    return %c0_i32, %c0_i32_0 : i32, i32
  }
  func.func @transform_8(%arg0: i32, %arg1: memref<4xf32, #tpu.memory_space<smem>>) -> (i32, i32) {
    %c0_i32 = arith.constant 0 : i32
    %c0_i32_0 = arith.constant 0 : i32
    %c0_i32_1 = arith.constant 0 : i32
    return %c0_i32, %c0_i32_0 : i32, i32
  }
  func.func @transform_9(%arg0: i32, %arg1: memref<4xf32, #tpu.memory_space<smem>>) -> (i32, i32) {
    %c0_i32 = arith.constant 0 : i32
    %c0_i32_0 = arith.constant 0 : i32
    %c0_i32_1 = arith.constant 0 : i32
    return %c0_i32, %c0_i32_0 : i32, i32
  }
  func.func @transform_10(%arg0: i32, %arg1: memref<4xf32, #tpu.memory_space<smem>>) -> (i32, i32) {
    %c0_i32 = arith.constant 0 : i32
    %c0_i32_0 = arith.constant 0 : i32
    %c0_i32_1 = arith.constant 0 : i32
    return %c0_i32, %c0_i32_0 : i32, i32
  }
  func.func @transform_11(%arg0: i32, %arg1: memref<4xf32, #tpu.memory_space<smem>>) -> (i32, i32) {
    %c0_i32 = arith.constant 0 : i32
    %c0_i32_0 = arith.constant 0 : i32
    %c0_i32_1 = arith.constant 0 : i32
    return %c0_i32, %c0_i32_0 : i32, i32
  }
  func.func @transform_12(%arg0: i32, %arg1: memref<4xf32, #tpu.memory_space<smem>>) -> (i32, i32) {
    %c0_i32 = arith.constant 0 : i32
    %c0_i32_0 = arith.constant 0 : i32
    %c0_i32_1 = arith.constant 0 : i32
    return %c0_i32, %c0_i32_0 : i32, i32
  }
  func.func @transform_13(%arg0: i32, %arg1: memref<4xf32, #tpu.memory_space<smem>>) -> (i32, i32) {
    %c0_i32 = arith.constant 0 : i32
    %c0_i32_0 = arith.constant 0 : i32
    %c0_i32_1 = arith.constant 0 : i32
    return %c0_i32, %c0_i32_0 : i32, i32
  }
  func.func @transform_14(%arg0: i32, %arg1: memref<4xf32, #tpu.memory_space<smem>>) -> (i32, i32) {
    %c0_i32 = arith.constant 0 : i32
    %c0_i32_0 = arith.constant 0 : i32
    %c0_i32_1 = arith.constant 0 : i32
    return %c0_i32, %c0_i32_0 : i32, i32
  }
  func.func @transform_15(%arg0: i32, %arg1: memref<4xf32, #tpu.memory_space<smem>>) -> (i32, i32) {
    %c0_i32 = arith.constant 0 : i32
    %c0_i32_0 = arith.constant 0 : i32
    %c0_i32_1 = arith.constant 0 : i32
    return %c0_i32, %c0_i32_0 : i32, i32
  }
  func.func @transform_16(%arg0: i32, %arg1: memref<4xf32, #tpu.memory_space<smem>>) -> (i32, i32, i32) {
    %c0_i32 = arith.constant 0 : i32
    %c0_i32_0 = arith.constant 0 : i32
    %c0_i32_1 = arith.constant 0 : i32
    return %arg0, %c0_i32, %c0_i32_0 : i32, i32, i32
  }
}

module attributes {stable_mosaic.version = 11 : i64} {
  func.func @_fused_layer_kernel(%arg0: i32, %arg1: memref<4xf32, #tpu.memory_space<smem>>, %arg2: memref<1x8x32xf32, #tpu.memory_space<vmem>>, %arg3: memref<1x8x32xf32, #tpu.memory_space<vmem>>, %arg4: memref<32x32xf32, #tpu.memory_space<vmem>>, %arg5: memref<1x32xf32, #tpu.memory_space<vmem>>, %arg6: memref<32x32xf32, #tpu.memory_space<vmem>>, %arg7: memref<1x32xf32, #tpu.memory_space<vmem>>, %arg8: memref<32x32xf32, #tpu.memory_space<vmem>>, %arg9: memref<1x32xf32, #tpu.memory_space<vmem>>, %arg10: memref<1x32xf32, #tpu.memory_space<vmem>>, %arg11: memref<1x32xf32, #tpu.memory_space<vmem>>, %arg12: memref<32x64xf32, #tpu.memory_space<vmem>>, %arg13: memref<1x64xf32, #tpu.memory_space<vmem>>, %arg14: memref<64x32xf32, #tpu.memory_space<vmem>>, %arg15: memref<1x32xf32, #tpu.memory_space<vmem>>, %arg16: memref<1x32xf32, #tpu.memory_space<vmem>>, %arg17: memref<1x32xf32, #tpu.memory_space<vmem>>, %arg18: memref<1x8x32xf32, #tpu.memory_space<vmem>>) attributes {dimension_semantics = [#tpu.dimension_semantics<parallel>], iteration_bounds = array<i64: 2>, scalar_prefetch = 1 : i64, scratch_operands = 0 : i64, tpu.core_type = #tpu.core_type<tc>, window_params = [{transform_indices = @transform_0, window_bounds = array<i64: 1, 8, 32>}, {transform_indices = @transform_1, window_bounds = array<i64: 1, 8, 32>}, {pipeline_mode = #tpu.pipeline_mode<synchronous>, transform_indices = @transform_2, window_bounds = array<i64: 32, 32>}, {pipeline_mode = #tpu.pipeline_mode<synchronous>, transform_indices = @transform_3, window_bounds = array<i64: 1, 32>}, {pipeline_mode = #tpu.pipeline_mode<synchronous>, transform_indices = @transform_4, window_bounds = array<i64: 32, 32>}, {pipeline_mode = #tpu.pipeline_mode<synchronous>, transform_indices = @transform_5, window_bounds = array<i64: 1, 32>}, {pipeline_mode = #tpu.pipeline_mode<synchronous>, transform_indices = @transform_6, window_bounds = array<i64: 32, 32>}, {pipeline_mode = #tpu.pipeline_mode<synchronous>, transform_indices = @transform_7, window_bounds = array<i64: 1, 32>}, {pipeline_mode = #tpu.pipeline_mode<synchronous>, transform_indices = @transform_8, window_bounds = array<i64: 1, 32>}, {pipeline_mode = #tpu.pipeline_mode<synchronous>, transform_indices = @transform_9, window_bounds = array<i64: 1, 32>}, {pipeline_mode = #tpu.pipeline_mode<synchronous>, transform_indices = @transform_10, window_bounds = array<i64: 32, 64>}, {pipeline_mode = #tpu.pipeline_mode<synchronous>, transform_indices = @transform_11, window_bounds = array<i64: 1, 64>}, {pipeline_mode = #tpu.pipeline_mode<synchronous>, transform_indices = @transform_12, window_bounds = array<i64: 64, 32>}, {pipeline_mode = #tpu.pipeline_mode<synchronous>, transform_indices = @transform_13, window_bounds = array<i64: 1, 32>}, {pipeline_mode = #tpu.pipeline_mode<synchronous>, transform_indices = @transform_14, window_bounds = array<i64: 1, 32>}, {pipeline_mode = #tpu.pipeline_mode<synchronous>, transform_indices = @transform_15, window_bounds = array<i64: 1, 32>}, {transform_indices = @transform_16, window_bounds = array<i64: 1, 8, 32>}]} {
    %c0 = arith.constant 0 : index
    %c0_0 = arith.constant 0 : index
    %c0_1 = arith.constant 0 : index
    %0 = vector.load %arg2[%c0, %c0_0, %c0_1] : memref<1x8x32xf32, #tpu.memory_space<vmem>>, vector<1x8x32xf32>
    %1 = vector.shape_cast %0 : vector<1x8x32xf32> to vector<8x32xf32>
    %c0_2 = arith.constant 0 : index
    %c0_3 = arith.constant 0 : index
    %c0_4 = arith.constant 0 : index
    %2 = vector.load %arg3[%c0_2, %c0_3, %c0_4] : memref<1x8x32xf32, #tpu.memory_space<vmem>>, vector<1x8x32xf32>
    %3 = vector.shape_cast %2 : vector<1x8x32xf32> to vector<8x32xf32>
    %c0_5 = arith.constant 0 : index
    %c0_6 = arith.constant 0 : index
    %4 = vector.load %arg4[%c0_5, %c0_6] : memref<32x32xf32, #tpu.memory_space<vmem>>, vector<32x32xf32>
    %cst = arith.constant dense<0.000000e+00> : vector<8x32xf32>
    %5 = tpu.matmul %1, %4, %cst {dimension_numbers = #tpu.dot_dimension_numbers<[1], [0], [0], [1], [0, 0, 1, 1], [], []>} : vector<8x32xf32>, vector<32x32xf32>, vector<8x32xf32> -> vector<8x32xf32>
    %c0_7 = arith.constant 0 : index
    %c0_8 = arith.constant 0 : index
    %6 = vector.load %arg5[%c0_7, %c0_8] : memref<1x32xf32, #tpu.memory_space<vmem>>, vector<1x32xf32>
    %7 = vector.broadcast %6 : vector<1x32xf32> to vector<8x32xf32>
    %8 = arith.addf %5, %7 : vector<8x32xf32>
    %c0_9 = arith.constant 0 : index
    %c0_10 = arith.constant 0 : index
    %9 = vector.load %arg6[%c0_9, %c0_10] : memref<32x32xf32, #tpu.memory_space<vmem>>, vector<32x32xf32>
    %cst_11 = arith.constant dense<0.000000e+00> : vector<8x32xf32>
    %10 = tpu.matmul %3, %9, %cst_11 {dimension_numbers = #tpu.dot_dimension_numbers<[1], [0], [0], [1], [0, 0, 1, 1], [], []>} : vector<8x32xf32>, vector<32x32xf32>, vector<8x32xf32> -> vector<8x32xf32>
    %c0_12 = arith.constant 0 : index
    %c0_13 = arith.constant 0 : index
    %11 = vector.load %arg7[%c0_12, %c0_13] : memref<1x32xf32, #tpu.memory_space<vmem>>, vector<1x32xf32>
    %12 = vector.broadcast %11 : vector<1x32xf32> to vector<8x32xf32>
    %13 = arith.addf %10, %12 : vector<8x32xf32>
    %14 = tpu.iota {dimensions = array<i32: 0>} : vector<8x8xi32>
    %15 = tpu.iota {dimensions = array<i32: 1>} : vector<8x8xi32>
    %16 = arith.cmpi sle, %15, %14 : vector<8x8xi32>
    %17 = arith.extui %16 : vector<8x8xi1> to vector<8x8xi32>
    %18 = arith.sitofp %17 : vector<8x8xi32> to vector<8x8xf32>
    %19 = arith.cmpi sle, %14, %15 : vector<8x8xi32>
    %20 = arith.extui %19 : vector<8x8xi1> to vector<8x8xi32>
    %21 = arith.sitofp %20 : vector<8x8xi32> to vector<8x8xf32>
    %22 = arith.subi %15, %14 : vector<8x8xi32>
    %23 = math.absi %22 : vector<8x8xi32>
    %24 = arith.sitofp %23 : vector<8x8xi32> to vector<8x8xf32>
    %c0_14 = arith.constant 0 : index
    %c0_15 = arith.constant 0 : index
    %25 = vector.load %arg9[%c0_14, %c0_15] : memref<1x32xf32, #tpu.memory_space<vmem>>, vector<1x32xf32>
    %26 = vector.extract_strided_slice %8 {offsets = [0, 0], sizes = [8, 8], strides = [1, 1]} : vector<8x32xf32> to vector<8x8xf32>
    %27 = vector.extract_strided_slice %13 {offsets = [0, 0], sizes = [8, 8], strides = [1, 1]} : vector<8x32xf32> to vector<8x8xf32>
    %cst_16 = arith.constant dense<0.000000e+00> : vector<8x8xf32>
    %28 = tpu.matmul %26, %26, %cst_16 {dimension_numbers = #tpu.dot_dimension_numbers<[1], [1], [0], [0], [0, 0, 1, 0], [], []>} : vector<8x8xf32>, vector<8x8xf32>, vector<8x8xf32> -> vector<8x8xf32>
    %cst_17 = arith.constant 0.353553385 : f32
    %29 = vector.broadcast %cst_17 : f32 to vector<8x8xf32>
    %30 = arith.mulf %28, %29 : vector<8x8xf32>
    %cst_18 = arith.constant dense<0xFF800000> : vector<8xf32>
    %31 = vector.multi_reduction <maximumf>, %30, %cst_18 [1] : vector<8x8xf32> to vector<8xf32>
    %32 = vector.shape_cast %31 : vector<8xf32> to vector<8x1xf32>
    %33 = vector.broadcast %32 : vector<8x1xf32> to vector<8x8xf32>
    %34 = arith.subf %30, %33 : vector<8x8xf32>
    %35 = math.exp %34 : vector<8x8xf32>
    %cst_19 = arith.constant dense<0.000000e+00> : vector<8xf32>
    %36 = vector.multi_reduction <add>, %35, %cst_19 [1] : vector<8x8xf32> to vector<8xf32>
    %37 = vector.shape_cast %36 : vector<8xf32> to vector<8x1xf32>
    %38 = tpu.reciprocal %37 {approx = true} : vector<8x1xf32> -> vector<8x1xf32>
    %39 = vector.broadcast %38 : vector<8x1xf32> to vector<8x8xf32>
    %40 = arith.mulf %35, %39 : vector<8x8xf32>
    %41 = arith.mulf %40, %18 : vector<8x8xf32>
    %cst_20 = arith.constant dense<0.000000e+00> : vector<8x8xf32>
    %42 = tpu.matmul %41, %21, %cst_20 {dimension_numbers = #tpu.dot_dimension_numbers<[1], [0], [0], [1], [0, 0, 1, 1], [], []>} : vector<8x8xf32>, vector<8x8xf32>, vector<8x8xf32> -> vector<8x8xf32>
    %cst_21 = arith.constant dense<0.000000e+00> : vector<8xf32>
    %43 = vector.multi_reduction <add>, %41, %cst_21 [1] : vector<8x8xf32> to vector<8xf32>
    %44 = vector.shape_cast %43 : vector<8xf32> to vector<8x1xf32>
    %45 = vector.broadcast %44 : vector<8x1xf32> to vector<8x8xf32>
    %46 = arith.subf %45, %42 : vector<8x8xf32>
    %47 = arith.mulf %46, %24 : vector<8x8xf32>
    %cst_22 = arith.constant 0.000000e+00 : f32
    %48 = vector.broadcast %cst_22 : f32 to vector<8x8xf32>
    %49 = arith.maximumf %47, %48 : vector<8x8xf32>
    %50 = math.sqrt %49 : vector<8x8xf32>
    %c0_23 = arith.constant 0 : index
    %51 = memref.load %arg1[%c0_23] : memref<4xf32, #tpu.memory_space<smem>>
    %52 = vector.broadcast %51 : f32 to vector<8x8xf32>
    %53 = arith.mulf %50, %52 : vector<8x8xf32>
    %54 = math.exp %53 : vector<8x8xf32>
    %cst_24 = arith.constant 9.99999974E-6 : f32
    %cst_25 = arith.constant 1.000000e+05 : f32
    %55 = vector.broadcast %cst_24 : f32 to vector<8x8xf32>
    %56 = arith.maximumf %55, %54 : vector<8x8xf32>
    %57 = vector.broadcast %cst_25 : f32 to vector<8x8xf32>
    %58 = arith.minimumf %57, %56 : vector<8x8xf32>
    %59 = arith.mulf %30, %58 : vector<8x8xf32>
    %cst_26 = arith.constant -1.000000e+32 : f32
    %60 = vector.broadcast %cst_26 : f32 to vector<8x8xf32>
    %61 = arith.select %16, %59, %60 : vector<8x8xi1>, vector<8x8xf32>
    %cst_27 = arith.constant dense<0xFF800000> : vector<8xf32>
    %62 = vector.multi_reduction <maximumf>, %61, %cst_27 [1] : vector<8x8xf32> to vector<8xf32>
    %63 = vector.shape_cast %62 : vector<8xf32> to vector<8x1xf32>
    %64 = vector.broadcast %63 : vector<8x1xf32> to vector<8x8xf32>
    %65 = arith.subf %61, %64 : vector<8x8xf32>
    %66 = math.exp %65 : vector<8x8xf32>
    %cst_28 = arith.constant dense<0.000000e+00> : vector<8xf32>
    %67 = vector.multi_reduction <add>, %66, %cst_28 [1] : vector<8x8xf32> to vector<8xf32>
    %68 = vector.shape_cast %67 : vector<8xf32> to vector<8x1xf32>
    %69 = tpu.reciprocal %68 {approx = true} : vector<8x1xf32> -> vector<8x1xf32>
    %70 = vector.broadcast %69 : vector<8x1xf32> to vector<8x8xf32>
    %71 = arith.mulf %66, %70 : vector<8x8xf32>
    %cst_29 = arith.constant dense<0.000000e+00> : vector<8x8xf32>
    %72 = tpu.matmul %71, %27, %cst_29 {dimension_numbers = #tpu.dot_dimension_numbers<[1], [0], [0], [1], [0, 0, 1, 1], [], []>} : vector<8x8xf32>, vector<8x8xf32>, vector<8x8xf32> -> vector<8x8xf32>
    %c0_30 = arith.constant 0 : index
    %c0_31 = arith.constant 0 : index
    %73 = vector.load %arg8[%c0_30, %c0_31] : memref<32x32xf32, #tpu.memory_space<vmem>>, vector<8x32xf32>
    %cst_32 = arith.constant dense<0.000000e+00> : vector<8x32xf32>
    %74 = tpu.matmul %72, %73, %cst_32 {dimension_numbers = #tpu.dot_dimension_numbers<[1], [0], [0], [1], [0, 0, 1, 1], [], []>} : vector<8x8xf32>, vector<8x32xf32>, vector<8x32xf32> -> vector<8x32xf32>
    %75 = vector.broadcast %25 : vector<1x32xf32> to vector<8x32xf32>
    %76 = arith.addf %75, %74 : vector<8x32xf32>
    %77 = vector.extract_strided_slice %8 {offsets = [0, 8], sizes = [8, 8], strides = [1, 1]} : vector<8x32xf32> to vector<8x8xf32>
    %78 = vector.extract_strided_slice %13 {offsets = [0, 8], sizes = [8, 8], strides = [1, 1]} : vector<8x32xf32> to vector<8x8xf32>
    %cst_33 = arith.constant dense<0.000000e+00> : vector<8x8xf32>
    %79 = tpu.matmul %77, %77, %cst_33 {dimension_numbers = #tpu.dot_dimension_numbers<[1], [1], [0], [0], [0, 0, 1, 0], [], []>} : vector<8x8xf32>, vector<8x8xf32>, vector<8x8xf32> -> vector<8x8xf32>
    %cst_34 = arith.constant 0.353553385 : f32
    %80 = vector.broadcast %cst_34 : f32 to vector<8x8xf32>
    %81 = arith.mulf %79, %80 : vector<8x8xf32>
    %cst_35 = arith.constant dense<0xFF800000> : vector<8xf32>
    %82 = vector.multi_reduction <maximumf>, %81, %cst_35 [1] : vector<8x8xf32> to vector<8xf32>
    %83 = vector.shape_cast %82 : vector<8xf32> to vector<8x1xf32>
    %84 = vector.broadcast %83 : vector<8x1xf32> to vector<8x8xf32>
    %85 = arith.subf %81, %84 : vector<8x8xf32>
    %86 = math.exp %85 : vector<8x8xf32>
    %cst_36 = arith.constant dense<0.000000e+00> : vector<8xf32>
    %87 = vector.multi_reduction <add>, %86, %cst_36 [1] : vector<8x8xf32> to vector<8xf32>
    %88 = vector.shape_cast %87 : vector<8xf32> to vector<8x1xf32>
    %89 = tpu.reciprocal %88 {approx = true} : vector<8x1xf32> -> vector<8x1xf32>
    %90 = vector.broadcast %89 : vector<8x1xf32> to vector<8x8xf32>
    %91 = arith.mulf %86, %90 : vector<8x8xf32>
    %92 = arith.mulf %91, %18 : vector<8x8xf32>
    %cst_37 = arith.constant dense<0.000000e+00> : vector<8x8xf32>
    %93 = tpu.matmul %92, %21, %cst_37 {dimension_numbers = #tpu.dot_dimension_numbers<[1], [0], [0], [1], [0, 0, 1, 1], [], []>} : vector<8x8xf32>, vector<8x8xf32>, vector<8x8xf32> -> vector<8x8xf32>
    %cst_38 = arith.constant dense<0.000000e+00> : vector<8xf32>
    %94 = vector.multi_reduction <add>, %92, %cst_38 [1] : vector<8x8xf32> to vector<8xf32>
    %95 = vector.shape_cast %94 : vector<8xf32> to vector<8x1xf32>
    %96 = vector.broadcast %95 : vector<8x1xf32> to vector<8x8xf32>
    %97 = arith.subf %96, %93 : vector<8x8xf32>
    %98 = arith.mulf %97, %24 : vector<8x8xf32>
    %cst_39 = arith.constant 0.000000e+00 : f32
    %99 = vector.broadcast %cst_39 : f32 to vector<8x8xf32>
    %100 = arith.maximumf %98, %99 : vector<8x8xf32>
    %101 = math.sqrt %100 : vector<8x8xf32>
    %c1 = arith.constant 1 : index
    %102 = memref.load %arg1[%c1] : memref<4xf32, #tpu.memory_space<smem>>
    %103 = vector.broadcast %102 : f32 to vector<8x8xf32>
    %104 = arith.mulf %101, %103 : vector<8x8xf32>
    %105 = math.exp %104 : vector<8x8xf32>
    %cst_40 = arith.constant 9.99999974E-6 : f32
    %cst_41 = arith.constant 1.000000e+05 : f32
    %106 = vector.broadcast %cst_40 : f32 to vector<8x8xf32>
    %107 = arith.maximumf %106, %105 : vector<8x8xf32>
    %108 = vector.broadcast %cst_41 : f32 to vector<8x8xf32>
    %109 = arith.minimumf %108, %107 : vector<8x8xf32>
    %110 = arith.mulf %81, %109 : vector<8x8xf32>
    %cst_42 = arith.constant -1.000000e+32 : f32
    %111 = vector.broadcast %cst_42 : f32 to vector<8x8xf32>
    %112 = arith.select %16, %110, %111 : vector<8x8xi1>, vector<8x8xf32>
    %cst_43 = arith.constant dense<0xFF800000> : vector<8xf32>
    %113 = vector.multi_reduction <maximumf>, %112, %cst_43 [1] : vector<8x8xf32> to vector<8xf32>
    %114 = vector.shape_cast %113 : vector<8xf32> to vector<8x1xf32>
    %115 = vector.broadcast %114 : vector<8x1xf32> to vector<8x8xf32>
    %116 = arith.subf %112, %115 : vector<8x8xf32>
    %117 = math.exp %116 : vector<8x8xf32>
    %cst_44 = arith.constant dense<0.000000e+00> : vector<8xf32>
    %118 = vector.multi_reduction <add>, %117, %cst_44 [1] : vector<8x8xf32> to vector<8xf32>
    %119 = vector.shape_cast %118 : vector<8xf32> to vector<8x1xf32>
    %120 = tpu.reciprocal %119 {approx = true} : vector<8x1xf32> -> vector<8x1xf32>
    %121 = vector.broadcast %120 : vector<8x1xf32> to vector<8x8xf32>
    %122 = arith.mulf %117, %121 : vector<8x8xf32>
    %cst_45 = arith.constant dense<0.000000e+00> : vector<8x8xf32>
    %123 = tpu.matmul %122, %78, %cst_45 {dimension_numbers = #tpu.dot_dimension_numbers<[1], [0], [0], [1], [0, 0, 1, 1], [], []>} : vector<8x8xf32>, vector<8x8xf32>, vector<8x8xf32> -> vector<8x8xf32>
    %c8 = arith.constant 8 : index
    %c0_46 = arith.constant 0 : index
    %124 = vector.load %arg8[%c8, %c0_46] : memref<32x32xf32, #tpu.memory_space<vmem>>, vector<8x32xf32>
    %cst_47 = arith.constant dense<0.000000e+00> : vector<8x32xf32>
    %125 = tpu.matmul %123, %124, %cst_47 {dimension_numbers = #tpu.dot_dimension_numbers<[1], [0], [0], [1], [0, 0, 1, 1], [], []>} : vector<8x8xf32>, vector<8x32xf32>, vector<8x32xf32> -> vector<8x32xf32>
    %126 = arith.addf %76, %125 : vector<8x32xf32>
    %127 = vector.extract_strided_slice %8 {offsets = [0, 16], sizes = [8, 8], strides = [1, 1]} : vector<8x32xf32> to vector<8x8xf32>
    %128 = vector.extract_strided_slice %13 {offsets = [0, 16], sizes = [8, 8], strides = [1, 1]} : vector<8x32xf32> to vector<8x8xf32>
    %cst_48 = arith.constant dense<0.000000e+00> : vector<8x8xf32>
    %129 = tpu.matmul %127, %127, %cst_48 {dimension_numbers = #tpu.dot_dimension_numbers<[1], [1], [0], [0], [0, 0, 1, 0], [], []>} : vector<8x8xf32>, vector<8x8xf32>, vector<8x8xf32> -> vector<8x8xf32>
    %cst_49 = arith.constant 0.353553385 : f32
    %130 = vector.broadcast %cst_49 : f32 to vector<8x8xf32>
    %131 = arith.mulf %129, %130 : vector<8x8xf32>
    %cst_50 = arith.constant dense<0xFF800000> : vector<8xf32>
    %132 = vector.multi_reduction <maximumf>, %131, %cst_50 [1] : vector<8x8xf32> to vector<8xf32>
    %133 = vector.shape_cast %132 : vector<8xf32> to vector<8x1xf32>
    %134 = vector.broadcast %133 : vector<8x1xf32> to vector<8x8xf32>
    %135 = arith.subf %131, %134 : vector<8x8xf32>
    %136 = math.exp %135 : vector<8x8xf32>
    %cst_51 = arith.constant dense<0.000000e+00> : vector<8xf32>
    %137 = vector.multi_reduction <add>, %136, %cst_51 [1] : vector<8x8xf32> to vector<8xf32>
    %138 = vector.shape_cast %137 : vector<8xf32> to vector<8x1xf32>
    %139 = tpu.reciprocal %138 {approx = true} : vector<8x1xf32> -> vector<8x1xf32>
    %140 = vector.broadcast %139 : vector<8x1xf32> to vector<8x8xf32>
    %141 = arith.mulf %136, %140 : vector<8x8xf32>
    %142 = arith.mulf %141, %18 : vector<8x8xf32>
    %cst_52 = arith.constant dense<0.000000e+00> : vector<8x8xf32>
    %143 = tpu.matmul %142, %21, %cst_52 {dimension_numbers = #tpu.dot_dimension_numbers<[1], [0], [0], [1], [0, 0, 1, 1], [], []>} : vector<8x8xf32>, vector<8x8xf32>, vector<8x8xf32> -> vector<8x8xf32>
    %cst_53 = arith.constant dense<0.000000e+00> : vector<8xf32>
    %144 = vector.multi_reduction <add>, %142, %cst_53 [1] : vector<8x8xf32> to vector<8xf32>
    %145 = vector.shape_cast %144 : vector<8xf32> to vector<8x1xf32>
    %146 = vector.broadcast %145 : vector<8x1xf32> to vector<8x8xf32>
    %147 = arith.subf %146, %143 : vector<8x8xf32>
    %148 = arith.mulf %147, %24 : vector<8x8xf32>
    %cst_54 = arith.constant 0.000000e+00 : f32
    %149 = vector.broadcast %cst_54 : f32 to vector<8x8xf32>
    %150 = arith.maximumf %148, %149 : vector<8x8xf32>
    %151 = math.sqrt %150 : vector<8x8xf32>
    %c2 = arith.constant 2 : index
    %152 = memref.load %arg1[%c2] : memref<4xf32, #tpu.memory_space<smem>>
    %153 = vector.broadcast %152 : f32 to vector<8x8xf32>
    %154 = arith.mulf %151, %153 : vector<8x8xf32>
    %155 = math.exp %154 : vector<8x8xf32>
    %cst_55 = arith.constant 9.99999974E-6 : f32
    %cst_56 = arith.constant 1.000000e+05 : f32
    %156 = vector.broadcast %cst_55 : f32 to vector<8x8xf32>
    %157 = arith.maximumf %156, %155 : vector<8x8xf32>
    %158 = vector.broadcast %cst_56 : f32 to vector<8x8xf32>
    %159 = arith.minimumf %158, %157 : vector<8x8xf32>
    %160 = arith.mulf %131, %159 : vector<8x8xf32>
    %cst_57 = arith.constant -1.000000e+32 : f32
    %161 = vector.broadcast %cst_57 : f32 to vector<8x8xf32>
    %162 = arith.select %16, %160, %161 : vector<8x8xi1>, vector<8x8xf32>
    %cst_58 = arith.constant dense<0xFF800000> : vector<8xf32>
    %163 = vector.multi_reduction <maximumf>, %162, %cst_58 [1] : vector<8x8xf32> to vector<8xf32>
    %164 = vector.shape_cast %163 : vector<8xf32> to vector<8x1xf32>
    %165 = vector.broadcast %164 : vector<8x1xf32> to vector<8x8xf32>
    %166 = arith.subf %162, %165 : vector<8x8xf32>
    %167 = math.exp %166 : vector<8x8xf32>
    %cst_59 = arith.constant dense<0.000000e+00> : vector<8xf32>
    %168 = vector.multi_reduction <add>, %167, %cst_59 [1] : vector<8x8xf32> to vector<8xf32>
    %169 = vector.shape_cast %168 : vector<8xf32> to vector<8x1xf32>
    %170 = tpu.reciprocal %169 {approx = true} : vector<8x1xf32> -> vector<8x1xf32>
    %171 = vector.broadcast %170 : vector<8x1xf32> to vector<8x8xf32>
    %172 = arith.mulf %167, %171 : vector<8x8xf32>
    %cst_60 = arith.constant dense<0.000000e+00> : vector<8x8xf32>
    %173 = tpu.matmul %172, %128, %cst_60 {dimension_numbers = #tpu.dot_dimension_numbers<[1], [0], [0], [1], [0, 0, 1, 1], [], []>} : vector<8x8xf32>, vector<8x8xf32>, vector<8x8xf32> -> vector<8x8xf32>
    %c16 = arith.constant 16 : index
    %c0_61 = arith.constant 0 : index
    %174 = vector.load %arg8[%c16, %c0_61] : memref<32x32xf32, #tpu.memory_space<vmem>>, vector<8x32xf32>
    %cst_62 = arith.constant dense<0.000000e+00> : vector<8x32xf32>
    %175 = tpu.matmul %173, %174, %cst_62 {dimension_numbers = #tpu.dot_dimension_numbers<[1], [0], [0], [1], [0, 0, 1, 1], [], []>} : vector<8x8xf32>, vector<8x32xf32>, vector<8x32xf32> -> vector<8x32xf32>
    %176 = arith.addf %126, %175 : vector<8x32xf32>
    %177 = vector.extract_strided_slice %8 {offsets = [0, 24], sizes = [8, 8], strides = [1, 1]} : vector<8x32xf32> to vector<8x8xf32>
    %178 = vector.extract_strided_slice %13 {offsets = [0, 24], sizes = [8, 8], strides = [1, 1]} : vector<8x32xf32> to vector<8x8xf32>
    %cst_63 = arith.constant dense<0.000000e+00> : vector<8x8xf32>
    %179 = tpu.matmul %177, %177, %cst_63 {dimension_numbers = #tpu.dot_dimension_numbers<[1], [1], [0], [0], [0, 0, 1, 0], [], []>} : vector<8x8xf32>, vector<8x8xf32>, vector<8x8xf32> -> vector<8x8xf32>
    %cst_64 = arith.constant 0.353553385 : f32
    %180 = vector.broadcast %cst_64 : f32 to vector<8x8xf32>
    %181 = arith.mulf %179, %180 : vector<8x8xf32>
    %cst_65 = arith.constant dense<0xFF800000> : vector<8xf32>
    %182 = vector.multi_reduction <maximumf>, %181, %cst_65 [1] : vector<8x8xf32> to vector<8xf32>
    %183 = vector.shape_cast %182 : vector<8xf32> to vector<8x1xf32>
    %184 = vector.broadcast %183 : vector<8x1xf32> to vector<8x8xf32>
    %185 = arith.subf %181, %184 : vector<8x8xf32>
    %186 = math.exp %185 : vector<8x8xf32>
    %cst_66 = arith.constant dense<0.000000e+00> : vector<8xf32>
    %187 = vector.multi_reduction <add>, %186, %cst_66 [1] : vector<8x8xf32> to vector<8xf32>
    %188 = vector.shape_cast %187 : vector<8xf32> to vector<8x1xf32>
    %189 = tpu.reciprocal %188 {approx = true} : vector<8x1xf32> -> vector<8x1xf32>
    %190 = vector.broadcast %189 : vector<8x1xf32> to vector<8x8xf32>
    %191 = arith.mulf %186, %190 : vector<8x8xf32>
    %192 = arith.mulf %191, %18 : vector<8x8xf32>
    %cst_67 = arith.constant dense<0.000000e+00> : vector<8x8xf32>
    %193 = tpu.matmul %192, %21, %cst_67 {dimension_numbers = #tpu.dot_dimension_numbers<[1], [0], [0], [1], [0, 0, 1, 1], [], []>} : vector<8x8xf32>, vector<8x8xf32>, vector<8x8xf32> -> vector<8x8xf32>
    %cst_68 = arith.constant dense<0.000000e+00> : vector<8xf32>
    %194 = vector.multi_reduction <add>, %192, %cst_68 [1] : vector<8x8xf32> to vector<8xf32>
    %195 = vector.shape_cast %194 : vector<8xf32> to vector<8x1xf32>
    %196 = vector.broadcast %195 : vector<8x1xf32> to vector<8x8xf32>
    %197 = arith.subf %196, %193 : vector<8x8xf32>
    %198 = arith.mulf %197, %24 : vector<8x8xf32>
    %cst_69 = arith.constant 0.000000e+00 : f32
    %199 = vector.broadcast %cst_69 : f32 to vector<8x8xf32>
    %200 = arith.maximumf %198, %199 : vector<8x8xf32>
    %201 = math.sqrt %200 : vector<8x8xf32>
    %c3 = arith.constant 3 : index
    %202 = memref.load %arg1[%c3] : memref<4xf32, #tpu.memory_space<smem>>
    %203 = vector.broadcast %202 : f32 to vector<8x8xf32>
    %204 = arith.mulf %201, %203 : vector<8x8xf32>
    %205 = math.exp %204 : vector<8x8xf32>
    %cst_70 = arith.constant 9.99999974E-6 : f32
    %cst_71 = arith.constant 1.000000e+05 : f32
    %206 = vector.broadcast %cst_70 : f32 to vector<8x8xf32>
    %207 = arith.maximumf %206, %205 : vector<8x8xf32>
    %208 = vector.broadcast %cst_71 : f32 to vector<8x8xf32>
    %209 = arith.minimumf %208, %207 : vector<8x8xf32>
    %210 = arith.mulf %181, %209 : vector<8x8xf32>
    %cst_72 = arith.constant -1.000000e+32 : f32
    %211 = vector.broadcast %cst_72 : f32 to vector<8x8xf32>
    %212 = arith.select %16, %210, %211 : vector<8x8xi1>, vector<8x8xf32>
    %cst_73 = arith.constant dense<0xFF800000> : vector<8xf32>
    %213 = vector.multi_reduction <maximumf>, %212, %cst_73 [1] : vector<8x8xf32> to vector<8xf32>
    %214 = vector.shape_cast %213 : vector<8xf32> to vector<8x1xf32>
    %215 = vector.broadcast %214 : vector<8x1xf32> to vector<8x8xf32>
    %216 = arith.subf %212, %215 : vector<8x8xf32>
    %217 = math.exp %216 : vector<8x8xf32>
    %cst_74 = arith.constant dense<0.000000e+00> : vector<8xf32>
    %218 = vector.multi_reduction <add>, %217, %cst_74 [1] : vector<8x8xf32> to vector<8xf32>
    %219 = vector.shape_cast %218 : vector<8xf32> to vector<8x1xf32>
    %220 = tpu.reciprocal %219 {approx = true} : vector<8x1xf32> -> vector<8x1xf32>
    %221 = vector.broadcast %220 : vector<8x1xf32> to vector<8x8xf32>
    %222 = arith.mulf %217, %221 : vector<8x8xf32>
    %cst_75 = arith.constant dense<0.000000e+00> : vector<8x8xf32>
    %223 = tpu.matmul %222, %178, %cst_75 {dimension_numbers = #tpu.dot_dimension_numbers<[1], [0], [0], [1], [0, 0, 1, 1], [], []>} : vector<8x8xf32>, vector<8x8xf32>, vector<8x8xf32> -> vector<8x8xf32>
    %c24 = arith.constant 24 : index
    %c0_76 = arith.constant 0 : index
    %224 = vector.load %arg8[%c24, %c0_76] : memref<32x32xf32, #tpu.memory_space<vmem>>, vector<8x32xf32>
    %cst_77 = arith.constant dense<0.000000e+00> : vector<8x32xf32>
    %225 = tpu.matmul %223, %224, %cst_77 {dimension_numbers = #tpu.dot_dimension_numbers<[1], [0], [0], [1], [0, 0, 1, 1], [], []>} : vector<8x8xf32>, vector<8x32xf32>, vector<8x32xf32> -> vector<8x32xf32>
    %226 = arith.addf %176, %225 : vector<8x32xf32>
    %227 = arith.addf %1, %226 : vector<8x32xf32>
    %c0_78 = arith.constant 0 : index
    %c0_79 = arith.constant 0 : index
    %228 = vector.load %arg10[%c0_78, %c0_79] : memref<1x32xf32, #tpu.memory_space<vmem>>, vector<1x32xf32>
    %c0_80 = arith.constant 0 : index
    %c0_81 = arith.constant 0 : index
    %229 = vector.load %arg11[%c0_80, %c0_81] : memref<1x32xf32, #tpu.memory_space<vmem>>, vector<1x32xf32>
    %cst_82 = arith.constant dense<0.000000e+00> : vector<8xf32>
    %230 = vector.multi_reduction <add>, %227, %cst_82 [1] : vector<8x32xf32> to vector<8xf32>
    %231 = vector.shape_cast %230 : vector<8xf32> to vector<8x1xf32>
    %cst_83 = arith.constant 3.200000e+01 : f32
    %232 = vector.broadcast %cst_83 : f32 to vector<8x1xf32>
    %233 = arith.divf %231, %232 : vector<8x1xf32>
    %234 = vector.broadcast %233 : vector<8x1xf32> to vector<8x32xf32>
    %235 = arith.subf %227, %234 : vector<8x32xf32>
    %236 = arith.mulf %235, %235 : vector<8x32xf32>
    %cst_84 = arith.constant dense<0.000000e+00> : vector<8xf32>
    %237 = vector.multi_reduction <add>, %236, %cst_84 [1] : vector<8x32xf32> to vector<8xf32>
    %238 = vector.shape_cast %237 : vector<8xf32> to vector<8x1xf32>
    %cst_85 = arith.constant 3.200000e+01 : f32
    %239 = vector.broadcast %cst_85 : f32 to vector<8x1xf32>
    %240 = arith.divf %238, %239 : vector<8x1xf32>
    %241 = vector.broadcast %233 : vector<8x1xf32> to vector<8x32xf32>
    %242 = arith.subf %227, %241 : vector<8x32xf32>
    %cst_86 = arith.constant 9.99999974E-6 : f32
    %243 = vector.broadcast %cst_86 : f32 to vector<8x1xf32>
    %244 = arith.addf %240, %243 : vector<8x1xf32>
    %245 = math.rsqrt %244 : vector<8x1xf32>
    %246 = vector.broadcast %245 : vector<8x1xf32> to vector<8x32xf32>
    %247 = arith.mulf %242, %246 : vector<8x32xf32>
    %248 = vector.broadcast %228 : vector<1x32xf32> to vector<8x32xf32>
    %249 = arith.mulf %247, %248 : vector<8x32xf32>
    %250 = vector.broadcast %229 : vector<1x32xf32> to vector<8x32xf32>
    %251 = arith.addf %249, %250 : vector<8x32xf32>
    %c0_87 = arith.constant 0 : index
    %c0_88 = arith.constant 0 : index
    %252 = vector.load %arg12[%c0_87, %c0_88] : memref<32x64xf32, #tpu.memory_space<vmem>>, vector<32x64xf32>
    %cst_89 = arith.constant dense<0.000000e+00> : vector<8x64xf32>
    %253 = tpu.matmul %251, %252, %cst_89 {dimension_numbers = #tpu.dot_dimension_numbers<[1], [0], [0], [1], [0, 0, 1, 1], [], []>} : vector<8x32xf32>, vector<32x64xf32>, vector<8x64xf32> -> vector<8x64xf32>
    %c0_90 = arith.constant 0 : index
    %c0_91 = arith.constant 0 : index
    %254 = vector.load %arg13[%c0_90, %c0_91] : memref<1x64xf32, #tpu.memory_space<vmem>>, vector<1x64xf32>
    %255 = vector.broadcast %254 : vector<1x64xf32> to vector<8x64xf32>
    %256 = arith.addf %253, %255 : vector<8x64xf32>
    %cst_92 = arith.constant 0.000000e+00 : f32
    %257 = vector.broadcast %cst_92 : f32 to vector<8x64xf32>
    %258 = arith.maximumf %256, %257 : vector<8x64xf32>
    %c0_93 = arith.constant 0 : index
    %c0_94 = arith.constant 0 : index
    %259 = vector.load %arg14[%c0_93, %c0_94] : memref<64x32xf32, #tpu.memory_space<vmem>>, vector<64x32xf32>
    %cst_95 = arith.constant dense<0.000000e+00> : vector<8x32xf32>
    %260 = tpu.matmul %258, %259, %cst_95 {dimension_numbers = #tpu.dot_dimension_numbers<[1], [0], [0], [1], [0, 0, 1, 1], [], []>} : vector<8x64xf32>, vector<64x32xf32>, vector<8x32xf32> -> vector<8x32xf32>
    %c0_96 = arith.constant 0 : index
    %c0_97 = arith.constant 0 : index
    %261 = vector.load %arg15[%c0_96, %c0_97] : memref<1x32xf32, #tpu.memory_space<vmem>>, vector<1x32xf32>
    %262 = vector.broadcast %261 : vector<1x32xf32> to vector<8x32xf32>
    %263 = arith.addf %260, %262 : vector<8x32xf32>
    %264 = arith.addf %251, %263 : vector<8x32xf32>
    %c0_98 = arith.constant 0 : index
    %c0_99 = arith.constant 0 : index
    %265 = vector.load %arg16[%c0_98, %c0_99] : memref<1x32xf32, #tpu.memory_space<vmem>>, vector<1x32xf32>
    %c0_100 = arith.constant 0 : index
    %c0_101 = arith.constant 0 : index
    %266 = vector.load %arg17[%c0_100, %c0_101] : memref<1x32xf32, #tpu.memory_space<vmem>>, vector<1x32xf32>
    %cst_102 = arith.constant dense<0.000000e+00> : vector<8xf32>
    %267 = vector.multi_reduction <add>, %264, %cst_102 [1] : vector<8x32xf32> to vector<8xf32>
    %268 = vector.shape_cast %267 : vector<8xf32> to vector<8x1xf32>
    %cst_103 = arith.constant 3.200000e+01 : f32
    %269 = vector.broadcast %cst_103 : f32 to vector<8x1xf32>
    %270 = arith.divf %268, %269 : vector<8x1xf32>
    %271 = vector.broadcast %270 : vector<8x1xf32> to vector<8x32xf32>
    %272 = arith.subf %264, %271 : vector<8x32xf32>
    %273 = arith.mulf %272, %272 : vector<8x32xf32>
    %cst_104 = arith.constant dense<0.000000e+00> : vector<8xf32>
    %274 = vector.multi_reduction <add>, %273, %cst_104 [1] : vector<8x32xf32> to vector<8xf32>
    %275 = vector.shape_cast %274 : vector<8xf32> to vector<8x1xf32>
    %cst_105 = arith.constant 3.200000e+01 : f32
    %276 = vector.broadcast %cst_105 : f32 to vector<8x1xf32>
    %277 = arith.divf %275, %276 : vector<8x1xf32>
    %278 = vector.broadcast %270 : vector<8x1xf32> to vector<8x32xf32>
    %279 = arith.subf %264, %278 : vector<8x32xf32>
    %cst_106 = arith.constant 9.99999974E-6 : f32
    %280 = vector.broadcast %cst_106 : f32 to vector<8x1xf32>
    %281 = arith.addf %277, %280 : vector<8x1xf32>
    %282 = math.rsqrt %281 : vector<8x1xf32>
    %283 = vector.broadcast %282 : vector<8x1xf32> to vector<8x32xf32>
    %284 = arith.mulf %279, %283 : vector<8x32xf32>
    %285 = vector.broadcast %265 : vector<1x32xf32> to vector<8x32xf32>
    %286 = arith.mulf %284, %285 : vector<8x32xf32>
    %287 = vector.broadcast %266 : vector<1x32xf32> to vector<8x32xf32>
    %288 = arith.addf %286, %287 : vector<8x32xf32>
    %c0_107 = arith.constant 0 : index
    %c0_108 = arith.constant 0 : index
    %c0_109 = arith.constant 0 : index
    %289 = vector.load %arg18[%c0_107, %c0_108, %c0_109] : memref<1x8x32xf32, #tpu.memory_space<vmem>>, vector<1x8x32xf32>
    %290 = vector.shape_cast %289 : vector<1x8x32xf32> to vector<8x32xf32>
    %291 = vector.shape_cast %288 : vector<8x32xf32> to vector<1x8x32xf32>
    tpu.vector_store %arg18[%c0_107, %c0_108, %c0_109], %291 {strides = array<i32>} : memref<1x8x32xf32, #tpu.memory_space<vmem>>, vector<1x8x32xf32>,
    return
  }
  func.func @transform_0(%arg0: i32, %arg1: memref<4xf32, #tpu.memory_space<smem>>) -> (i32, i32, i32) {
    %c0_i32 = arith.constant 0 : i32
    %c0_i32_0 = arith.constant 0 : i32
    %c0_i32_1 = arith.constant 0 : i32
    return %arg0, %c0_i32, %c0_i32_0 : i32, i32, i32
  }
  func.func @transform_1(%arg0: i32, %arg1: memref<4xf32, #tpu.memory_space<smem>>) -> (i32, i32, i32) {
    %c0_i32 = arith.constant 0 : i32
    %c0_i32_0 = arith.constant 0 : i32
    %c0_i32_1 = arith.constant 0 : i32
    return %arg0, %c0_i32, %c0_i32_0 : i32, i32, i32
  }
  func.func @transform_2(%arg0: i32, %arg1: memref<4xf32, #tpu.memory_space<smem>>) -> (i32, i32) {
    %c0_i32 = arith.constant 0 : i32
    %c0_i32_0 = arith.constant 0 : i32
    %c0_i32_1 = arith.constant 0 : i32
    return %c0_i32, %c0_i32_0 : i32, i32
  }
  func.func @transform_3(%arg0: i32, %arg1: memref<4xf32, #tpu.memory_space<smem>>) -> (i32, i32) {
    %c0_i32 = arith.constant 0 : i32
    %c0_i32_0 = arith.constant 0 : i32
    %c0_i32_1 = arith.constant 0 : i32
    return %c0_i32, %c0_i32_0 : i32, i32
  }
  func.func @transform_4(%arg0: i32, %arg1: memref<4xf32, #tpu.memory_space<smem>>) -> (i32, i32) {
    %c0_i32 = arith.constant 0 : i32
    %c0_i32_0 = arith.constant 0 : i32
    %c0_i32_1 = arith.constant 0 : i32
    return %c0_i32, %c0_i32_0 : i32, i32
  }
  func.func @transform_5(%arg0: i32, %arg1: memref<4xf32, #tpu.memory_space<smem>>) -> (i32, i32) {
    %c0_i32 = arith.constant 0 : i32
    %c0_i32_0 = arith.constant 0 : i32
    %c0_i32_1 = arith.constant 0 : i32
    return %c0_i32, %c0_i32_0 : i32, i32
  }
  func.func @transform_6(%arg0: i32, %arg1: memref<4xf32, #tpu.memory_space<smem>>) -> (i32, i32) {
    %c0_i32 = arith.constant 0 : i32
    %c0_i32_0 = arith.constant 0 : i32
    %c0_i32_1 = arith.constant 0 : i32
    return %c0_i32, %c0_i32_0 : i32, i32
  }
  func.func @transform_7(%arg0: i32, %arg1: memref<4xf32, #tpu.memory_space<smem>>) -> (i32, i32) {
    %c0_i32 = arith.constant 0 : i32
    %c0_i32_0 = arith.constant 0 : i32
    %c0_i32_1 = arith.constant 0 : i32
    return %c0_i32, %c0_i32_0 : i32, i32
  }
  func.func @transform_8(%arg0: i32, %arg1: memref<4xf32, #tpu.memory_space<smem>>) -> (i32, i32) {
    %c0_i32 = arith.constant 0 : i32
    %c0_i32_0 = arith.constant 0 : i32
    %c0_i32_1 = arith.constant 0 : i32
    return %c0_i32, %c0_i32_0 : i32, i32
  }
  func.func @transform_9(%arg0: i32, %arg1: memref<4xf32, #tpu.memory_space<smem>>) -> (i32, i32) {
    %c0_i32 = arith.constant 0 : i32
    %c0_i32_0 = arith.constant 0 : i32
    %c0_i32_1 = arith.constant 0 : i32
    return %c0_i32, %c0_i32_0 : i32, i32
  }
  func.func @transform_10(%arg0: i32, %arg1: memref<4xf32, #tpu.memory_space<smem>>) -> (i32, i32) {
    %c0_i32 = arith.constant 0 : i32
    %c0_i32_0 = arith.constant 0 : i32
    %c0_i32_1 = arith.constant 0 : i32
    return %c0_i32, %c0_i32_0 : i32, i32
  }
  func.func @transform_11(%arg0: i32, %arg1: memref<4xf32, #tpu.memory_space<smem>>) -> (i32, i32) {
    %c0_i32 = arith.constant 0 : i32
    %c0_i32_0 = arith.constant 0 : i32
    %c0_i32_1 = arith.constant 0 : i32
    return %c0_i32, %c0_i32_0 : i32, i32
  }
  func.func @transform_12(%arg0: i32, %arg1: memref<4xf32, #tpu.memory_space<smem>>) -> (i32, i32) {
    %c0_i32 = arith.constant 0 : i32
    %c0_i32_0 = arith.constant 0 : i32
    %c0_i32_1 = arith.constant 0 : i32
    return %c0_i32, %c0_i32_0 : i32, i32
  }
  func.func @transform_13(%arg0: i32, %arg1: memref<4xf32, #tpu.memory_space<smem>>) -> (i32, i32) {
    %c0_i32 = arith.constant 0 : i32
    %c0_i32_0 = arith.constant 0 : i32
    %c0_i32_1 = arith.constant 0 : i32
    return %c0_i32, %c0_i32_0 : i32, i32
  }
  func.func @transform_14(%arg0: i32, %arg1: memref<4xf32, #tpu.memory_space<smem>>) -> (i32, i32) {
    %c0_i32 = arith.constant 0 : i32
    %c0_i32_0 = arith.constant 0 : i32
    %c0_i32_1 = arith.constant 0 : i32
    return %c0_i32, %c0_i32_0 : i32, i32
  }
  func.func @transform_15(%arg0: i32, %arg1: memref<4xf32, #tpu.memory_space<smem>>) -> (i32, i32) {
    %c0_i32 = arith.constant 0 : i32
    %c0_i32_0 = arith.constant 0 : i32
    %c0_i32_1 = arith.constant 0 : i32
    return %c0_i32, %c0_i32_0 : i32, i32
  }
  func.func @transform_16(%arg0: i32, %arg1: memref<4xf32, #tpu.memory_space<smem>>) -> (i32, i32, i32) {
    %c0_i32 = arith.constant 0 : i32
    %c0_i32_0 = arith.constant 0 : i32
    %c0_i32_1 = arith.constant 0 : i32
    return %arg0, %c0_i32, %c0_i32_0 : i32, i32, i32
  }
}

module attributes {stable_mosaic.version = 11 : i64} {
  func.func @_fused_layer_kernel(%arg0: i32, %arg1: memref<4xf32, #tpu.memory_space<smem>>, %arg2: memref<1x8x32xf32, #tpu.memory_space<vmem>>, %arg3: memref<1x8x32xf32, #tpu.memory_space<vmem>>, %arg4: memref<32x32xf32, #tpu.memory_space<vmem>>, %arg5: memref<1x32xf32, #tpu.memory_space<vmem>>, %arg6: memref<32x32xf32, #tpu.memory_space<vmem>>, %arg7: memref<1x32xf32, #tpu.memory_space<vmem>>, %arg8: memref<32x32xf32, #tpu.memory_space<vmem>>, %arg9: memref<1x32xf32, #tpu.memory_space<vmem>>, %arg10: memref<1x32xf32, #tpu.memory_space<vmem>>, %arg11: memref<1x32xf32, #tpu.memory_space<vmem>>, %arg12: memref<32x64xf32, #tpu.memory_space<vmem>>, %arg13: memref<1x64xf32, #tpu.memory_space<vmem>>, %arg14: memref<64x32xf32, #tpu.memory_space<vmem>>, %arg15: memref<1x32xf32, #tpu.memory_space<vmem>>, %arg16: memref<1x32xf32, #tpu.memory_space<vmem>>, %arg17: memref<1x32xf32, #tpu.memory_space<vmem>>, %arg18: memref<1x8x32xf32, #tpu.memory_space<vmem>>) attributes {dimension_semantics = [#tpu.dimension_semantics<parallel>], iteration_bounds = array<i64: 2>, scalar_prefetch = 1 : i64, scratch_operands = 0 : i64, tpu.core_type = #tpu.core_type<tc>, window_params = [{transform_indices = @transform_0, window_bounds = array<i64: 1, 8, 32>}, {transform_indices = @transform_1, window_bounds = array<i64: 1, 8, 32>}, {pipeline_mode = #tpu.pipeline_mode<synchronous>, transform_indices = @transform_2, window_bounds = array<i64: 32, 32>}, {pipeline_mode = #tpu.pipeline_mode<synchronous>, transform_indices = @transform_3, window_bounds = array<i64: 1, 32>}, {pipeline_mode = #tpu.pipeline_mode<synchronous>, transform_indices = @transform_4, window_bounds = array<i64: 32, 32>}, {pipeline_mode = #tpu.pipeline_mode<synchronous>, transform_indices = @transform_5, window_bounds = array<i64: 1, 32>}, {pipeline_mode = #tpu.pipeline_mode<synchronous>, transform_indices = @transform_6, window_bounds = array<i64: 32, 32>}, {pipeline_mode = #tpu.pipeline_mode<synchronous>, transform_indices = @transform_7, window_bounds = array<i64: 1, 32>}, {pipeline_mode = #tpu.pipeline_mode<synchronous>, transform_indices = @transform_8, window_bounds = array<i64: 1, 32>}, {pipeline_mode = #tpu.pipeline_mode<synchronous>, transform_indices = @transform_9, window_bounds = array<i64: 1, 32>}, {pipeline_mode = #tpu.pipeline_mode<synchronous>, transform_indices = @transform_10, window_bounds = array<i64: 32, 64>}, {pipeline_mode = #tpu.pipeline_mode<synchronous>, transform_indices = @transform_11, window_bounds = array<i64: 1, 64>}, {pipeline_mode = #tpu.pipeline_mode<synchronous>, transform_indices = @transform_12, window_bounds = array<i64: 64, 32>}, {pipeline_mode = #tpu.pipeline_mode<synchronous>, transform_indices = @transform_13, window_bounds = array<i64: 1, 32>}, {pipeline_mode = #tpu.pipeline_mode<synchronous>, transform_indices = @transform_14, window_bounds = array<i64: 1, 32>}, {pipeline_mode = #tpu.pipeline_mode<synchronous>, transform_indices = @transform_15, window_bounds = array<i64: 1, 32>}, {transform_indices = @transform_16, window_bounds = array<i64: 1, 8, 32>}]} {
    %c0 = arith.constant 0 : index
    %c0_0 = arith.constant 0 : index
    %c0_1 = arith.constant 0 : index
    %0 = vector.load %arg2[%c0, %c0_0, %c0_1] : memref<1x8x32xf32, #tpu.memory_space<vmem>>, vector<1x8x32xf32>
    %1 = vector.shape_cast %0 : vector<1x8x32xf32> to vector<8x32xf32>
    %c0_2 = arith.constant 0 : index
    %c0_3 = arith.constant 0 : index
    %c0_4 = arith.constant 0 : index
    %2 = vector.load %arg3[%c0_2, %c0_3, %c0_4] : memref<1x8x32xf32, #tpu.memory_space<vmem>>, vector<1x8x32xf32>
    %3 = vector.shape_cast %2 : vector<1x8x32xf32> to vector<8x32xf32>
    %c0_5 = arith.constant 0 : index
    %c0_6 = arith.constant 0 : index
    %4 = vector.load %arg4[%c0_5, %c0_6] : memref<32x32xf32, #tpu.memory_space<vmem>>, vector<32x32xf32>
    %cst = arith.constant dense<0.000000e+00> : vector<8x32xf32>
    %5 = tpu.matmul %1, %4, %cst {dimension_numbers = #tpu.dot_dimension_numbers<[1], [0], [0], [1], [0, 0, 1, 1], [], []>} : vector<8x32xf32>, vector<32x32xf32>, vector<8x32xf32> -> vector<8x32xf32>
    %c0_7 = arith.constant 0 : index
    %c0_8 = arith.constant 0 : index
    %6 = vector.load %arg5[%c0_7, %c0_8] : memref<1x32xf32, #tpu.memory_space<vmem>>, vector<1x32xf32>
    %7 = vector.broadcast %6 : vector<1x32xf32> to vector<8x32xf32>
    %8 = arith.addf %5, %7 : vector<8x32xf32>
    %c0_9 = arith.constant 0 : index
    %c0_10 = arith.constant 0 : index
    %9 = vector.load %arg6[%c0_9, %c0_10] : memref<32x32xf32, #tpu.memory_space<vmem>>, vector<32x32xf32>
    %cst_11 = arith.constant dense<0.000000e+00> : vector<8x32xf32>
    %10 = tpu.matmul %3, %9, %cst_11 {dimension_numbers = #tpu.dot_dimension_numbers<[1], [0], [0], [1], [0, 0, 1, 1], [], []>} : vector<8x32xf32>, vector<32x32xf32>, vector<8x32xf32> -> vector<8x32xf32>
    %c0_12 = arith.constant 0 : index
    %c0_13 = arith.constant 0 : index
    %11 = vector.load %arg7[%c0_12, %c0_13] : memref<1x32xf32, #tpu.memory_space<vmem>>, vector<1x32xf32>
    %12 = vector.broadcast %11 : vector<1x32xf32> to vector<8x32xf32>
    %13 = arith.addf %10, %12 : vector<8x32xf32>
    %14 = tpu.iota {dimensions = array<i32: 0>} : vector<8x8xi32>
    %15 = tpu.iota {dimensions = array<i32: 1>} : vector<8x8xi32>
    %16 = arith.cmpi slt, %15, %14 : vector<8x8xi32>
    %17 = arith.extui %16 : vector<8x8xi1> to vector<8x8xi32>
    %18 = arith.sitofp %17 : vector<8x8xi32> to vector<8x8xf32>
    %19 = arith.cmpi sle, %14, %15 : vector<8x8xi32>
    %20 = arith.extui %19 : vector<8x8xi1> to vector<8x8xi32>
    %21 = arith.sitofp %20 : vector<8x8xi32> to vector<8x8xf32>
    %22 = arith.subi %15, %14 : vector<8x8xi32>
    %23 = math.absi %22 : vector<8x8xi32>
    %24 = arith.sitofp %23 : vector<8x8xi32> to vector<8x8xf32>
    %c0_14 = arith.constant 0 : index
    %c0_15 = arith.constant 0 : index
    %25 = vector.load %arg9[%c0_14, %c0_15] : memref<1x32xf32, #tpu.memory_space<vmem>>, vector<1x32xf32>
    %26 = vector.extract_strided_slice %8 {offsets = [0, 0], sizes = [8, 8], strides = [1, 1]} : vector<8x32xf32> to vector<8x8xf32>
    %27 = vector.extract_strided_slice %13 {offsets = [0, 0], sizes = [8, 8], strides = [1, 1]} : vector<8x32xf32> to vector<8x8xf32>
    %cst_16 = arith.constant dense<0.000000e+00> : vector<8x8xf32>
    %28 = tpu.matmul %26, %26, %cst_16 {dimension_numbers = #tpu.dot_dimension_numbers<[1], [1], [0], [0], [0, 0, 1, 0], [], []>} : vector<8x8xf32>, vector<8x8xf32>, vector<8x8xf32> -> vector<8x8xf32>
    %cst_17 = arith.constant 0.353553385 : f32
    %29 = vector.broadcast %cst_17 : f32 to vector<8x8xf32>
    %30 = arith.mulf %28, %29 : vector<8x8xf32>
    %cst_18 = arith.constant dense<0xFF800000> : vector<8xf32>
    %31 = vector.multi_reduction <maximumf>, %30, %cst_18 [1] : vector<8x8xf32> to vector<8xf32>
    %32 = vector.shape_cast %31 : vector<8xf32> to vector<8x1xf32>
    %33 = vector.broadcast %32 : vector<8x1xf32> to vector<8x8xf32>
    %34 = arith.subf %30, %33 : vector<8x8xf32>
    %35 = math.exp %34 : vector<8x8xf32>
    %cst_19 = arith.constant dense<0.000000e+00> : vector<8xf32>
    %36 = vector.multi_reduction <add>, %35, %cst_19 [1] : vector<8x8xf32> to vector<8xf32>
    %37 = vector.shape_cast %36 : vector<8xf32> to vector<8x1xf32>
    %38 = tpu.reciprocal %37 {approx = true} : vector<8x1xf32> -> vector<8x1xf32>
    %39 = vector.broadcast %38 : vector<8x1xf32> to vector<8x8xf32>
    %40 = arith.mulf %35, %39 : vector<8x8xf32>
    %41 = arith.mulf %40, %18 : vector<8x8xf32>
    %cst_20 = arith.constant dense<0.000000e+00> : vector<8x8xf32>
    %42 = tpu.matmul %41, %21, %cst_20 {dimension_numbers = #tpu.dot_dimension_numbers<[1], [0], [0], [1], [0, 0, 1, 1], [], []>} : vector<8x8xf32>, vector<8x8xf32>, vector<8x8xf32> -> vector<8x8xf32>
    %cst_21 = arith.constant dense<0.000000e+00> : vector<8xf32>
    %43 = vector.multi_reduction <add>, %41, %cst_21 [1] : vector<8x8xf32> to vector<8xf32>
    %44 = vector.shape_cast %43 : vector<8xf32> to vector<8x1xf32>
    %45 = vector.broadcast %44 : vector<8x1xf32> to vector<8x8xf32>
    %46 = arith.subf %45, %42 : vector<8x8xf32>
    %47 = arith.mulf %46, %24 : vector<8x8xf32>
    %cst_22 = arith.constant 0.000000e+00 : f32
    %48 = vector.broadcast %cst_22 : f32 to vector<8x8xf32>
    %49 = arith.maximumf %47, %48 : vector<8x8xf32>
    %50 = math.sqrt %49 : vector<8x8xf32>
    %c0_23 = arith.constant 0 : index
    %51 = memref.load %arg1[%c0_23] : memref<4xf32, #tpu.memory_space<smem>>
    %52 = vector.broadcast %51 : f32 to vector<8x8xf32>
    %53 = arith.mulf %50, %52 : vector<8x8xf32>
    %54 = math.exp %53 : vector<8x8xf32>
    %cst_24 = arith.constant 9.99999974E-6 : f32
    %cst_25 = arith.constant 1.000000e+05 : f32
    %55 = vector.broadcast %cst_24 : f32 to vector<8x8xf32>
    %56 = arith.maximumf %55, %54 : vector<8x8xf32>
    %57 = vector.broadcast %cst_25 : f32 to vector<8x8xf32>
    %58 = arith.minimumf %57, %56 : vector<8x8xf32>
    %59 = arith.mulf %30, %58 : vector<8x8xf32>
    %cst_26 = arith.constant -1.000000e+32 : f32
    %60 = vector.broadcast %cst_26 : f32 to vector<8x8xf32>
    %61 = arith.select %16, %59, %60 : vector<8x8xi1>, vector<8x8xf32>
    %cst_27 = arith.constant dense<0xFF800000> : vector<8xf32>
    %62 = vector.multi_reduction <maximumf>, %61, %cst_27 [1] : vector<8x8xf32> to vector<8xf32>
    %63 = vector.shape_cast %62 : vector<8xf32> to vector<8x1xf32>
    %64 = vector.broadcast %63 : vector<8x1xf32> to vector<8x8xf32>
    %65 = arith.subf %61, %64 : vector<8x8xf32>
    %66 = math.exp %65 : vector<8x8xf32>
    %cst_28 = arith.constant dense<0.000000e+00> : vector<8xf32>
    %67 = vector.multi_reduction <add>, %66, %cst_28 [1] : vector<8x8xf32> to vector<8xf32>
    %68 = vector.shape_cast %67 : vector<8xf32> to vector<8x1xf32>
    %69 = tpu.reciprocal %68 {approx = true} : vector<8x1xf32> -> vector<8x1xf32>
    %70 = vector.broadcast %69 : vector<8x1xf32> to vector<8x8xf32>
    %71 = arith.mulf %66, %70 : vector<8x8xf32>
    %c0_i32 = arith.constant 0 : i32
    %72 = vector.broadcast %c0_i32 : i32 to vector<8x8xi32>
    %73 = arith.cmpi eq, %14, %72 : vector<8x8xi32>
    %cst_29 = arith.constant 0.000000e+00 : f32
    %74 = vector.broadcast %cst_29 : f32 to vector<8x8xf32>
    %75 = arith.select %73, %74, %71 : vector<8x8xi1>, vector<8x8xf32>
    %cst_30 = arith.constant dense<0.000000e+00> : vector<8x8xf32>
    %76 = tpu.matmul %75, %27, %cst_30 {dimension_numbers = #tpu.dot_dimension_numbers<[1], [0], [0], [1], [0, 0, 1, 1], [], []>} : vector<8x8xf32>, vector<8x8xf32>, vector<8x8xf32> -> vector<8x8xf32>
    %c0_31 = arith.constant 0 : index
    %c0_32 = arith.constant 0 : index
    %77 = vector.load %arg8[%c0_31, %c0_32] : memref<32x32xf32, #tpu.memory_space<vmem>>, vector<8x32xf32>
    %cst_33 = arith.constant dense<0.000000e+00> : vector<8x32xf32>
    %78 = tpu.matmul %76, %77, %cst_33 {dimension_numbers = #tpu.dot_dimension_numbers<[1], [0], [0], [1], [0, 0, 1, 1], [], []>} : vector<8x8xf32>, vector<8x32xf32>, vector<8x32xf32> -> vector<8x32xf32>
    %79 = vector.broadcast %25 : vector<1x32xf32> to vector<8x32xf32>
    %80 = arith.addf %79, %78 : vector<8x32xf32>
    %81 = vector.extract_strided_slice %8 {offsets = [0, 8], sizes = [8, 8], strides = [1, 1]} : vector<8x32xf32> to vector<8x8xf32>
    %82 = vector.extract_strided_slice %13 {offsets = [0, 8], sizes = [8, 8], strides = [1, 1]} : vector<8x32xf32> to vector<8x8xf32>
    %cst_34 = arith.constant dense<0.000000e+00> : vector<8x8xf32>
    %83 = tpu.matmul %81, %81, %cst_34 {dimension_numbers = #tpu.dot_dimension_numbers<[1], [1], [0], [0], [0, 0, 1, 0], [], []>} : vector<8x8xf32>, vector<8x8xf32>, vector<8x8xf32> -> vector<8x8xf32>
    %cst_35 = arith.constant 0.353553385 : f32
    %84 = vector.broadcast %cst_35 : f32 to vector<8x8xf32>
    %85 = arith.mulf %83, %84 : vector<8x8xf32>
    %cst_36 = arith.constant dense<0xFF800000> : vector<8xf32>
    %86 = vector.multi_reduction <maximumf>, %85, %cst_36 [1] : vector<8x8xf32> to vector<8xf32>
    %87 = vector.shape_cast %86 : vector<8xf32> to vector<8x1xf32>
    %88 = vector.broadcast %87 : vector<8x1xf32> to vector<8x8xf32>
    %89 = arith.subf %85, %88 : vector<8x8xf32>
    %90 = math.exp %89 : vector<8x8xf32>
    %cst_37 = arith.constant dense<0.000000e+00> : vector<8xf32>
    %91 = vector.multi_reduction <add>, %90, %cst_37 [1] : vector<8x8xf32> to vector<8xf32>
    %92 = vector.shape_cast %91 : vector<8xf32> to vector<8x1xf32>
    %93 = tpu.reciprocal %92 {approx = true} : vector<8x1xf32> -> vector<8x1xf32>
    %94 = vector.broadcast %93 : vector<8x1xf32> to vector<8x8xf32>
    %95 = arith.mulf %90, %94 : vector<8x8xf32>
    %96 = arith.mulf %95, %18 : vector<8x8xf32>
    %cst_38 = arith.constant dense<0.000000e+00> : vector<8x8xf32>
    %97 = tpu.matmul %96, %21, %cst_38 {dimension_numbers = #tpu.dot_dimension_numbers<[1], [0], [0], [1], [0, 0, 1, 1], [], []>} : vector<8x8xf32>, vector<8x8xf32>, vector<8x8xf32> -> vector<8x8xf32>
    %cst_39 = arith.constant dense<0.000000e+00> : vector<8xf32>
    %98 = vector.multi_reduction <add>, %96, %cst_39 [1] : vector<8x8xf32> to vector<8xf32>
    %99 = vector.shape_cast %98 : vector<8xf32> to vector<8x1xf32>
    %100 = vector.broadcast %99 : vector<8x1xf32> to vector<8x8xf32>
    %101 = arith.subf %100, %97 : vector<8x8xf32>
    %102 = arith.mulf %101, %24 : vector<8x8xf32>
    %cst_40 = arith.constant 0.000000e+00 : f32
    %103 = vector.broadcast %cst_40 : f32 to vector<8x8xf32>
    %104 = arith.maximumf %102, %103 : vector<8x8xf32>
    %105 = math.sqrt %104 : vector<8x8xf32>
    %c1 = arith.constant 1 : index
    %106 = memref.load %arg1[%c1] : memref<4xf32, #tpu.memory_space<smem>>
    %107 = vector.broadcast %106 : f32 to vector<8x8xf32>
    %108 = arith.mulf %105, %107 : vector<8x8xf32>
    %109 = math.exp %108 : vector<8x8xf32>
    %cst_41 = arith.constant 9.99999974E-6 : f32
    %cst_42 = arith.constant 1.000000e+05 : f32
    %110 = vector.broadcast %cst_41 : f32 to vector<8x8xf32>
    %111 = arith.maximumf %110, %109 : vector<8x8xf32>
    %112 = vector.broadcast %cst_42 : f32 to vector<8x8xf32>
    %113 = arith.minimumf %112, %111 : vector<8x8xf32>
    %114 = arith.mulf %85, %113 : vector<8x8xf32>
    %cst_43 = arith.constant -1.000000e+32 : f32
    %115 = vector.broadcast %cst_43 : f32 to vector<8x8xf32>
    %116 = arith.select %16, %114, %115 : vector<8x8xi1>, vector<8x8xf32>
    %cst_44 = arith.constant dense<0xFF800000> : vector<8xf32>
    %117 = vector.multi_reduction <maximumf>, %116, %cst_44 [1] : vector<8x8xf32> to vector<8xf32>
    %118 = vector.shape_cast %117 : vector<8xf32> to vector<8x1xf32>
    %119 = vector.broadcast %118 : vector<8x1xf32> to vector<8x8xf32>
    %120 = arith.subf %116, %119 : vector<8x8xf32>
    %121 = math.exp %120 : vector<8x8xf32>
    %cst_45 = arith.constant dense<0.000000e+00> : vector<8xf32>
    %122 = vector.multi_reduction <add>, %121, %cst_45 [1] : vector<8x8xf32> to vector<8xf32>
    %123 = vector.shape_cast %122 : vector<8xf32> to vector<8x1xf32>
    %124 = tpu.reciprocal %123 {approx = true} : vector<8x1xf32> -> vector<8x1xf32>
    %125 = vector.broadcast %124 : vector<8x1xf32> to vector<8x8xf32>
    %126 = arith.mulf %121, %125 : vector<8x8xf32>
    %c0_i32_46 = arith.constant 0 : i32
    %127 = vector.broadcast %c0_i32_46 : i32 to vector<8x8xi32>
    %128 = arith.cmpi eq, %14, %127 : vector<8x8xi32>
    %cst_47 = arith.constant 0.000000e+00 : f32
    %129 = vector.broadcast %cst_47 : f32 to vector<8x8xf32>
    %130 = arith.select %128, %129, %126 : vector<8x8xi1>, vector<8x8xf32>
    %cst_48 = arith.constant dense<0.000000e+00> : vector<8x8xf32>
    %131 = tpu.matmul %130, %82, %cst_48 {dimension_numbers = #tpu.dot_dimension_numbers<[1], [0], [0], [1], [0, 0, 1, 1], [], []>} : vector<8x8xf32>, vector<8x8xf32>, vector<8x8xf32> -> vector<8x8xf32>
    %c8 = arith.constant 8 : index
    %c0_49 = arith.constant 0 : index
    %132 = vector.load %arg8[%c8, %c0_49] : memref<32x32xf32, #tpu.memory_space<vmem>>, vector<8x32xf32>
    %cst_50 = arith.constant dense<0.000000e+00> : vector<8x32xf32>
    %133 = tpu.matmul %131, %132, %cst_50 {dimension_numbers = #tpu.dot_dimension_numbers<[1], [0], [0], [1], [0, 0, 1, 1], [], []>} : vector<8x8xf32>, vector<8x32xf32>, vector<8x32xf32> -> vector<8x32xf32>
    %134 = arith.addf %80, %133 : vector<8x32xf32>
    %135 = vector.extract_strided_slice %8 {offsets = [0, 16], sizes = [8, 8], strides = [1, 1]} : vector<8x32xf32> to vector<8x8xf32>
    %136 = vector.extract_strided_slice %13 {offsets = [0, 16], sizes = [8, 8], strides = [1, 1]} : vector<8x32xf32> to vector<8x8xf32>
    %cst_51 = arith.constant dense<0.000000e+00> : vector<8x8xf32>
    %137 = tpu.matmul %135, %135, %cst_51 {dimension_numbers = #tpu.dot_dimension_numbers<[1], [1], [0], [0], [0, 0, 1, 0], [], []>} : vector<8x8xf32>, vector<8x8xf32>, vector<8x8xf32> -> vector<8x8xf32>
    %cst_52 = arith.constant 0.353553385 : f32
    %138 = vector.broadcast %cst_52 : f32 to vector<8x8xf32>
    %139 = arith.mulf %137, %138 : vector<8x8xf32>
    %cst_53 = arith.constant dense<0xFF800000> : vector<8xf32>
    %140 = vector.multi_reduction <maximumf>, %139, %cst_53 [1] : vector<8x8xf32> to vector<8xf32>
    %141 = vector.shape_cast %140 : vector<8xf32> to vector<8x1xf32>
    %142 = vector.broadcast %141 : vector<8x1xf32> to vector<8x8xf32>
    %143 = arith.subf %139, %142 : vector<8x8xf32>
    %144 = math.exp %143 : vector<8x8xf32>
    %cst_54 = arith.constant dense<0.000000e+00> : vector<8xf32>
    %145 = vector.multi_reduction <add>, %144, %cst_54 [1] : vector<8x8xf32> to vector<8xf32>
    %146 = vector.shape_cast %145 : vector<8xf32> to vector<8x1xf32>
    %147 = tpu.reciprocal %146 {approx = true} : vector<8x1xf32> -> vector<8x1xf32>
    %148 = vector.broadcast %147 : vector<8x1xf32> to vector<8x8xf32>
    %149 = arith.mulf %144, %148 : vector<8x8xf32>
    %150 = arith.mulf %149, %18 : vector<8x8xf32>
    %cst_55 = arith.constant dense<0.000000e+00> : vector<8x8xf32>
    %151 = tpu.matmul %150, %21, %cst_55 {dimension_numbers = #tpu.dot_dimension_numbers<[1], [0], [0], [1], [0, 0, 1, 1], [], []>} : vector<8x8xf32>, vector<8x8xf32>, vector<8x8xf32> -> vector<8x8xf32>
    %cst_56 = arith.constant dense<0.000000e+00> : vector<8xf32>
    %152 = vector.multi_reduction <add>, %150, %cst_56 [1] : vector<8x8xf32> to vector<8xf32>
    %153 = vector.shape_cast %152 : vector<8xf32> to vector<8x1xf32>
    %154 = vector.broadcast %153 : vector<8x1xf32> to vector<8x8xf32>
    %155 = arith.subf %154, %151 : vector<8x8xf32>
    %156 = arith.mulf %155, %24 : vector<8x8xf32>
    %cst_57 = arith.constant 0.000000e+00 : f32
    %157 = vector.broadcast %cst_57 : f32 to vector<8x8xf32>
    %158 = arith.maximumf %156, %157 : vector<8x8xf32>
    %159 = math.sqrt %158 : vector<8x8xf32>
    %c2 = arith.constant 2 : index
    %160 = memref.load %arg1[%c2] : memref<4xf32, #tpu.memory_space<smem>>
    %161 = vector.broadcast %160 : f32 to vector<8x8xf32>
    %162 = arith.mulf %159, %161 : vector<8x8xf32>
    %163 = math.exp %162 : vector<8x8xf32>
    %cst_58 = arith.constant 9.99999974E-6 : f32
    %cst_59 = arith.constant 1.000000e+05 : f32
    %164 = vector.broadcast %cst_58 : f32 to vector<8x8xf32>
    %165 = arith.maximumf %164, %163 : vector<8x8xf32>
    %166 = vector.broadcast %cst_59 : f32 to vector<8x8xf32>
    %167 = arith.minimumf %166, %165 : vector<8x8xf32>
    %168 = arith.mulf %139, %167 : vector<8x8xf32>
    %cst_60 = arith.constant -1.000000e+32 : f32
    %169 = vector.broadcast %cst_60 : f32 to vector<8x8xf32>
    %170 = arith.select %16, %168, %169 : vector<8x8xi1>, vector<8x8xf32>
    %cst_61 = arith.constant dense<0xFF800000> : vector<8xf32>
    %171 = vector.multi_reduction <maximumf>, %170, %cst_61 [1] : vector<8x8xf32> to vector<8xf32>
    %172 = vector.shape_cast %171 : vector<8xf32> to vector<8x1xf32>
    %173 = vector.broadcast %172 : vector<8x1xf32> to vector<8x8xf32>
    %174 = arith.subf %170, %173 : vector<8x8xf32>
    %175 = math.exp %174 : vector<8x8xf32>
    %cst_62 = arith.constant dense<0.000000e+00> : vector<8xf32>
    %176 = vector.multi_reduction <add>, %175, %cst_62 [1] : vector<8x8xf32> to vector<8xf32>
    %177 = vector.shape_cast %176 : vector<8xf32> to vector<8x1xf32>
    %178 = tpu.reciprocal %177 {approx = true} : vector<8x1xf32> -> vector<8x1xf32>
    %179 = vector.broadcast %178 : vector<8x1xf32> to vector<8x8xf32>
    %180 = arith.mulf %175, %179 : vector<8x8xf32>
    %c0_i32_63 = arith.constant 0 : i32
    %181 = vector.broadcast %c0_i32_63 : i32 to vector<8x8xi32>
    %182 = arith.cmpi eq, %14, %181 : vector<8x8xi32>
    %cst_64 = arith.constant 0.000000e+00 : f32
    %183 = vector.broadcast %cst_64 : f32 to vector<8x8xf32>
    %184 = arith.select %182, %183, %180 : vector<8x8xi1>, vector<8x8xf32>
    %cst_65 = arith.constant dense<0.000000e+00> : vector<8x8xf32>
    %185 = tpu.matmul %184, %136, %cst_65 {dimension_numbers = #tpu.dot_dimension_numbers<[1], [0], [0], [1], [0, 0, 1, 1], [], []>} : vector<8x8xf32>, vector<8x8xf32>, vector<8x8xf32> -> vector<8x8xf32>
    %c16 = arith.constant 16 : index
    %c0_66 = arith.constant 0 : index
    %186 = vector.load %arg8[%c16, %c0_66] : memref<32x32xf32, #tpu.memory_space<vmem>>, vector<8x32xf32>
    %cst_67 = arith.constant dense<0.000000e+00> : vector<8x32xf32>
    %187 = tpu.matmul %185, %186, %cst_67 {dimension_numbers = #tpu.dot_dimension_numbers<[1], [0], [0], [1], [0, 0, 1, 1], [], []>} : vector<8x8xf32>, vector<8x32xf32>, vector<8x32xf32> -> vector<8x32xf32>
    %188 = arith.addf %134, %187 : vector<8x32xf32>
    %189 = vector.extract_strided_slice %8 {offsets = [0, 24], sizes = [8, 8], strides = [1, 1]} : vector<8x32xf32> to vector<8x8xf32>
    %190 = vector.extract_strided_slice %13 {offsets = [0, 24], sizes = [8, 8], strides = [1, 1]} : vector<8x32xf32> to vector<8x8xf32>
    %cst_68 = arith.constant dense<0.000000e+00> : vector<8x8xf32>
    %191 = tpu.matmul %189, %189, %cst_68 {dimension_numbers = #tpu.dot_dimension_numbers<[1], [1], [0], [0], [0, 0, 1, 0], [], []>} : vector<8x8xf32>, vector<8x8xf32>, vector<8x8xf32> -> vector<8x8xf32>
    %cst_69 = arith.constant 0.353553385 : f32
    %192 = vector.broadcast %cst_69 : f32 to vector<8x8xf32>
    %193 = arith.mulf %191, %192 : vector<8x8xf32>
    %cst_70 = arith.constant dense<0xFF800000> : vector<8xf32>
    %194 = vector.multi_reduction <maximumf>, %193, %cst_70 [1] : vector<8x8xf32> to vector<8xf32>
    %195 = vector.shape_cast %194 : vector<8xf32> to vector<8x1xf32>
    %196 = vector.broadcast %195 : vector<8x1xf32> to vector<8x8xf32>
    %197 = arith.subf %193, %196 : vector<8x8xf32>
    %198 = math.exp %197 : vector<8x8xf32>
    %cst_71 = arith.constant dense<0.000000e+00> : vector<8xf32>
    %199 = vector.multi_reduction <add>, %198, %cst_71 [1] : vector<8x8xf32> to vector<8xf32>
    %200 = vector.shape_cast %199 : vector<8xf32> to vector<8x1xf32>
    %201 = tpu.reciprocal %200 {approx = true} : vector<8x1xf32> -> vector<8x1xf32>
    %202 = vector.broadcast %201 : vector<8x1xf32> to vector<8x8xf32>
    %203 = arith.mulf %198, %202 : vector<8x8xf32>
    %204 = arith.mulf %203, %18 : vector<8x8xf32>
    %cst_72 = arith.constant dense<0.000000e+00> : vector<8x8xf32>
    %205 = tpu.matmul %204, %21, %cst_72 {dimension_numbers = #tpu.dot_dimension_numbers<[1], [0], [0], [1], [0, 0, 1, 1], [], []>} : vector<8x8xf32>, vector<8x8xf32>, vector<8x8xf32> -> vector<8x8xf32>
    %cst_73 = arith.constant dense<0.000000e+00> : vector<8xf32>
    %206 = vector.multi_reduction <add>, %204, %cst_73 [1] : vector<8x8xf32> to vector<8xf32>
    %207 = vector.shape_cast %206 : vector<8xf32> to vector<8x1xf32>
    %208 = vector.broadcast %207 : vector<8x1xf32> to vector<8x8xf32>
    %209 = arith.subf %208, %205 : vector<8x8xf32>
    %210 = arith.mulf %209, %24 : vector<8x8xf32>
    %cst_74 = arith.constant 0.000000e+00 : f32
    %211 = vector.broadcast %cst_74 : f32 to vector<8x8xf32>
    %212 = arith.maximumf %210, %211 : vector<8x8xf32>
    %213 = math.sqrt %212 : vector<8x8xf32>
    %c3 = arith.constant 3 : index
    %214 = memref.load %arg1[%c3] : memref<4xf32, #tpu.memory_space<smem>>
    %215 = vector.broadcast %214 : f32 to vector<8x8xf32>
    %216 = arith.mulf %213, %215 : vector<8x8xf32>
    %217 = math.exp %216 : vector<8x8xf32>
    %cst_75 = arith.constant 9.99999974E-6 : f32
    %cst_76 = arith.constant 1.000000e+05 : f32
    %218 = vector.broadcast %cst_75 : f32 to vector<8x8xf32>
    %219 = arith.maximumf %218, %217 : vector<8x8xf32>
    %220 = vector.broadcast %cst_76 : f32 to vector<8x8xf32>
    %221 = arith.minimumf %220, %219 : vector<8x8xf32>
    %222 = arith.mulf %193, %221 : vector<8x8xf32>
    %cst_77 = arith.constant -1.000000e+32 : f32
    %223 = vector.broadcast %cst_77 : f32 to vector<8x8xf32>
    %224 = arith.select %16, %222, %223 : vector<8x8xi1>, vector<8x8xf32>
    %cst_78 = arith.constant dense<0xFF800000> : vector<8xf32>
    %225 = vector.multi_reduction <maximumf>, %224, %cst_78 [1] : vector<8x8xf32> to vector<8xf32>
    %226 = vector.shape_cast %225 : vector<8xf32> to vector<8x1xf32>
    %227 = vector.broadcast %226 : vector<8x1xf32> to vector<8x8xf32>
    %228 = arith.subf %224, %227 : vector<8x8xf32>
    %229 = math.exp %228 : vector<8x8xf32>
    %cst_79 = arith.constant dense<0.000000e+00> : vector<8xf32>
    %230 = vector.multi_reduction <add>, %229, %cst_79 [1] : vector<8x8xf32> to vector<8xf32>
    %231 = vector.shape_cast %230 : vector<8xf32> to vector<8x1xf32>
    %232 = tpu.reciprocal %231 {approx = true} : vector<8x1xf32> -> vector<8x1xf32>
    %233 = vector.broadcast %232 : vector<8x1xf32> to vector<8x8xf32>
    %234 = arith.mulf %229, %233 : vector<8x8xf32>
    %c0_i32_80 = arith.constant 0 : i32
    %235 = vector.broadcast %c0_i32_80 : i32 to vector<8x8xi32>
    %236 = arith.cmpi eq, %14, %235 : vector<8x8xi32>
    %cst_81 = arith.constant 0.000000e+00 : f32
    %237 = vector.broadcast %cst_81 : f32 to vector<8x8xf32>
    %238 = arith.select %236, %237, %234 : vector<8x8xi1>, vector<8x8xf32>
    %cst_82 = arith.constant dense<0.000000e+00> : vector<8x8xf32>
    %239 = tpu.matmul %238, %190, %cst_82 {dimension_numbers = #tpu.dot_dimension_numbers<[1], [0], [0], [1], [0, 0, 1, 1], [], []>} : vector<8x8xf32>, vector<8x8xf32>, vector<8x8xf32> -> vector<8x8xf32>
    %c24 = arith.constant 24 : index
    %c0_83 = arith.constant 0 : index
    %240 = vector.load %arg8[%c24, %c0_83] : memref<32x32xf32, #tpu.memory_space<vmem>>, vector<8x32xf32>
    %cst_84 = arith.constant dense<0.000000e+00> : vector<8x32xf32>
    %241 = tpu.matmul %239, %240, %cst_84 {dimension_numbers = #tpu.dot_dimension_numbers<[1], [0], [0], [1], [0, 0, 1, 1], [], []>} : vector<8x8xf32>, vector<8x32xf32>, vector<8x32xf32> -> vector<8x32xf32>
    %242 = arith.addf %188, %241 : vector<8x32xf32>
    %243 = arith.addf %1, %242 : vector<8x32xf32>
    %c0_85 = arith.constant 0 : index
    %c0_86 = arith.constant 0 : index
    %244 = vector.load %arg10[%c0_85, %c0_86] : memref<1x32xf32, #tpu.memory_space<vmem>>, vector<1x32xf32>
    %c0_87 = arith.constant 0 : index
    %c0_88 = arith.constant 0 : index
    %245 = vector.load %arg11[%c0_87, %c0_88] : memref<1x32xf32, #tpu.memory_space<vmem>>, vector<1x32xf32>
    %cst_89 = arith.constant dense<0.000000e+00> : vector<8xf32>
    %246 = vector.multi_reduction <add>, %243, %cst_89 [1] : vector<8x32xf32> to vector<8xf32>
    %247 = vector.shape_cast %246 : vector<8xf32> to vector<8x1xf32>
    %cst_90 = arith.constant 3.200000e+01 : f32
    %248 = vector.broadcast %cst_90 : f32 to vector<8x1xf32>
    %249 = arith.divf %247, %248 : vector<8x1xf32>
    %250 = vector.broadcast %249 : vector<8x1xf32> to vector<8x32xf32>
    %251 = arith.subf %243, %250 : vector<8x32xf32>
    %252 = arith.mulf %251, %251 : vector<8x32xf32>
    %cst_91 = arith.constant dense<0.000000e+00> : vector<8xf32>
    %253 = vector.multi_reduction <add>, %252, %cst_91 [1] : vector<8x32xf32> to vector<8xf32>
    %254 = vector.shape_cast %253 : vector<8xf32> to vector<8x1xf32>
    %cst_92 = arith.constant 3.200000e+01 : f32
    %255 = vector.broadcast %cst_92 : f32 to vector<8x1xf32>
    %256 = arith.divf %254, %255 : vector<8x1xf32>
    %257 = vector.broadcast %249 : vector<8x1xf32> to vector<8x32xf32>
    %258 = arith.subf %243, %257 : vector<8x32xf32>
    %cst_93 = arith.constant 9.99999974E-6 : f32
    %259 = vector.broadcast %cst_93 : f32 to vector<8x1xf32>
    %260 = arith.addf %256, %259 : vector<8x1xf32>
    %261 = math.rsqrt %260 : vector<8x1xf32>
    %262 = vector.broadcast %261 : vector<8x1xf32> to vector<8x32xf32>
    %263 = arith.mulf %258, %262 : vector<8x32xf32>
    %264 = vector.broadcast %244 : vector<1x32xf32> to vector<8x32xf32>
    %265 = arith.mulf %263, %264 : vector<8x32xf32>
    %266 = vector.broadcast %245 : vector<1x32xf32> to vector<8x32xf32>
    %267 = arith.addf %265, %266 : vector<8x32xf32>
    %c0_94 = arith.constant 0 : index
    %c0_95 = arith.constant 0 : index
    %268 = vector.load %arg12[%c0_94, %c0_95] : memref<32x64xf32, #tpu.memory_space<vmem>>, vector<32x64xf32>
    %cst_96 = arith.constant dense<0.000000e+00> : vector<8x64xf32>
    %269 = tpu.matmul %267, %268, %cst_96 {dimension_numbers = #tpu.dot_dimension_numbers<[1], [0], [0], [1], [0, 0, 1, 1], [], []>} : vector<8x32xf32>, vector<32x64xf32>, vector<8x64xf32> -> vector<8x64xf32>
    %c0_97 = arith.constant 0 : index
    %c0_98 = arith.constant 0 : index
    %270 = vector.load %arg13[%c0_97, %c0_98] : memref<1x64xf32, #tpu.memory_space<vmem>>, vector<1x64xf32>
    %271 = vector.broadcast %270 : vector<1x64xf32> to vector<8x64xf32>
    %272 = arith.addf %269, %271 : vector<8x64xf32>
    %cst_99 = arith.constant 0.000000e+00 : f32
    %273 = vector.broadcast %cst_99 : f32 to vector<8x64xf32>
    %274 = arith.maximumf %272, %273 : vector<8x64xf32>
    %c0_100 = arith.constant 0 : index
    %c0_101 = arith.constant 0 : index
    %275 = vector.load %arg14[%c0_100, %c0_101] : memref<64x32xf32, #tpu.memory_space<vmem>>, vector<64x32xf32>
    %cst_102 = arith.constant dense<0.000000e+00> : vector<8x32xf32>
    %276 = tpu.matmul %274, %275, %cst_102 {dimension_numbers = #tpu.dot_dimension_numbers<[1], [0], [0], [1], [0, 0, 1, 1], [], []>} : vector<8x64xf32>, vector<64x32xf32>, vector<8x32xf32> -> vector<8x32xf32>
    %c0_103 = arith.constant 0 : index
    %c0_104 = arith.constant 0 : index
    %277 = vector.load %arg15[%c0_103, %c0_104] : memref<1x32xf32, #tpu.memory_space<vmem>>, vector<1x32xf32>
    %278 = vector.broadcast %277 : vector<1x32xf32> to vector<8x32xf32>
    %279 = arith.addf %276, %278 : vector<8x32xf32>
    %280 = arith.addf %267, %279 : vector<8x32xf32>
    %c0_105 = arith.constant 0 : index
    %c0_106 = arith.constant 0 : index
    %281 = vector.load %arg16[%c0_105, %c0_106] : memref<1x32xf32, #tpu.memory_space<vmem>>, vector<1x32xf32>
    %c0_107 = arith.constant 0 : index
    %c0_108 = arith.constant 0 : index
    %282 = vector.load %arg17[%c0_107, %c0_108] : memref<1x32xf32, #tpu.memory_space<vmem>>, vector<1x32xf32>
    %cst_109 = arith.constant dense<0.000000e+00> : vector<8xf32>
    %283 = vector.multi_reduction <add>, %280, %cst_109 [1] : vector<8x32xf32> to vector<8xf32>
    %284 = vector.shape_cast %283 : vector<8xf32> to vector<8x1xf32>
    %cst_110 = arith.constant 3.200000e+01 : f32
    %285 = vector.broadcast %cst_110 : f32 to vector<8x1xf32>
    %286 = arith.divf %284, %285 : vector<8x1xf32>
    %287 = vector.broadcast %286 : vector<8x1xf32> to vector<8x32xf32>
    %288 = arith.subf %280, %287 : vector<8x32xf32>
    %289 = arith.mulf %288, %288 : vector<8x32xf32>
    %cst_111 = arith.constant dense<0.000000e+00> : vector<8xf32>
    %290 = vector.multi_reduction <add>, %289, %cst_111 [1] : vector<8x32xf32> to vector<8xf32>
    %291 = vector.shape_cast %290 : vector<8xf32> to vector<8x1xf32>
    %cst_112 = arith.constant 3.200000e+01 : f32
    %292 = vector.broadcast %cst_112 : f32 to vector<8x1xf32>
    %293 = arith.divf %291, %292 : vector<8x1xf32>
    %294 = vector.broadcast %286 : vector<8x1xf32> to vector<8x32xf32>
    %295 = arith.subf %280, %294 : vector<8x32xf32>
    %cst_113 = arith.constant 9.99999974E-6 : f32
    %296 = vector.broadcast %cst_113 : f32 to vector<8x1xf32>
    %297 = arith.addf %293, %296 : vector<8x1xf32>
    %298 = math.rsqrt %297 : vector<8x1xf32>
    %299 = vector.broadcast %298 : vector<8x1xf32> to vector<8x32xf32>
    %300 = arith.mulf %295, %299 : vector<8x32xf32>
    %301 = vector.broadcast %281 : vector<1x32xf32> to vector<8x32xf32>
    %302 = arith.mulf %300, %301 : vector<8x32xf32>
    %303 = vector.broadcast %282 : vector<1x32xf32> to vector<8x32xf32>
    %304 = arith.addf %302, %303 : vector<8x32xf32>
    %c0_114 = arith.constant 0 : index
    %c0_115 = arith.constant 0 : index
    %c0_116 = arith.constant 0 : index
    %305 = vector.load %arg18[%c0_114, %c0_115, %c0_116] : memref<1x8x32xf32, #tpu.memory_space<vmem>>, vector<1x8x32xf32>
    %306 = vector.shape_cast %305 : vector<1x8x32xf32> to vector<8x32xf32>
    %307 = vector.shape_cast %304 : vector<8x32xf32> to vector<1x8x32xf32>
    tpu.vector_store %arg18[%c0_114, %c0_115, %c0_116], %307 {strides = array<i32>} : memref<1x8x32xf32, #tpu.memory_space<vmem>>, vector<1x8x32xf32>,
    return
  }
  func.func @transform_0(%arg0: i32, %arg1: memref<4xf32, #tpu.memory_space<smem>>) -> (i32, i32, i32) {
    %c0_i32 = arith.constant 0 : i32
    %c0_i32_0 = arith.constant 0 : i32
    %c0_i32_1 = arith.constant 0 : i32
    return %arg0, %c0_i32, %c0_i32_0 : i32, i32, i32
  }
  func.func @transform_1(%arg0: i32, %arg1: memref<4xf32, #tpu.memory_space<smem>>) -> (i32, i32, i32) {
    %c0_i32 = arith.constant 0 : i32
    %c0_i32_0 = arith.constant 0 : i32
    %c0_i32_1 = arith.constant 0 : i32
    return %arg0, %c0_i32, %c0_i32_0 : i32, i32, i32
  }
  func.func @transform_2(%arg0: i32, %arg1: memref<4xf32, #tpu.memory_space<smem>>) -> (i32, i32) {
    %c0_i32 = arith.constant 0 : i32
    %c0_i32_0 = arith.constant 0 : i32
    %c0_i32_1 = arith.constant 0 : i32
    return %c0_i32, %c0_i32_0 : i32, i32
  }
  func.func @transform_3(%arg0: i32, %arg1: memref<4xf32, #tpu.memory_space<smem>>) -> (i32, i32) {
    %c0_i32 = arith.constant 0 : i32
    %c0_i32_0 = arith.constant 0 : i32
    %c0_i32_1 = arith.constant 0 : i32
    return %c0_i32, %c0_i32_0 : i32, i32
  }
  func.func @transform_4(%arg0: i32, %arg1: memref<4xf32, #tpu.memory_space<smem>>) -> (i32, i32) {
    %c0_i32 = arith.constant 0 : i32
    %c0_i32_0 = arith.constant 0 : i32
    %c0_i32_1 = arith.constant 0 : i32
    return %c0_i32, %c0_i32_0 : i32, i32
  }
  func.func @transform_5(%arg0: i32, %arg1: memref<4xf32, #tpu.memory_space<smem>>) -> (i32, i32) {
    %c0_i32 = arith.constant 0 : i32
    %c0_i32_0 = arith.constant 0 : i32
    %c0_i32_1 = arith.constant 0 : i32
    return %c0_i32, %c0_i32_0 : i32, i32
  }
  func.func @transform_6(%arg0: i32, %arg1: memref<4xf32, #tpu.memory_space<smem>>) -> (i32, i32) {
    %c0_i32 = arith.constant 0 : i32
    %c0_i32_0 = arith.constant 0 : i32
    %c0_i32_1 = arith.constant 0 : i32
    return %c0_i32, %c0_i32_0 : i32, i32
  }
  func.func @transform_7(%arg0: i32, %arg1: memref<4xf32, #tpu.memory_space<smem>>) -> (i32, i32) {
    %c0_i32 = arith.constant 0 : i32
    %c0_i32_0 = arith.constant 0 : i32
    %c0_i32_1 = arith.constant 0 : i32
    return %c0_i32, %c0_i32_0 : i32, i32
  }
  func.func @transform_8(%arg0: i32, %arg1: memref<4xf32, #tpu.memory_space<smem>>) -> (i32, i32) {
    %c0_i32 = arith.constant 0 : i32
    %c0_i32_0 = arith.constant 0 : i32
    %c0_i32_1 = arith.constant 0 : i32
    return %c0_i32, %c0_i32_0 : i32, i32
  }
  func.func @transform_9(%arg0: i32, %arg1: memref<4xf32, #tpu.memory_space<smem>>) -> (i32, i32) {
    %c0_i32 = arith.constant 0 : i32
    %c0_i32_0 = arith.constant 0 : i32
    %c0_i32_1 = arith.constant 0 : i32
    return %c0_i32, %c0_i32_0 : i32, i32
  }
  func.func @transform_10(%arg0: i32, %arg1: memref<4xf32, #tpu.memory_space<smem>>) -> (i32, i32) {
    %c0_i32 = arith.constant 0 : i32
    %c0_i32_0 = arith.constant 0 : i32
    %c0_i32_1 = arith.constant 0 : i32
    return %c0_i32, %c0_i32_0 : i32, i32
  }
  func.func @transform_11(%arg0: i32, %arg1: memref<4xf32, #tpu.memory_space<smem>>) -> (i32, i32) {
    %c0_i32 = arith.constant 0 : i32
    %c0_i32_0 = arith.constant 0 : i32
    %c0_i32_1 = arith.constant 0 : i32
    return %c0_i32, %c0_i32_0 : i32, i32
  }
  func.func @transform_12(%arg0: i32, %arg1: memref<4xf32, #tpu.memory_space<smem>>) -> (i32, i32) {
    %c0_i32 = arith.constant 0 : i32
    %c0_i32_0 = arith.constant 0 : i32
    %c0_i32_1 = arith.constant 0 : i32
    return %c0_i32, %c0_i32_0 : i32, i32
  }
  func.func @transform_13(%arg0: i32, %arg1: memref<4xf32, #tpu.memory_space<smem>>) -> (i32, i32) {
    %c0_i32 = arith.constant 0 : i32
    %c0_i32_0 = arith.constant 0 : i32
    %c0_i32_1 = arith.constant 0 : i32
    return %c0_i32, %c0_i32_0 : i32, i32
  }
  func.func @transform_14(%arg0: i32, %arg1: memref<4xf32, #tpu.memory_space<smem>>) -> (i32, i32) {
    %c0_i32 = arith.constant 0 : i32
    %c0_i32_0 = arith.constant 0 : i32
    %c0_i32_1 = arith.constant 0 : i32
    return %c0_i32, %c0_i32_0 : i32, i32
  }
  func.func @transform_15(%arg0: i32, %arg1: memref<4xf32, #tpu.memory_space<smem>>) -> (i32, i32) {
    %c0_i32 = arith.constant 0 : i32
    %c0_i32_0 = arith.constant 0 : i32
    %c0_i32_1 = arith.constant 0 : i32
    return %c0_i32, %c0_i32_0 : i32, i32
  }
  func.func @transform_16(%arg0: i32, %arg1: memref<4xf32, #tpu.memory_space<smem>>) -> (i32, i32, i32) {
    %c0_i32 = arith.constant 0 : i32
    %c0_i32_0 = arith.constant 0 : i32
    %c0_i32_1 = arith.constant 0 : i32
    return %arg0, %c0_i32, %c0_i32_0 : i32, i32, i32
  }
}

</mosaic_0001>

<bundles_post_ra>
// kernel: architecture_forward.4
= control target key start
LH: loop header
LB: loop body
LE: loop exit
PB: predicated region body
PF: predicated region fallthrough
CT: control target
= control target key end

     0   :  { %s2851_s0 = inlined_call_operand.vmem [shape: f32[4], index: 0, kind: input, shape index: {}]   ;;  %s2852_s1 = inlined_call_operand.vmem [shape: f32[2,8,32], index: 1, kind: input, shape index: {}, may-alias: {1,2}]   ;;  %s2853_s2 = inlined_call_operand.vmem [shape: f32[2,8,32], index: 2, kind: input, shape index: {}, may-alias: {1,2}]   ;;  %s2854_s3 = inlined_call_operand.vmem [shape: f32[32,32], index: 3, kind: input, shape index: {}]   ;;  %s2855_s4 = inlined_call_operand.vmem [shape: f32[1,32], index: 4, kind: input, shape index: {}]   ;;  %s2856_s5 = inlined_call_operand.vmem [shape: f32[32,32], index: 5, kind: input, shape index: {}]   ;;  %s2857_s6 = inlined_call_operand.vmem [shape: f32[1,32], index: 6, kind: input, shape index: {}]   ;;  %s2858_s7 = inlined_call_operand.vmem [shape: f32[32,32], index: 7, kind: input, shape index: {}]   ;;  %s2859_s8 = inlined_call_operand.vmem [shape: f32[1,32], index: 8, kind: input, shape index: {}]   ;;  %s2860_s9 = inlined_call_operand.vmem [shape: f32[1,32], index: 9, kind: input, shape index: {}]   ;;  %s2861_s10 = inlined_call_operand.vmem [shape: f32[1,32], index: 10, kind: input, shape index: {}]   ;;  %s2862_s11 = inlined_call_operand.vmem [shape: f32[32,64], index: 11, kind: input, shape index: {}]   ;;  %s2863_s12 = inlined_call_operand.vmem [shape: f32[1,64], index: 12, kind: input, shape index: {}]   ;;  %s2864_s13 = inlined_call_operand.vmem [shape: f32[64,32], index: 13, kind: input, shape index: {}]   ;;  %s2865_s14 = inlined_call_operand.vmem [shape: f32[1,32], index: 14, kind: input, shape index: {}]   ;;  %s2866_s15 = inlined_call_operand.vmem [shape: f32[1,32], index: 15, kind: input, shape index: {}]   ;;  %s2867_s16 = inlined_call_operand.vmem [shape: f32[1,32], index: 16, kind: input, shape index: {}]   ;;  %s2868_s17 = inlined_call_operand.vmem [shape: f32[2,8,32], index: 17, kind: output, shape index: {}]  }
   0x1   :  { %2869 = sst [smem:[#allocation5_spill]] %s2851_s0 }
   0x2   :  { %2870 = sst [smem:[#allocation6_spill]] %s2852_s1 }
   0x3   :  { %s2871_s25 = sld [smem:[#allocation5_spill]] }
   0x9   :  { %s22_s26 = sshll.u32 %s2871_s25, 4  ;;  %s23_s26 = int_to_ptr.vmem [resolvable:$true] %s22_s26 }
   0xa   :  { %s2461_s12 = scalar_lea.vmem %s23_s26, 16  ;;  %p2466_p1 = scmp.lt.s32.totalorder %s23_s26, %s23_s26 }
   0xb   :  { %p2462_p0 = scmp.ne.s32.totalorder %s23_s26, %s2461_s12  ;;  %p2467_p2 = scmp.lt.s32.totalorder %s2461_s12, %s2461_s12 }
   0xd   :  { %p2468_p3 = por %p2467_p2, %p2466_p1 }
   0xf   :  { %p2469_p4 = pnand %p2468_p3, %p2462_p0 }
  0x11   :  { %2472 = shalt.err (!%p2469_p4)  }
  0x12   :  { %s2483_s13 = smov [#allocation3]  }
  0x13   :  { %25 = dma.vmem_to_smem %s23_s26, 16, %s2483_s13, [#allocation2] }
  0x14   :  { %2477 = dma.done.wait [#allocation2], 16 }
  0x15   :  { %2478 = vsyncadd [#allocation2], 4294967280 }
  0x16   :  { %27 = sfence }
  0x17   :  { %s2583_s14 = smov 0  }
  0x18 LB: > { %s2205_s15 = sadd.s32 4294967295, %s2481_s14   ;;  %p2209_p5 = scmp.ge.s32.totalorder %s2481_s14, 1  ;;  %s2481_s14 = sphi %s2583_s14, %s33_s14  }
  0x19   : > { %p477_p6 = scmp.lt.s32.totalorder %s2481_s14, 3 }
  0x1b   : > { %p478_p7 = pnand %p2209_p5, %p477_p6 }
  0x1c   : > { %p529_p8 = scmp.lt.s32.totalorder (!%p478_p7), %s2205_s15, 1  ;;  %s2872_s22 = sld [smem:[#allocation6_spill]] (!%p478_p7) }
  0x1d   : > { %481 = sbr.rel (%p478_p7) target bundleno = 5204 (0x1454), region = 84  ;;  %s901_s20 = sld [smem:[#allocation3]] (!%p478_p7) }
  0x1e   : > { %s2487_s21 = smov (!%p478_p7), 120   ;;  %s2231_s24 = sld [smem:[#allocation3 + $0x1]] (!%p478_p7) }
  0x1f   : > { %s2488_s11 = smov (!%p478_p7), 112   ;;  %s2489_s12 = smov (!%p478_p7), 104  }
  0x20   : > { %s2238_s16 = sld [smem:[#allocation3 + $0x2]] (!%p478_p7) }
  0x22   : > { %v546_v0 = vld [vmem:[%s2854_s3 + $0x18] sm:$0xff]  ;;  %v2484_v1 = vmov 0.0   ;;  %v545_v2 = vld [vmem:[%s2854_s3 + $0x10] sm:$0xff]  ;;  %vm2485_vm0 = vmmov 0   ;;  %s2876_s15 = smov (!%p529_p8, %s2205_s15), 1  ;;  %v544_v3 = vld [vmem:[%s2854_s3 + $0x8] sm:$0xff]  ;;  %v712_v21 = vlaneseq }
  0x23   : > { %2294 = vmatprep.subr.mxu0 %v2484_v1  ;;  %2302 = vmatprep.mubr.msk.f32.mxu0 %vm2485_vm0, %v2484_v1  ;;  %s2607_s18 = sshll.u32 %s2876_s15, 3  ;;  %v543_v4 = vld [vmem:[%s2854_s3] sm:$0xff]  ;;  %vm554_vm1 = vcmask 261120   ;;  %vm728_vm2 = vcmask 64512   ;;  %v631_v19 = vld [vmem:[%s2856_s5 + $0x18] sm:$0xff]  ;;  %v630_v20 = vld [vmem:[%s2856_s5 + $0x10] sm:$0xff]  ;;  %v902_v52 = vstv %s901_s20 }
  0x24   : > { %2295 = vmatpush3.msra.mxu0 %v546_v0  ;;  %2305 = vmatprep.subr.mxu1 %v2484_v1  ;;  %s532_s23 = scalar_lea.vmem %s2872_s22, %s2607_s18  ;;  %v2213_v6 = vld [vmem:[%s2855_s4] ss:$0 sm:$0xff]  ;;  %v629_v22 = vld [vmem:[%s2856_s5 + $0x8] sm:$0xff]  ;;  %s536_s29 = scalar_lea.vmem %s2853_s2, %s2607_s18  ;;  %v2661_v24 = vshrl.u32 %v712_v21, 7  ;;  %v2663_v25 = vand.u32 127, %v712_v21  ;;  %v2486_v27 = vmov 1.0  }
  0x25   : > { %2296 = vmatprep.subr.mxu0 %v2484_v1  ;;  %2313 = vmatprep.mubr.msk.f32.mxu1 %vm2485_vm0, %v2484_v1  ;;  %v2617_v5 = vld [vmem:[%s532_s23] sm:$0xff]  ;;  %v2033_v29 = vld [vmem:[%s2858_s7 + $0x18] sm:$0xff] }
  0x26   : > { %2297 = vmatpush3.msra.mxu0 %v545_v2  ;;  %2306 = vmatpush3.msra.mxu1 %v631_v19  ;;  %v628_v23 = vld [vmem:[%s2856_s5] sm:$0xff]  ;;  %vm719_vm3 = vcmp.le.s32.totalorder %v2661_v24, %v2663_v25  ;;  %vm2679_vm4 = vcmp.le.s32.totalorder %v2663_v25, %v2661_v24  ;;  %v722_v39 = vsub.s32 %v2663_v25, %v2661_v24 }
  0x27   : > { %2298 = vmatprep.subr.mxu0 %v2484_v1  ;;  %2307 = vmatprep.subr.mxu1 %v2484_v1  ;;  %v542_v26 = vld [vmem:[%s536_s29] sm:$0xff]  ;;  %v2686_v31 = vsel %vm2679_vm4, 1.0, %v2484_v1  ;;  %s2245_s29 = sld [smem:[#allocation3 + $0x3]] }
  0x28   : > { %2299 = vmatpush3.msra.mxu0 %v544_v3  ;;  %2308 = vmatpush3.msra.mxu1 %v630_v20  ;;  %v2215_v35 = vld [vmem:[%s2857_s6] ss:$0 sm:$0xff]  ;;  %v724_v40 = vsub.s32 0, %v722_v39 }
  0x29   : > { %2300 = vmatprep.subr.mxu0 %v2484_v1  ;;  %2309 = vmatprep.subr.mxu1 %v2484_v1 }
  0x2a   : > { %2301 = vmatpush3.msra.mxu0 %v543_v4  ;;  %2310 = vmatpush3.msra.mxu1 %v629_v22  ;;  %v2219_v41 = vmin.u32 %v724_v40, %v722_v39 }
  0x2b   : > { %2303 = vmatmul.mubr.msk.f32.vlgmr.msra.gmra.mxu0 %vm554_vm1, %v2617_v5  ;;  %2316 = vmatprep.subr.mxu0 %v2484_v1 }
  0x2c   : > { %2318 = vmatprep.mubr.msk.f32.mxu0 %vm2485_vm0, %v2484_v1  ;;  %2311 = vmatprep.subr.mxu1 %v2484_v1  ;;  %v2702_v42 = vcvt.s32.f32 %v2219_v41 }
  0x2d   : > { %2312 = vmatpush3.msra.mxu1 %v628_v23 }
  0x2e   : > { %2314 = vmatmul.mubr.msk.f32.vlgmr.msra.gmra.mxu1 %vm554_vm1, %v542_v26  ;;  %2321 = vmatprep.subr.mxu1 %v2484_v1 }
  0x2f   : > { %2322 = vmatpush3.msk.msra.mxu1 %vm719_vm3, %v2486_v27  ;;  %2323 = vmatprep.mubr.msk.f32.mxu1 %vm2485_vm0, %v2484_v1 }
  0x30   : > { %2331 = vmatprep.subr.mxu1 %v2484_v1 }
  0xeb   : > { %v624_v7 = vpop.f32.mrf.mxu0 }
  0xec   : > { %v2628_v8 = vadd.f32 %v2213_v6, %v624_v7 }
  0xed   : > { %v2304_v9 = vpop.f32.mrf.mxu0 }
  0xee   : > { %2317 = vmatpush3.xpose.msk.msra.mxu0 %vm728_vm2, %v2628_v8  ;;  %v708_v36 = vpop.f32.mrf.mxu1 }
  0xef   : > { %2326 = vmatprep.subr.mxu0 %v2484_v1  ;;  %v2696_v37 = vadd.f32 %v2215_v35, %v708_v36 }
  0xf0   : > { %v2315_v38 = vpop.f32.mrf.mxu1 }
  0xf1   : > { %2319 = vmatmul.mubr.msk.f32.vlgmr.msra.gmra.mxu0 %vm728_vm2, %v2628_v8 }
  0xf2   : > { %2328 = vmatprep.mubr.msk.f32.mxu0 %vm2485_vm0, %v2484_v1  ;;  %2327 = vmatpush3.msra.mxu0 %v2696_v37 }
  0xf3   : > { %2336 = vmatprep.subr.mxu0 %v2484_v1 }
 0x1b1   : > { %v798_v10 = vpop.f32.mrf.mxu0 }
 0x1b2   : > { %v2637_v11 = vmul.f32 0.35355338, %v798_v10 }
 0x1b3   : > { %v2320_v12 = vpop.f32.mrf.mxu0 }
 0x1b4   : > { %v803_v13 = vsel %vm728_vm2, %v2637_v11, -inf }
 0x1b5   : > { %804 = vmax.xlane.f32.xlu0 %v803_v13 }
 0x23e   : > { %v805_v14 = vpop.xlane.xlu0 %804 }
 0x23f   : > { %v806_v15 = vsub.f32 %v2637_v11, %v805_v14 }
 0x241   : > { %v807_v16 = vmul.f32 1.442695, %v806_v15 }
 0x243   : > { %2411 = vpow2.f32 %v807_v16 }
 0x250   : > { %v2412_v17 = vpop.eup %2411 }
 0x251   : > { %v809_v18 = vsel %vm728_vm2, %v2412_v17, 0.0 }
 0x252   : > { %810 = vadd.xlane.f32.xlu0 %v809_v18 }
 0x2db   : > { %v811_v28 = vpop.xlane.xlu0 %810 }
 0x2dc   : > { %2413 = vrcp.f32 %v811_v28 }
 0x2e9   : > { %v2414_v30 = vpop.eup %2413 }
 0x2ea   : > { %v813_v32 = vmul.f32 %v2414_v30, %v2412_v17 }
 0x2ec   : > { %v814_v33 = vmul.f32 %v2686_v31, %v813_v32 }
 0x2ee   : > { %2324 = vmatmul.mubr.msk.f32.vlgmr.msra.gmra.mxu1 %vm728_vm2, %v814_v33  ;;  %v888_v34 = vsel %vm728_vm2, %v814_v33, 0.0 }
 0x2ef   : > { %889 = vadd.xlane.f32.xlu1 %v888_v34  ;;  %2333 = vmatprep.mubr.msk.f32.mxu1 %vm2485_vm0, %v2484_v1 }
 0x378   : > { %v890_v43 = vpop.xlane.xlu1 %889 }
 0x3ae   : > { %v884_v44 = vpop.f32.mrf.mxu1 }
 0x3af   : > { %v891_v45 = vsub.f32 %v890_v43, %v884_v44 }
 0x3b0   : > { %v2325_v46 = vpop.f32.mrf.mxu1 }
 0x3b1   : > { %v892_v47 = vmul.f32 %v891_v45, %v2702_v42  ;;  %v1249_v46 = vstv %s2231_s24  ;;  %s540_s24 = scalar_lea.vmem %s2868_s17, %s2607_s18 }
 0x3b3   : > { %v893_v48 = vmax.f32 %v892_v47, 0.0 }
 0x3b5   : > { %2415 = vrsqrt.f32 %v893_v48  ;;  %vm896_vm5 = vcmp.eq.f32.partialorder %v893_v48, inf  ;;  %v899_v51 = vand.u32 2147483648, %v893_v48  ;;  %vm898_vm6 = vcmp.eq.f32.partialorder %v893_v48, 0.0 }
 0x3c2   : > { %v2416_v49 = vpop.eup %2415 }
 0x3c3   : > { %v895_v50 = vmul.f32 %v2416_v49, %v893_v48 }
 0x3c5   : > { %v897_v53 = vsel %vm896_vm5, %v893_v48, %v895_v50 }
 0x3c6   : > { %v900_v54 = vsel %vm898_vm6, %v899_v51, %v897_v53 }
 0x3c7   : > { %v903_v55 = vmul.f32 %v902_v52, %v900_v54 }
 0x3c9   : > { %v904_v56 = vmul.f32 1.442695, %v903_v55 }
 0x3cb   : > { %2417 = vpow2.f32 %v904_v56 }
 0x3d8   : > { %v2418_v57 = vpop.eup %2417 }
 0x3d9   : > { %v906_v58 = vmax.f32 %v2418_v57, 1e-05 }
 0x3db   : > { %v907_v59 = vmin.f32 %v906_v58, 100000.0 }
 0x3dd   : > { %v908_v60 = vmul.f32 %v907_v59, %v2637_v11  ;;  %v994_v11 = vld [vmem:[%s2858_s7] sm:$0xff] }
 0x3de   : > { %2332 = vmatpush3.msra.mxu1 %v994_v11 }
 0x3df   : > { %v909_v61 = vsel %vm2679_vm4, %v908_v60, -1e+32  ;;  %2341 = vmatprep.subr.mxu1 %v2484_v1 }
 0x3e0   : > { %v910_v62 = vsel %vm728_vm2, %v909_v61, -inf }
 0x3e1   : > { %911 = vmax.xlane.f32.xlu1 %v910_v62 }
 0x3f2   : > { %1075 = vrot.lane.b32.xlu1 %v2628_v8, %s2487_s21 }
 0x46a   : > { %v912_v63 = vpop.xlane.xlu1 %911 }
 0x46b   : > { %v913_v0 = vsub.f32 %v909_v61, %v912_v63 }
 0x46d   : > { %v914_v2 = vmul.f32 1.442695, %v913_v0 }
 0x46e   : > { %v1076_v10 = vpop.permute.xlu1 %1075 }
 0x46f   : > { %2419 = vpow2.f32 %v914_v2 }
 0x47c   : > { %v2420_v3 = vpop.eup %2419 }
 0x47d   : > { %v916_v4 = vsel %vm728_vm2, %v2420_v3, 0.0 }
 0x47e   : > { %917 = vadd.xlane.f32.xlu0 %v916_v4  ;;  %v1345_v4 = vld [vmem:[%s2858_s7 + $0x8] sm:$0xff] }
 0x507   : > { %v918_v6 = vpop.xlane.xlu0 %917 }
 0x508   : > { %2421 = vrcp.f32 %v918_v6 }
 0x515   : > { %v2422_v7 = vpop.eup %2421 }
 0x516   : > { %v920_v9 = vmul.f32 %v2422_v7, %v2420_v3 }
 0x518   : > { %2329 = vmatmul.mubr.msk.f32.vlgmr.msra.gmra.mxu0 %vm728_vm2, %v920_v9 }
 0x519   : > { %2337 = vmatpush3.xpose.msk.msra.mxu0 %vm728_vm2, %v1076_v10  ;;  %2338 = vmatprep.mubr.msk.f32.mxu0 %vm2485_vm0, %v2484_v1 }
 0x51a   : > { %2346 = vmatprep.subr.mxu0 %v2484_v1 }
 0x51c   : > { %2339 = vmatmul.mubr.msk.f32.vlgmr.msra.gmra.mxu0 %vm728_vm2, %v1076_v10 }
 0x51d   : > { %2348 = vmatprep.mubr.msk.f32.mxu0 %vm2485_vm0, %v2484_v1 }
 0x5d8   : > { %v990_v12 = vpop.f32.mrf.mxu0 }
 0x5d9   : > { %2334 = vmatmul.mubr.msk.f32.vlgmr.msra.gmra.mxu1 %vm728_vm2, %v990_v12 }
 0x5da   : > { %v2330_v13 = vpop.f32.mrf.mxu0  ;;  %2342 = vmatpush3.msk.msra.mxu1 %vm719_vm3, %v2486_v27  ;;  %2343 = vmatprep.mubr.msk.f32.mxu1 %vm2485_vm0, %v2484_v1 }
 0x5db   : > { %2351 = vmatprep.subr.mxu1 %v2484_v1 }
 0x5dc   : > { %v1145_v14 = vpop.f32.mrf.mxu0 }
 0x5dd   : > { %v1149_v15 = vmul.f32 0.35355338, %v1145_v14 }
 0x5de   : > { %v2340_v16 = vpop.f32.mrf.mxu0 }
 0x5df   : > { %v1150_v17 = vsel %vm728_vm2, %v1149_v15, -inf }
 0x5e0   : > { %1151 = vmax.xlane.f32.xlu0 %v1150_v17 }
 0x669   : > { %v1152_v18 = vpop.xlane.xlu0 %1151 }
 0x66a   : > { %v1153_v19 = vsub.f32 %v1149_v15, %v1152_v18  ;;  %v2226_v18 = vld [vmem:[%s2859_s8] ss:$0 sm:$0xff] }
 0x66c   : > { %v1154_v20 = vmul.f32 1.442695, %v1153_v19 }
 0x66e   : > { %2423 = vpow2.f32 %v1154_v20 }
 0x67b   : > { %v2424_v21 = vpop.eup %2423 }
 0x67c   : > { %v1156_v22 = vsel %vm728_vm2, %v2424_v21, 0.0 }
 0x67d   : > { %1157 = vadd.xlane.f32.xlu0 %v1156_v22 }
 0x699   : > { %v2734_v23 = vpop.f32.mrf.mxu1 }
 0x69a   : > { %v1074_v19 = vadd.f32 %v2226_v18, %v2734_v23 }
 0x69b   : > { %v2335_v26 = vpop.f32.mrf.mxu1 }
 0x706   : > { %v1158_v28 = vpop.xlane.xlu0 %1157 }
 0x707   : > { %2425 = vrcp.f32 %v1158_v28 }
 0x714   : > { %v2426_v30 = vpop.eup %2425 }
 0x715   : > { %v1160_v32 = vmul.f32 %v2426_v30, %v2424_v21 }
 0x717   : > { %v1161_v33 = vmul.f32 %v2686_v31, %v1160_v32 }
 0x719   : > { %2344 = vmatmul.mubr.msk.f32.vlgmr.msra.gmra.mxu1 %vm728_vm2, %v1161_v33  ;;  %v1235_v34 = vsel %vm728_vm2, %v1161_v33, 0.0 }
 0x71a   : > { %1236 = vadd.xlane.f32.xlu0 %v1235_v34  ;;  %2353 = vmatprep.mubr.msk.f32.mxu1 %vm2485_vm0, %v2484_v1 }
 0x71b   : > { %2352 = vmatpush3.msra.mxu1 %v1345_v4 }
 0x71c   : > { %2361 = vmatprep.subr.mxu1 %v2484_v1 }
 0x7a3   : > { %v1237_v35 = vpop.xlane.xlu0 %1236 }
 0x7d9   : > { %v1231_v36 = vpop.f32.mrf.mxu1 }
 0x7da   : > { %v1238_v38 = vsub.f32 %v1237_v35, %v1231_v36 }
 0x7db   : > { %v2345_v39 = vpop.f32.mrf.mxu1 }
 0x7dc   : > { %v1239_v40 = vmul.f32 %v1238_v38, %v2702_v42 }
 0x7de   : > { %v1240_v41 = vmax.f32 %v1239_v40, 0.0 }
 0x7e0   : > { %2427 = vrsqrt.f32 %v1240_v41  ;;  %vm1243_vm7 = vcmp.eq.f32.partialorder %v1240_v41, inf  ;;  %v1246_v45 = vand.u32 2147483648, %v1240_v41  ;;  %vm1245_vm8 = vcmp.eq.f32.partialorder %v1240_v41, 0.0 }
 0x7ed   : > { %v2428_v43 = vpop.eup %2427 }
 0x7ee   : > { %v1242_v44 = vmul.f32 %v2428_v43, %v1240_v41  ;;  %v1594_v43 = vstv %s2238_s16 }
 0x7f0   : > { %v1244_v47 = vsel %vm1243_vm7, %v1240_v41, %v1242_v44 }
 0x7f1   : > { %v1247_v48 = vsel %vm1245_vm8, %v1246_v45, %v1244_v47 }
 0x7f2   : > { %v1250_v49 = vmul.f32 %v1249_v46, %v1247_v48 }
 0x7f4   : > { %v1251_v50 = vmul.f32 1.442695, %v1250_v49 }
 0x7f6   : > { %2429 = vpow2.f32 %v1251_v50 }
 0x803   : > { %v2430_v51 = vpop.eup %2429 }
 0x804   : > { %v1253_v52 = vmax.f32 %v2430_v51, 1e-05 }
 0x806   : > { %v1254_v53 = vmin.f32 %v1253_v52, 100000.0 }
 0x808   : > { %v1255_v54 = vmul.f32 %v1254_v53, %v1149_v15 }
 0x80a   : > { %v1256_v55 = vsel %vm2679_vm4, %v1255_v54, -1e+32 }
 0x80b   : > { %v1257_v56 = vsel %vm728_vm2, %v1256_v55, -inf }
 0x80c   : > { %1258 = vmax.xlane.f32.xlu0 %v1257_v56 }
 0x822   : > { %1269 = vrot.lane.b32.xlu0 %v2696_v37, %s2487_s21 }
 0x826   : > { %1420 = vrot.lane.b32.xlu0 %v2628_v8, %s2488_s11 }
 0x895   : > { %v1259_v57 = vpop.xlane.xlu0 %1258 }
 0x896   : > { %v1260_v58 = vsub.f32 %v1256_v55, %v1259_v57 }
 0x898   : > { %v1261_v59 = vmul.f32 1.442695, %v1260_v58 }
 0x899   : > { %v1270_v60 = vpop.permute.xlu0 %1269 }
 0x89a   : > { %2431 = vpow2.f32 %v1261_v59  ;;  %2347 = vmatpush3.msra.mxu0 %v1270_v60 }
 0x89b   : > { %2356 = vmatprep.subr.mxu0 %v2484_v1 }
 0x89d   : > { %v1421_v3 = vpop.permute.xlu0 %1420 }
 0x8a7   : > { %v2432_v61 = vpop.eup %2431 }
 0x8a8   : > { %v1263_v62 = vsel %vm728_vm2, %v2432_v61, 0.0 }
 0x8a9   : > { %1264 = vadd.xlane.f32.xlu1 %v1263_v62 }
 0x932   : > { %v1265_v63 = vpop.xlane.xlu1 %1264 }
 0x933   : > { %2433 = vrcp.f32 %v1265_v63 }
 0x940   : > { %v2434_v0 = vpop.eup %2433 }
 0x941   : > { %v1267_v2 = vmul.f32 %v2434_v0, %v2432_v61  ;;  %v1689_v0 = vld [vmem:[%s2858_s7 + $0x10] sm:$0xff] }
 0x943   : > { %2349 = vmatmul.mubr.msk.f32.vlgmr.msra.gmra.mxu0 %vm728_vm2, %v1267_v2 }
 0x944   : > { %2357 = vmatpush3.xpose.msk.msra.mxu0 %vm728_vm2, %v1421_v3  ;;  %2358 = vmatprep.mubr.msk.f32.mxu0 %vm2485_vm0, %v2484_v1 }
 0x945   : > { %2366 = vmatprep.subr.mxu0 %v2484_v1 }
 0x947   : > { %2359 = vmatmul.mubr.msk.f32.vlgmr.msra.gmra.mxu0 %vm728_vm2, %v1421_v3 }
 0x948   : > { %2368 = vmatprep.mubr.msk.f32.mxu0 %vm2485_vm0, %v2484_v1 }
 0xa03   : > { %v1341_v6 = vpop.f32.mrf.mxu0 }
 0xa04   : > { %2354 = vmatmul.mubr.msk.f32.vlgmr.msra.gmra.mxu1 %vm728_vm2, %v1341_v6 }
 0xa05   : > { %v2350_v7 = vpop.f32.mrf.mxu0  ;;  %2362 = vmatpush3.msk.msra.mxu1 %vm719_vm3, %v2486_v27  ;;  %2363 = vmatprep.mubr.msk.f32.mxu1 %vm2485_vm0, %v2484_v1 }
 0xa06   : > { %2371 = vmatprep.subr.mxu1 %v2484_v1 }
 0xa07   : > { %v1490_v9 = vpop.f32.mrf.mxu0 }
 0xa08   : > { %v1494_v10 = vmul.f32 0.35355338, %v1490_v9 }
 0xa09   : > { %v2360_v11 = vpop.f32.mrf.mxu0 }
 0xa0a   : > { %v1495_v12 = vsel %vm728_vm2, %v1494_v10, -inf }
 0xa0b   : > { %1496 = vmax.xlane.f32.xlu0 %v1495_v12 }
 0xa21   : > { %1764 = vrot.lane.b32.xlu0 %v2628_v8, %s2489_s12 }
 0xa94   : > { %v1497_v13 = vpop.xlane.xlu0 %1496 }
 0xa95   : > { %v1498_v14 = vsub.f32 %v1494_v10, %v1497_v13 }
 0xa97   : > { %v1499_v15 = vmul.f32 1.442695, %v1498_v14 }
 0xa98   : > { %v1765_v63 = vpop.permute.xlu0 %1764 }
 0xa99   : > { %2435 = vpow2.f32 %v1499_v15 }
 0xaa6   : > { %v2436_v16 = vpop.eup %2435 }
 0xaa7   : > { %v1501_v17 = vsel %vm728_vm2, %v2436_v16, 0.0 }
 0xaa8   : > { %1502 = vadd.xlane.f32.xlu1 %v1501_v17 }
 0xac4   : > { %v1415_v20 = vpop.f32.mrf.mxu1 }
 0xac5   : > { %v2779_v21 = vadd.f32 %v1415_v20, %v1074_v19 }
 0xac6   : > { %v2355_v22 = vpop.f32.mrf.mxu1 }
 0xb31   : > { %v1503_v26 = vpop.xlane.xlu1 %1502 }
 0xb32   : > { %2437 = vrcp.f32 %v1503_v26 }
 0xb3f   : > { %v2438_v8 = vpop.eup %2437 }
 0xb40   : > { %v1505_v28 = vmul.f32 %v2438_v8, %v2436_v16 }
 0xb42   : > { %v1506_v30 = vmul.f32 %v2686_v31, %v1505_v28 }
 0xb44   : > { %2364 = vmatmul.mubr.msk.f32.vlgmr.msra.gmra.mxu1 %vm728_vm2, %v1506_v30  ;;  %v1580_v32 = vsel %vm728_vm2, %v1506_v30, 0.0 }
 0xb45   : > { %1581 = vadd.xlane.f32.xlu1 %v1580_v32  ;;  %2373 = vmatprep.mubr.msk.f32.mxu1 %vm2485_vm0, %v2484_v1 }
 0xb46   : > { %2372 = vmatpush3.msra.mxu1 %v1689_v0 }
 0xb47   : > { %2381 = vmatprep.subr.mxu1 %v2484_v1 }
 0xbce   : > { %v1582_v33 = vpop.xlane.xlu1 %1581 }
 0xc04   : > { %v1576_v23 = vpop.f32.mrf.mxu1 }
 0xc05   : > { %v1583_v34 = vsub.f32 %v1582_v33, %v1576_v23  ;;  %v1938_v33 = vstv %s2245_s29 }
 0xc06   : > { %v2365_v35 = vpop.f32.mrf.mxu1 }
 0xc07   : > { %v1584_v36 = vmul.f32 %v1583_v34, %v2702_v42 }
 0xc09   : > { %v1585_v38 = vmax.f32 %v1584_v36, 0.0 }
 0xc0b   : > { %2439 = vrsqrt.f32 %v1585_v38  ;;  %vm1588_vm9 = vcmp.eq.f32.partialorder %v1585_v38, inf  ;;  %v1591_v41 = vand.u32 2147483648, %v1585_v38  ;;  %vm1590_vm10 = vcmp.eq.f32.partialorder %v1585_v38, 0.0 }
 0xc18   : > { %v2440_v39 = vpop.eup %2439 }
 0xc19   : > { %v1587_v40 = vmul.f32 %v2440_v39, %v1585_v38 }
 0xc1b   : > { %v1589_v44 = vsel %vm1588_vm9, %v1585_v38, %v1587_v40 }
 0xc1c   : > { %v1592_v45 = vsel %vm1590_vm10, %v1591_v41, %v1589_v44 }
 0xc1d   : > { %v1595_v46 = vmul.f32 %v1594_v43, %v1592_v45 }
 0xc1f   : > { %v1596_v47 = vmul.f32 1.442695, %v1595_v46 }
 0xc21   : > { %2441 = vpow2.f32 %v1596_v47 }
 0xc2e   : > { %v2442_v48 = vpop.eup %2441 }
 0xc2f   : > { %v1598_v49 = vmax.f32 %v2442_v48, 1e-05 }
 0xc31   : > { %v1599_v50 = vmin.f32 %v1598_v49, 100000.0 }
 0xc33   : > { %v1600_v51 = vmul.f32 %v1599_v50, %v1494_v10 }
 0xc35   : > { %v1601_v52 = vsel %vm2679_vm4, %v1600_v51, -1e+32 }
 0xc36   : > { %v1602_v53 = vsel %vm728_vm2, %v1601_v52, -inf }
 0xc37   : > { %1603 = vmax.xlane.f32.xlu1 %v1602_v53 }
 0xcc0   : > { %v1604_v54 = vpop.xlane.xlu1 %1603 }
 0xcc1   : > { %v1605_v55 = vsub.f32 %v1601_v52, %v1604_v54 }
 0xcc3   : > { %v1606_v56 = vmul.f32 1.442695, %v1605_v55 }
 0xcc5   : > { %2443 = vpow2.f32 %v1606_v56 }
 0xcd2   : > { %v2444_v57 = vpop.eup %2443 }
 0xcd3   : > { %v1608_v58 = vsel %vm728_vm2, %v2444_v57, 0.0 }
 0xcd4   : > { %1609 = vadd.xlane.f32.xlu1 %v1608_v58 }
 0xce5   : > { %1613 = vrot.lane.b32.xlu1 %v2696_v37, %s2488_s11 }
 0xd5d   : > { %v1610_v59 = vpop.xlane.xlu1 %1609 }
 0xd5e   : > { %2445 = vrcp.f32 %v1610_v59 }
 0xd61   : > { %v1614_v60 = vpop.permute.xlu1 %1613 }
 0xd62   : > { %2367 = vmatpush3.msra.mxu0 %v1614_v60 }
 0xd63   : > { %2376 = vmatprep.subr.mxu0 %v2484_v1 }
 0xd6b   : > { %v2446_v61 = vpop.eup %2445 }
 0xd6c   : > { %v1612_v62 = vmul.f32 %v2446_v61, %v2444_v57 }
 0xd6e   : > { %2369 = vmatmul.mubr.msk.f32.vlgmr.msra.gmra.mxu0 %vm728_vm2, %v1612_v62 }
 0xd6f   : > { %2377 = vmatpush3.xpose.msk.msra.mxu0 %vm728_vm2, %v1765_v63  ;;  %2378 = vmatprep.mubr.msk.f32.mxu0 %vm2485_vm0, %v2484_v1 }
 0xd70   : > { %2386 = vmatprep.subr.mxu0 %v2484_v1 }
 0xd72   : > { %2379 = vmatmul.mubr.msk.f32.vlgmr.msra.gmra.mxu0 %vm728_vm2, %v1765_v63 }
 0xd73   : > { %2388 = vmatprep.mubr.msk.f32.mxu0 %vm2485_vm0, %v2484_v1 }
 0xe2e   : > { %v1685_v2 = vpop.f32.mrf.mxu0 }
 0xe2f   : > { %2374 = vmatmul.mubr.msk.f32.vlgmr.msra.gmra.mxu1 %vm728_vm2, %v1685_v2 }
 0xe30   : > { %v2370_v3 = vpop.f32.mrf.mxu0  ;;  %2382 = vmatpush3.msk.msra.mxu1 %vm719_vm3, %v2486_v27  ;;  %2383 = vmatprep.mubr.msk.f32.mxu1 %vm2485_vm0, %v2484_v1 }
 0xe31   : > { %2391 = vmatprep.subr.mxu1 %v2484_v1 }
 0xe32   : > { %v1834_v4 = vpop.f32.mrf.mxu0 }
 0xe33   : > { %v1838_v6 = vmul.f32 0.35355338, %v1834_v4 }
 0xe34   : > { %v2380_v7 = vpop.f32.mrf.mxu0 }
 0xe35   : > { %v1839_v9 = vsel %vm728_vm2, %v1838_v6, -inf }
 0xe36   : > { %1840 = vmax.xlane.f32.xlu1 %v1839_v9 }
 0xebf   : > { %v1841_v10 = vpop.xlane.xlu1 %1840 }
 0xec0   : > { %v1842_v11 = vsub.f32 %v1838_v6, %v1841_v10 }
 0xec2   : > { %v1843_v12 = vmul.f32 1.442695, %v1842_v11 }
 0xec4   : > { %2447 = vpow2.f32 %v1843_v12 }
 0xed1   : > { %v2448_v13 = vpop.eup %2447 }
 0xed2   : > { %v1845_v14 = vsel %vm728_vm2, %v2448_v13, 0.0 }
 0xed3   : > { %1846 = vadd.xlane.f32.xlu0 %v1845_v14 }
 0xeef   : > { %v1759_v24 = vpop.f32.mrf.mxu1 }
 0xef0   : > { %v1763_v25 = vadd.f32 %v1759_v24, %v2779_v21 }
 0xef1   : > { %v2375_v27 = vpop.f32.mrf.mxu1 }
 0xf5c   : > { %v1847_v15 = vpop.xlane.xlu0 %1846 }
 0xf5d   : > { %2449 = vrcp.f32 %v1847_v15 }
 0xf6a   : > { %v2450_v16 = vpop.eup %2449 }
 0xf6b   : > { %v1849_v17 = vmul.f32 %v2450_v16, %v2448_v13 }
 0xf6d   : > { %v1850_v18 = vmul.f32 %v2686_v31, %v1849_v17 }
 0xf6f   : > { %2384 = vmatmul.mubr.msk.f32.vlgmr.msra.gmra.mxu1 %vm728_vm2, %v1850_v18  ;;  %v1924_v19 = vsel %vm728_vm2, %v1850_v18, 0.0 }
 0xf70   : > { %1925 = vadd.xlane.f32.xlu1 %v1924_v19  ;;  %2393 = vmatprep.mubr.msk.f32.mxu1 %vm2485_vm0, %v2484_v1 }
 0xf71   : > { %2392 = vmatpush3.msra.mxu1 %v2033_v29 }
 0xff9   : > { %v1926_v20 = vpop.xlane.xlu1 %1925 }
0x102f   : > { %v1920_v22 = vpop.f32.mrf.mxu1 }
0x1030   : > { %v1927_v26 = vsub.f32 %v1926_v20, %v1920_v22 }
0x1031   : > { %v2385_v8 = vpop.f32.mrf.mxu1 }
0x1032   : > { %v1928_v21 = vmul.f32 %v1927_v26, %v2702_v42 }
0x1034   : > { %v1929_v28 = vmax.f32 %v1928_v21, 0.0 }
0x1036   : > { %2451 = vrsqrt.f32 %v1929_v28  ;;  %vm1932_vm11 = vcmp.eq.f32.partialorder %v1929_v28, inf  ;;  %v1935_v31 = vand.u32 2147483648, %v1929_v28  ;;  %vm1934_vm12 = vcmp.eq.f32.partialorder %v1929_v28, 0.0 }
0x1043   : > { %v2452_v30 = vpop.eup %2451 }
0x1044   : > { %v1931_v32 = vmul.f32 %v2452_v30, %v1929_v28 }
0x1046   : > { %v1933_v23 = vsel %vm1932_vm11, %v1929_v28, %v1931_v32 }
0x1047   : > { %v1936_v34 = vsel %vm1934_vm12, %v1935_v31, %v1933_v23 }
0x1048   : > { %v1939_v35 = vmul.f32 %v1938_v33, %v1936_v34 }
0x104a   : > { %v1940_v36 = vmul.f32 1.442695, %v1939_v35 }
0x104c   : > { %2453 = vpow2.f32 %v1940_v36 }
0x1059   : > { %v2454_v1 = vpop.eup %2453 }
0x105a   : > { %v1942_v38 = vmax.f32 %v2454_v1, 1e-05 }
0x105c   : > { %v1943_v39 = vmin.f32 %v1942_v38, 100000.0 }
0x105e   : > { %v1944_v40 = vmul.f32 %v1943_v39, %v1838_v6  ;;  %v2249_v6 = vld [vmem:[%s2861_s10] ss:$0 sm:$0xff] }
0x1060   : > { %v1945_v42 = vsel %vm2679_vm4, %v1944_v40, -1e+32 }
0x1061   : > { %v1946_v41 = vsel %vm728_vm2, %v1945_v42, -inf }
0x1062   : > { %1947 = vmax.xlane.f32.xlu1 %v1946_v41 }
0x1073   : > { %1957 = vrot.lane.b32.xlu1 %v2696_v37, %s2489_s12 }
0x10eb   : > { %v1948_v43 = vpop.xlane.xlu1 %1947 }
0x10ec   : > { %v1949_v44 = vsub.f32 %v1945_v42, %v1948_v43 }
0x10ee   : > { %v1950_v45 = vmul.f32 1.442695, %v1949_v44 }
0x10ef   : > { %v1958_v46 = vpop.permute.xlu1 %1957 }
0x10f0   : > { %2455 = vpow2.f32 %v1950_v45  ;;  %2387 = vmatpush3.msra.mxu0 %v1958_v46 }
0x10fd   : > { %v2456_v47 = vpop.eup %2455 }
0x10fe   : > { %v1952_v48 = vsel %vm728_vm2, %v2456_v47, 0.0 }
0x10ff   : > { %1953 = vadd.xlane.f32.xlu0 %v1952_v48 }
0x1188   : > { %v1954_v49 = vpop.xlane.xlu0 %1953 }
0x1189   : > { %2457 = vrcp.f32 %v1954_v49 }
0x1196   : > { %v2458_v50 = vpop.eup %2457 }
0x1197   : > { %v1956_v51 = vmul.f32 %v2458_v50, %v2456_v47 }
0x1199   : > { %2389 = vmatmul.mubr.msk.f32.vlgmr.msra.gmra.mxu0 %vm728_vm2, %v1956_v51 }
0x1259   : > { %v2029_v37 = vpop.f32.mrf.mxu0 }
0x125a   : > { %2394 = vmatmul.mubr.msk.f32.vlgmr.msra.gmra.mxu1 %vm728_vm2, %v2029_v37 }
0x125b   : > { %v2390_v52 = vpop.f32.mrf.mxu0 }
0x131a   : > { %v2103_v53 = vpop.f32.mrf.mxu1 }
0x131b   : > { %v2107_v54 = vadd.f32 %v2103_v53, %v1763_v25 }
0x131c   : > { %v2395_v55 = vpop.f32.mrf.mxu1 }
0x131d   : > { %v2108_v56 = vadd.f32 %v2107_v54, %v2617_v5  ;;  %v2248_v5 = vld [vmem:[%s2860_s9] ss:$0 sm:$0xff] }
0x131f   : > { %v2111_v57 = vsel %vm554_vm1, %v2108_v56, 0.0 }
0x1320   : > { %2112 = vadd.xlane.f32.xlu0 %v2111_v57 }
0x13a9   : > { %v2113_v58 = vpop.xlane.xlu0 %2112 }
0x13aa   : > { %v2115_v59 = vmul.f32 0.03125, %v2113_v58 }
0x13ac   : > { %v2116_v60 = vsub.f32 %v2108_v56, %v2115_v59 }
0x13ae   : > { %v2117_v61 = vmul.f32 %v2116_v60, %v2116_v60 }
0x13b0   : > { %v2118_v62 = vsel %vm554_vm1, %v2117_v61, 0.0 }
0x13b1   : > { %2119 = vadd.xlane.f32.xlu0 %v2118_v62 }
0x143a   : > { %v2120_v63 = vpop.xlane.xlu0 %2119 }
0x143b   : > { %v2121_v0 = vmul.f32 0.03125, %v2120_v63 }
0x143d   : > { %v2122_v2 = vadd.f32 1e-05, %v2121_v0 }
0x143f   : > { %2459 = vrsqrt.f32 %v2122_v2 }
0x144c   : > { %v2460_v3 = vpop.eup %2459 }
0x144d   : > { %v2124_v4 = vmul.f32 %v2460_v3, %v2116_v60 }
0x144f   : > { %v2131_v7 = vmul.f32 %v2248_v5, %v2124_v4 }
0x1451   : > { %v2138_v9 = vadd.f32 %v2249_v6, %v2131_v7 }
0x1453   : > { %2139 = vst.msk [vmem:[%s540_s24] sm:$0xff] %vm554_vm1, %v2138_v9 }
0x1454 PF: > { %s33_s14 = sadd.s32 1, %s2481_s14  }
0x1455   : > { %p30_p9 = scmp.ge.s32.totalorder %s33_s14, 4  }
0x1457   :  { %32 = sbr.rel (!%p30_p9) target bundleno = 24 (0x18), region = 117 }

// kernel: architecture_forward.3
= control target key start
LH: loop header
LB: loop body
LE: loop exit
PB: predicated region body
PF: predicated region fallthrough
CT: control target
= control target key end

     0   :  { %s3259_s0 = inlined_call_operand.vmem [shape: f32[4], index: 0, kind: input, shape index: {}]   ;;  %s3260_s1 = inlined_call_operand.vmem [shape: f32[2,8,32], index: 1, kind: input, shape index: {}, may-alias: {1,2}]   ;;  %s3261_s2 = inlined_call_operand.vmem [shape: f32[2,8,32], index: 2, kind: input, shape index: {}, may-alias: {1,2}]   ;;  %s3262_s3 = inlined_call_operand.vmem [shape: f32[32,32], index: 3, kind: input, shape index: {}]   ;;  %s3263_s4 = inlined_call_operand.vmem [shape: f32[1,32], index: 4, kind: input, shape index: {}]   ;;  %s3264_s5 = inlined_call_operand.vmem [shape: f32[32,32], index: 5, kind: input, shape index: {}]   ;;  %s3265_s6 = inlined_call_operand.vmem [shape: f32[1,32], index: 6, kind: input, shape index: {}]   ;;  %s3266_s7 = inlined_call_operand.vmem [shape: f32[32,32], index: 7, kind: input, shape index: {}]   ;;  %s3267_s8 = inlined_call_operand.vmem [shape: f32[1,32], index: 8, kind: input, shape index: {}]   ;;  %s3268_s9 = inlined_call_operand.vmem [shape: f32[1,32], index: 9, kind: input, shape index: {}]   ;;  %s3269_s10 = inlined_call_operand.vmem [shape: f32[1,32], index: 10, kind: input, shape index: {}]   ;;  %s3270_s11 = inlined_call_operand.hbm [shape: f32[32,64], index: 11, kind: input, shape index: {}]   ;;  %s3271_s12 = inlined_call_operand.vmem [shape: f32[1,64], index: 12, kind: input, shape index: {}]   ;;  %s3272_s13 = inlined_call_operand.vmem [shape: f32[64,32], index: 13, kind: input, shape index: {}]   ;;  %s3273_s14 = inlined_call_operand.vmem [shape: f32[1,32], index: 14, kind: input, shape index: {}]   ;;  %s3274_s15 = inlined_call_operand.vmem [shape: f32[1,32], index: 15, kind: input, shape index: {}]   ;;  %s3275_s16 = inlined_call_operand.vmem [shape: f32[1,32], index: 16, kind: input, shape index: {}]   ;;  %s3276_s17 = inlined_call_operand.vmem [shape: f32[2,8,32], index: 17, kind: output, shape index: {}]  }
   0x1   :  { %3277 = sst [smem:[#allocation8_spill]] %s3259_s0 }
   0x2   :  { %3278 = sst [smem:[#allocation9_spill]] %s3260_s1 }
   0x3   :  { %3279 = sst [smem:[#allocation10_spill]] %s3269_s10 }
   0x4   :  { %s3280_s26 = sld [smem:[#allocation8_spill]] }
   0xa   :  { %s22_s10 = sshll.u32 %s3280_s26, 4  ;;  %s23_s10 = int_to_ptr.vmem [resolvable:$true] %s22_s10 }
   0xb   :  { %s2759_s27 = scalar_lea.vmem %s23_s10, 16  ;;  %p2764_p1 = scmp.lt.s32.totalorder %s23_s10, %s23_s10 }
   0xc   :  { %p2760_p0 = scmp.ne.s32.totalorder %s23_s10, %s2759_s27  ;;  %p2765_p2 = scmp.lt.s32.totalorder %s2759_s27, %s2759_s27 }
   0xe   :  { %p2766_p3 = por %p2765_p2, %p2764_p1 }
  0x10   :  { %p2767_p4 = pnand %p2766_p3, %p2760_p0 }
  0x12   :  { %2770 = shalt.err (!%p2767_p4)  }
  0x13   :  { %s2811_s28 = smov [#allocation3]  }
  0x14   :  { %25 = dma.vmem_to_smem %s23_s10, 16, %s2811_s28, [#allocation2] }
  0x15   :  { %2801 = dma.done.wait [#allocation2], 16 }
  0x16   :  { %2802 = vsyncadd [#allocation2], 4294967280 }
  0x17   :  { %27 = sfence }
  0x18   :  { %28 = vsyncpa [#allocation5], 0  ;;  %s2914_s29 = smov 0  }
  0x19 LB: > { %s2920_s0 = sadd.s32 4294967295, %s2809_s29   ;;  %p2438_p5 = scmp.ge.s32.totalorder %s2809_s29, 1  ;;  %s2809_s29 = sphi %s2914_s29, %s34_s29  }
  0x1a   : > { %p411_p6 = scmp.lt.s32.totalorder %s2809_s29, 3  ;;  %s2812_s10 = smov [#allocation4]  }
  0x1b   : > { %s447_s30 = sshll.u32 %s2812_s10, 4  ;;  %p2687_p8 = scmp.eq.s32.totalorder %s2920_s0, 0  ;;  %s448_s30 = int_to_ptr.vmem [resolvable:$true] %s447_s30 }
  0x1c   : > { %p2924_p7 = pnand %p2438_p5, %p411_p6  ;;  %s2782_s19 = scalar_lea.vmem %s448_s30, 512 }
  0x1d   : > { %p2783_p12 = scmp.ne.s32.totalorder %s448_s30, %s2782_s19  ;;  %p2790_p1 = scmp.lt.s32.totalorder %s448_s30, %s448_s30 }
  0x1e   : > { %p2683_p9 = pneg %p2924_p7  ;;  %p2791_p2 = scmp.lt.s32.totalorder %s2782_s19, %s2782_s19 }
  0x20   : > { %p2684_p10 = pnand %p2687_p8, %p2683_p9  ;;  %p2792_p3 = por %p2791_p2, %p2790_p1 }
  0x22   : > { %p2773_p11 = pneg %p2684_p10 }
  0x24   : > { %p2785_p13 = pnand %p2783_p12, %p2773_p11 }
  0x26   : > { %p2786_p0 = pneg %p2785_p13 }
  0x28   : > { %p2793_p4 = pnand %p2792_p3, %p2786_p0 }
  0x2a   : > { %2796 = shalt.err (!%p2793_p4)
}
  0x2b   : > { %s2813_s1 = smov 128   ;;  %s2814_s20 = smov 8  }
  0x2c   : > { %2686 = dma.hbm_to_vmem [thread:$0]  (!%p2684_p10), %s3270_s11, 512, %s448_s30, [#allocation5], %s2813_s1, %s2813_s1, %s2814_s20  }
  0x2d   : > { %492 = sbr.rel (%p2924_p7) target bundleno = 5925 (0x1725), region = 84 }
  0x32   : > { %2804 = dma.done.wait (%p2687_p8), [#allocation5], 512  }
  0x33   : > { %2806 = vsyncadd (%p2687_p8), [#allocation5], 4294966784  ;;  %p544_p5 = scmp.lt.s32.totalorder %s2920_s0, 1  ;;  %v2815_v0 = vmov 0.0   ;;  %vm2816_vm0 = vmmov 0   ;;  %v561_v1 = vld [vmem:[%s3262_s3 + $0x18] sm:$0xff]  ;;  %v727_v19 = vlaneseq }
  0x34   : > { %2547 = vmatprep.subr.mxu0 %v2815_v0  ;;  %2555 = vmatprep.mubr.msk.f32.mxu0 %vm2816_vm0, %v2815_v0  ;;  %v560_v2 = vld [vmem:[%s3262_s3 + $0x10] sm:$0xff]  ;;  %v559_v3 = vld [vmem:[%s3262_s3 + $0x8] sm:$0xff]  ;;  %v558_v4 = vld [vmem:[%s3262_s3] sm:$0xff]  ;;  %vm569_vm1 = vcmask 261120   ;;  %vm743_vm2 = vcmask 64512   ;;  %v2817_v22 = vmov 1.0  }
  0x35   : > { %s3287_s0 = smov (!%p544_p5, %s2920_s0), 1  ;;  %2558 = vmatprep.subr.mxu1 %v2815_v0  ;;  %2566 = vmatprep.mubr.msk.f32.mxu1 %vm2816_vm0, %v2815_v0  ;;  %v2446_v6 = vld [vmem:[%s3263_s4] ss:$0 sm:$0xff]  ;;  %v2996_v20 = vshrl.u32 %v727_v19, 7  ;;  %v2998_v21 = vand.u32 127, %v727_v19  ;;  %v646_v30 = vld [vmem:[%s3264_s5 + $0x18] sm:$0xff] }
  0x36   : > { %s2950_s23 = sshll.u32 %s3287_s0, 3  ;;  %2548 = vmatpush3.msra.mxu0 %v561_v1  ;;  %s3282_s0 = sld [smem:[#allocation9_spill]]  ;;  %v645_v31 = vld [vmem:[%s3264_s5 + $0x10] sm:$0xff]  ;;  %2559 = vmatpush3.msra.mxu1 %v646_v30  ;;  %v644_v32 = vld [vmem:[%s3264_s5 + $0x8] sm:$0xff]  ;;  %v643_v33 = vld [vmem:[%s3264_s5] sm:$0xff]  ;;  %vm2254_vm13 = vcmask 523264  }
  0x37   : > { %2549 = vmatprep.subr.mxu0 %v2815_v0  ;;  %vm734_vm3 = vcmp.le.s32.totalorder %v2996_v20, %v2998_v21  ;;  %vm3009_vm4 = vcmp.le.s32.totalorder %v2998_v21, %v2996_v20  ;;  %2560 = vmatprep.subr.mxu1 %v2815_v0  ;;  %v737_v35 = vsub.s32 %v2998_v21, %v2996_v20  ;;  %s916_s20 = sld [smem:[#allocation3]]  ;;  %s2818_s21 = smov 120   ;;  %v2448_v1 = vld [vmem:[%s3265_s6] ss:$0 sm:$0xff]  ;;  %v2048_v24 = vld [vmem:[%s3266_s7 + $0x18] sm:$0xff] }
  0x38   : > { %2550 = vmatpush3.msra.mxu0 %v560_v2  ;;  %v3016_v26 = vsel %vm3009_vm4, 1.0, %v2815_v0  ;;  %2561 = vmatpush3.msra.mxu1 %v645_v31  ;;  %s2464_s27 = sld [smem:[#allocation3 + $0x1]]  ;;  %s2819_s28 = smov 112  }
  0x39   : > { %2551 = vmatprep.subr.mxu0 %v2815_v0  ;;  %2562 = vmatprep.subr.mxu1 %v2815_v0  ;;  %v739_v36 = vsub.s32 0, %v737_v35  ;;  %s2820_s18 = smov 104   ;;  %s2471_s1 = sld [smem:[#allocation3 + $0x2]] }
  0x3a   : > { %2552 = vmatpush3.msra.mxu0 %v559_v3  ;;  %2563 = vmatpush3.msra.mxu1 %v644_v32  ;;  %s2478_s22 = sld [smem:[#allocation3 + $0x3]]  ;;  %s555_s10 = scalar_lea.vmem %s3276_s17, %s2950_s23 }
  0x3b   : > { %2553 = vmatprep.subr.mxu0 %v2815_v0  ;;  %2564 = vmatprep.subr.mxu1 %v2815_v0  ;;  %v2452_v37 = vmin.u32 %v739_v36, %v737_v35  ;;  %s3285_s26 = sld [smem:[#allocation10_spill]] }
  0x3c   : > { %s547_s19 = scalar_lea.vmem %s3282_s0, %s2950_s23  ;;  %2554 = vmatpush3.msra.mxu0 %v558_v4  ;;  %s551_s0 = scalar_lea.vmem %s3261_s2, %s2950_s23  ;;  %2565 = vmatpush3.msra.mxu1 %v643_v33 }
  0x3d   : > { %v2970_v5 = vld [vmem:[%s547_s19] sm:$0xff]  ;;  %2569 = vmatprep.subr.mxu0 %v2815_v0  ;;  %2584 = vmatprep.subr.mxu1 %v2815_v0  ;;  %v3048_v38 = vcvt.s32.f32 %v2452_v37  ;;  %v917_v48 = vstv %s916_s20 }
  0x3e   : > { %2556 = vmatmul.mubr.msk.f32.vlgmr.msra.gmra.mxu0 %vm569_vm1, %v2970_v5  ;;  %v557_v34 = vld [vmem:[%s551_s0] sm:$0xff] }
  0x3f   : > { %2571 = vmatprep.mubr.msk.f32.mxu0 %vm2816_vm0, %v2815_v0  ;;  %2567 = vmatmul.mubr.msk.f32.vlgmr.msra.gmra.mxu1 %vm569_vm1, %v557_v34 }
  0x40   : > { %2586 = vmatprep.mubr.msk.f32.mxu1 %vm2816_vm0, %v2815_v0 }
  0xfe   : > { %v639_v7 = vpop.f32.mrf.mxu0 }
  0xff   : > { %v2981_v8 = vadd.f32 %v2446_v6, %v639_v7  ;;  %v723_v2 = vpop.f32.mrf.mxu1 }
 0x100   : > { %v2557_v9 = vpop.f32.mrf.mxu0  ;;  %v3061_v3 = vadd.f32 %v2448_v1, %v723_v2 }
 0x101   : > { %2570 = vmatpush3.xpose.msk.msra.mxu0 %vm743_vm2, %v2981_v8  ;;  %v2568_v4 = vpop.f32.mrf.mxu1 }
 0x102   : > { %2574 = vmatprep.subr.mxu0 %v2815_v0  ;;  %v1360_v4 = vld [vmem:[%s3266_s7 + $0x8] sm:$0xff] }
 0x104   : > { %2572 = vmatmul.mubr.msk.f32.vlgmr.msra.gmra.mxu0 %vm743_vm2, %v2981_v8 }
 0x105   : > { %2576 = vmatprep.mubr.msk.f32.mxu0 %vm2816_vm0, %v2815_v0  ;;  %2575 = vmatpush3.msk.msra.mxu0 %vm734_vm3, %v2817_v22 }
 0x106   : > { %2579 = vmatprep.subr.mxu0 %v2815_v0 }
 0x1c4   : > { %v813_v10 = vpop.f32.mrf.mxu0 }
 0x1c5   : > { %v2990_v11 = vmul.f32 0.35355338, %v813_v10 }
 0x1c6   : > { %v2573_v12 = vpop.f32.mrf.mxu0 }
 0x1c7   : > { %v818_v13 = vsel %vm743_vm2, %v2990_v11, -inf }
 0x1c8   : > { %819 = vmax.xlane.f32.xlu0 %v818_v13 }
 0x251   : > { %v820_v14 = vpop.xlane.xlu0 %819 }
 0x252   : > { %v821_v15 = vsub.f32 %v2990_v11, %v820_v14 }
 0x254   : > { %v822_v16 = vmul.f32 1.442695, %v821_v15 }
 0x256   : > { %2707 = vpow2.f32 %v822_v16 }
 0x263   : > { %v2708_v17 = vpop.eup %2707 }
 0x264   : > { %v824_v18 = vsel %vm743_vm2, %v2708_v17, 0.0 }
 0x265   : > { %825 = vadd.xlane.f32.xlu0 %v824_v18 }
 0x2ee   : > { %v826_v23 = vpop.xlane.xlu0 %825 }
 0x2ef   : > { %2709 = vrcp.f32 %v826_v23 }
 0x2fc   : > { %v2710_v25 = vpop.eup %2709 }
 0x2fd   : > { %v828_v27 = vmul.f32 %v2710_v25, %v2708_v17 }
 0x2ff   : > { %v829_v28 = vmul.f32 %v3016_v26, %v828_v27 }
 0x301   : > { %2577 = vmatmul.mubr.msk.f32.vlgmr.msra.gmra.mxu0 %vm743_vm2, %v829_v28  ;;  %v903_v29 = vsel %vm743_vm2, %v829_v28, 0.0 }
 0x302   : > { %904 = vadd.xlane.f32.xlu1 %v903_v29  ;;  %2581 = vmatprep.mubr.msk.f32.mxu0 %vm2816_vm0, %v2815_v0 }
 0x303   : > { %2580 = vmatpush3.msra.mxu0 %v3061_v3 }
 0x304   : > { %2589 = vmatprep.subr.mxu0 %v2815_v0 }
 0x38b   : > { %v905_v39 = vpop.xlane.xlu1 %904 }
 0x3c1   : > { %v899_v40 = vpop.f32.mrf.mxu0 }
 0x3c2   : > { %v906_v41 = vsub.f32 %v905_v39, %v899_v40 }
 0x3c3   : > { %v2578_v42 = vpop.f32.mrf.mxu0 }
 0x3c4   : > { %v907_v43 = vmul.f32 %v906_v41, %v3048_v38 }
 0x3c6   : > { %v908_v44 = vmax.f32 %v907_v43, 0.0 }
 0x3c8   : > { %2711 = vrsqrt.f32 %v908_v44  ;;  %vm911_vm5 = vcmp.eq.f32.partialorder %v908_v44, inf  ;;  %v914_v47 = vand.u32 2147483648, %v908_v44  ;;  %vm913_vm6 = vcmp.eq.f32.partialorder %v908_v44, 0.0 }
 0x3d5   : > { %v2712_v45 = vpop.eup %2711 }
 0x3d6   : > { %v910_v46 = vmul.f32 %v2712_v45, %v908_v44  ;;  %v1264_v45 = vstv %s2464_s27 }
 0x3d8   : > { %v912_v49 = vsel %vm911_vm5, %v908_v44, %v910_v46 }
 0x3d9   : > { %v915_v50 = vsel %vm913_vm6, %v914_v47, %v912_v49 }
 0x3da   : > { %v918_v51 = vmul.f32 %v917_v48, %v915_v50 }
 0x3dc   : > { %v919_v52 = vmul.f32 1.442695, %v918_v51 }
 0x3de   : > { %2713 = vpow2.f32 %v919_v52 }
 0x3eb   : > { %v2714_v53 = vpop.eup %2713 }
 0x3ec   : > { %v921_v54 = vmax.f32 %v2714_v53, 1e-05 }
 0x3ee   : > { %v922_v55 = vmin.f32 %v921_v54, 100000.0 }
 0x3f0   : > { %v923_v56 = vmul.f32 %v922_v55, %v2990_v11  ;;  %v1009_v11 = vld [vmem:[%s3266_s7] sm:$0xff] }
 0x3f1   : > { %2585 = vmatpush3.msra.mxu1 %v1009_v11 }
 0x3f2   : > { %v924_v57 = vsel %vm3009_vm4, %v923_v56, -1e+32  ;;  %2594 = vmatprep.subr.mxu1 %v2815_v0 }
 0x3f3   : > { %v925_v58 = vsel %vm743_vm2, %v924_v57, -inf }
 0x3f4   : > { %926 = vmax.xlane.f32.xlu1 %v925_v58 }
 0x405   : > { %1090 = vrot.lane.b32.xlu1 %v2981_v8, %s2818_s21 }
 0x47d   : > { %v927_v59 = vpop.xlane.xlu1 %926 }
 0x47e   : > { %v928_v60 = vsub.f32 %v924_v57, %v927_v59 }
 0x480   : > { %v929_v61 = vmul.f32 1.442695, %v928_v60 }
 0x481   : > { %v1091_v10 = vpop.permute.xlu1 %1090 }
 0x482   : > { %2715 = vpow2.f32 %v929_v61 }
 0x48f   : > { %v2716_v62 = vpop.eup %2715 }
 0x490   : > { %v931_v63 = vsel %vm743_vm2, %v2716_v62, 0.0 }
 0x491   : > { %932 = vadd.xlane.f32.xlu0 %v931_v63 }
 0x51a   : > { %v933_v6 = vpop.xlane.xlu0 %932 }
 0x51b   : > { %2717 = vrcp.f32 %v933_v6 }
 0x528   : > { %v2718_v7 = vpop.eup %2717 }
 0x529   : > { %v935_v9 = vmul.f32 %v2718_v7, %v2716_v62 }
 0x52b   : > { %2582 = vmatmul.mubr.msk.f32.vlgmr.msra.gmra.mxu0 %vm743_vm2, %v935_v9 }
 0x52c   : > { %2590 = vmatpush3.xpose.msk.msra.mxu0 %vm743_vm2, %v1091_v10  ;;  %2591 = vmatprep.mubr.msk.f32.mxu0 %vm2816_vm0, %v2815_v0 }
 0x52d   : > { %2599 = vmatprep.subr.mxu0 %v2815_v0 }
 0x52f   : > { %2592 = vmatmul.mubr.msk.f32.vlgmr.msra.gmra.mxu0 %vm743_vm2, %v1091_v10 }
 0x530   : > { %2601 = vmatprep.mubr.msk.f32.mxu0 %vm2816_vm0, %v2815_v0 }
 0x5eb   : > { %v1005_v12 = vpop.f32.mrf.mxu0 }
 0x5ec   : > { %2587 = vmatmul.mubr.msk.f32.vlgmr.msra.gmra.mxu1 %vm743_vm2, %v1005_v12 }
 0x5ed   : > { %v2583_v13 = vpop.f32.mrf.mxu0  ;;  %2595 = vmatpush3.msk.msra.mxu1 %vm734_vm3, %v2817_v22  ;;  %2596 = vmatprep.mubr.msk.f32.mxu1 %vm2816_vm0, %v2815_v0 }
 0x5ee   : > { %2604 = vmatprep.subr.mxu1 %v2815_v0 }
 0x5ef   : > { %v1160_v14 = vpop.f32.mrf.mxu0 }
 0x5f0   : > { %v1164_v15 = vmul.f32 0.35355338, %v1160_v14 }
 0x5f1   : > { %v2593_v16 = vpop.f32.mrf.mxu0 }
 0x5f2   : > { %v1165_v17 = vsel %vm743_vm2, %v1164_v15, -inf }
 0x5f3   : > { %1166 = vmax.xlane.f32.xlu0 %v1165_v17 }
 0x67c   : > { %v1167_v18 = vpop.xlane.xlu0 %1166 }
 0x67d   : > { %v1168_v19 = vsub.f32 %v1164_v15, %v1167_v18  ;;  %v2459_v18 = vld [vmem:[%s3267_s8] ss:$0 sm:$0xff] }
 0x67f   : > { %v1169_v23 = vmul.f32 1.442695, %v1168_v19 }
 0x681   : > { %2719 = vpow2.f32 %v1169_v23 }
 0x68e   : > { %v2720_v25 = vpop.eup %2719 }
 0x68f   : > { %v1171_v27 = vsel %vm743_vm2, %v2720_v25, 0.0 }
 0x690   : > { %1172 = vadd.xlane.f32.xlu0 %v1171_v27 }
 0x6ac   : > { %v3087_v28 = vpop.f32.mrf.mxu1 }
 0x6ad   : > { %v1089_v19 = vadd.f32 %v2459_v18, %v3087_v28 }
 0x6ae   : > { %v2588_v29 = vpop.f32.mrf.mxu1 }
 0x719   : > { %v1173_v30 = vpop.xlane.xlu0 %1172 }
 0x71a   : > { %2721 = vrcp.f32 %v1173_v30 }
 0x727   : > { %v2722_v31 = vpop.eup %2721 }
 0x728   : > { %v1175_v32 = vmul.f32 %v2722_v31, %v2720_v25 }
 0x72a   : > { %v1176_v33 = vmul.f32 %v3016_v26, %v1175_v32 }
 0x72c   : > { %2597 = vmatmul.mubr.msk.f32.vlgmr.msra.gmra.mxu1 %vm743_vm2, %v1176_v33  ;;  %v1250_v34 = vsel %vm743_vm2, %v1176_v33, 0.0 }
 0x72d   : > { %1251 = vadd.xlane.f32.xlu0 %v1250_v34  ;;  %2606 = vmatprep.mubr.msk.f32.mxu1 %vm2816_vm0, %v2815_v0 }
 0x72e   : > { %2605 = vmatpush3.msra.mxu1 %v1360_v4 }
 0x72f   : > { %2614 = vmatprep.subr.mxu1 %v2815_v0 }
 0x7b6   : > { %v1252_v35 = vpop.xlane.xlu0 %1251 }
 0x7ec   : > { %v1246_v36 = vpop.f32.mrf.mxu1 }
 0x7ed   : > { %v1253_v37 = vsub.f32 %v1252_v35, %v1246_v36 }
 0x7ee   : > { %v2598_v39 = vpop.f32.mrf.mxu1 }
 0x7ef   : > { %v1254_v40 = vmul.f32 %v1253_v37, %v3048_v38 }
 0x7f1   : > { %v1255_v41 = vmax.f32 %v1254_v40, 0.0 }
 0x7f3   : > { %2723 = vrsqrt.f32 %v1255_v41  ;;  %vm1258_vm7 = vcmp.eq.f32.partialorder %v1255_v41, inf  ;;  %v1261_v44 = vand.u32 2147483648, %v1255_v41  ;;  %vm1260_vm8 = vcmp.eq.f32.partialorder %v1255_v41, 0.0 }
 0x800   : > { %v2724_v42 = vpop.eup %2723 }
 0x801   : > { %v1257_v43 = vmul.f32 %v2724_v42, %v1255_v41  ;;  %v1609_v42 = vstv %s2471_s1 }
 0x803   : > { %v1259_v46 = vsel %vm1258_vm7, %v1255_v41, %v1257_v43 }
 0x804   : > { %v1262_v47 = vsel %vm1260_vm8, %v1261_v44, %v1259_v46 }
 0x805   : > { %v1265_v48 = vmul.f32 %v1264_v45, %v1262_v47 }
 0x807   : > { %v1266_v49 = vmul.f32 1.442695, %v1265_v48 }
 0x809   : > { %2725 = vpow2.f32 %v1266_v49 }
 0x816   : > { %v2726_v50 = vpop.eup %2725 }
 0x817   : > { %v1268_v51 = vmax.f32 %v2726_v50, 1e-05 }
 0x819   : > { %v1269_v52 = vmin.f32 %v1268_v51, 100000.0 }
 0x81b   : > { %v1270_v53 = vmul.f32 %v1269_v52, %v1164_v15 }
 0x81d   : > { %v1271_v54 = vsel %vm3009_vm4, %v1270_v53, -1e+32 }
 0x81e   : > { %v1272_v55 = vsel %vm743_vm2, %v1271_v54, -inf }
 0x81f   : > { %1273 = vmax.xlane.f32.xlu0 %v1272_v55 }
 0x835   : > { %1284 = vrot.lane.b32.xlu0 %v3061_v3, %s2818_s21 }
 0x839   : > { %1435 = vrot.lane.b32.xlu0 %v2981_v8, %s2819_s28 }
 0x8a8   : > { %v1274_v56 = vpop.xlane.xlu0 %1273 }
 0x8a9   : > { %v1275_v57 = vsub.f32 %v1271_v54, %v1274_v56 }
 0x8ab   : > { %v1276_v58 = vmul.f32 1.442695, %v1275_v57 }
 0x8ac   : > { %v1285_v59 = vpop.permute.xlu0 %1284 }
 0x8ad   : > { %2727 = vpow2.f32 %v1276_v58  ;;  %2600 = vmatpush3.msra.mxu0 %v1285_v59 }
 0x8ae   : > { %2609 = vmatprep.subr.mxu0 %v2815_v0 }
 0x8b0   : > { %v1436_v2 = vpop.permute.xlu0 %1435 }
 0x8ba   : > { %v2728_v60 = vpop.eup %2727 }
 0x8bb   : > { %v1278_v61 = vsel %vm743_vm2, %v2728_v60, 0.0 }
 0x8bc   : > { %1279 = vadd.xlane.f32.xlu1 %v1278_v61 }
 0x945   : > { %v1280_v62 = vpop.xlane.xlu1 %1279 }
 0x946   : > { %2729 = vrcp.f32 %v1280_v62 }
 0x953   : > { %v2730_v63 = vpop.eup %2729 }
 0x954   : > { %v1282_v1 = vmul.f32 %v2730_v63, %v2728_v60  ;;  %v1704_v63 = vld [vmem:[%s3266_s7 + $0x10] sm:$0xff] }
 0x956   : > { %2602 = vmatmul.mubr.msk.f32.vlgmr.msra.gmra.mxu0 %vm743_vm2, %v1282_v1 }
 0x957   : > { %2610 = vmatpush3.xpose.msk.msra.mxu0 %vm743_vm2, %v1436_v2  ;;  %2611 = vmatprep.mubr.msk.f32.mxu0 %vm2816_vm0, %v2815_v0 }
 0x958   : > { %2619 = vmatprep.subr.mxu0 %v2815_v0 }
 0x95a   : > { %2612 = vmatmul.mubr.msk.f32.vlgmr.msra.gmra.mxu0 %vm743_vm2, %v1436_v2 }
 0x95b   : > { %2621 = vmatprep.mubr.msk.f32.mxu0 %vm2816_vm0, %v2815_v0 }
 0xa16   : > { %v1356_v6 = vpop.f32.mrf.mxu0 }
 0xa17   : > { %2607 = vmatmul.mubr.msk.f32.vlgmr.msra.gmra.mxu1 %vm743_vm2, %v1356_v6 }
 0xa18   : > { %v2603_v7 = vpop.f32.mrf.mxu0  ;;  %2615 = vmatpush3.msk.msra.mxu1 %vm734_vm3, %v2817_v22  ;;  %2616 = vmatprep.mubr.msk.f32.mxu1 %vm2816_vm0, %v2815_v0 }
 0xa19   : > { %2624 = vmatprep.subr.mxu1 %v2815_v0 }
 0xa1a   : > { %v1505_v9 = vpop.f32.mrf.mxu0 }
 0xa1b   : > { %v1509_v10 = vmul.f32 0.35355338, %v1505_v9 }
 0xa1c   : > { %v2613_v11 = vpop.f32.mrf.mxu0 }
 0xa1d   : > { %v1510_v12 = vsel %vm743_vm2, %v1509_v10, -inf }
 0xa1e   : > { %1511 = vmax.xlane.f32.xlu0 %v1510_v12 }
 0xa34   : > { %1779 = vrot.lane.b32.xlu0 %v2981_v8, %s2820_s18 }
 0xaa7   : > { %v1512_v13 = vpop.xlane.xlu0 %1511 }
 0xaa8   : > { %v1513_v14 = vsub.f32 %v1509_v10, %v1512_v13 }
 0xaaa   : > { %v1514_v15 = vmul.f32 1.442695, %v1513_v14 }
 0xaab   : > { %v1780_v62 = vpop.permute.xlu0 %1779 }
 0xaac   : > { %2731 = vpow2.f32 %v1514_v15 }
 0xab9   : > { %v2732_v16 = vpop.eup %2731 }
 0xaba   : > { %v1516_v17 = vsel %vm743_vm2, %v2732_v16, 0.0 }
 0xabb   : > { %1517 = vadd.xlane.f32.xlu1 %v1516_v17 }
 0xad7   : > { %v1430_v23 = vpop.f32.mrf.mxu1 }
 0xad8   : > { %v3132_v25 = vadd.f32 %v1430_v23, %v1089_v19 }
 0xad9   : > { %v2608_v27 = vpop.f32.mrf.mxu1 }
 0xb44   : > { %v1518_v29 = vpop.xlane.xlu1 %1517 }
 0xb45   : > { %2733 = vrcp.f32 %v1518_v29 }
 0xb52   : > { %v2734_v8 = vpop.eup %2733 }
 0xb53   : > { %v1520_v30 = vmul.f32 %v2734_v8, %v2732_v16 }
 0xb55   : > { %v1521_v31 = vmul.f32 %v3016_v26, %v1520_v30 }
 0xb57   : > { %2617 = vmatmul.mubr.msk.f32.vlgmr.msra.gmra.mxu1 %vm743_vm2, %v1521_v31  ;;  %v1595_v32 = vsel %vm743_vm2, %v1521_v31, 0.0 }
 0xb58   : > { %1596 = vadd.xlane.f32.xlu1 %v1595_v32  ;;  %2626 = vmatprep.mubr.msk.f32.mxu1 %vm2816_vm0, %v2815_v0 }
 0xb59   : > { %2625 = vmatpush3.msra.mxu1 %v1704_v63  ;;  %v2157_v63 = vld [vmem:[#allocation4 + $0x18] sm:$0xff] }
 0xb5a   : > { %2634 = vmatprep.subr.mxu1 %v2815_v0 }
 0xbe1   : > { %v1597_v33 = vpop.xlane.xlu1 %1596 }
 0xc17   : > { %v1591_v28 = vpop.f32.mrf.mxu1 }
 0xc18   : > { %v1598_v34 = vsub.f32 %v1597_v33, %v1591_v28  ;;  %v1953_v33 = vstv %s2478_s22 }
 0xc19   : > { %v2618_v35 = vpop.f32.mrf.mxu1 }
 0xc1a   : > { %v1599_v36 = vmul.f32 %v1598_v34, %v3048_v38 }
 0xc1c   : > { %v1600_v37 = vmax.f32 %v1599_v36, 0.0 }
 0xc1e   : > { %2735 = vrsqrt.f32 %v1600_v37  ;;  %vm1603_vm9 = vcmp.eq.f32.partialorder %v1600_v37, inf  ;;  %v1606_v41 = vand.u32 2147483648, %v1600_v37  ;;  %vm1605_vm10 = vcmp.eq.f32.partialorder %v1600_v37, 0.0 }
 0xc2b   : > { %v2736_v39 = vpop.eup %2735 }
 0xc2c   : > { %v1602_v40 = vmul.f32 %v2736_v39, %v1600_v37 }
 0xc2e   : > { %v1604_v43 = vsel %vm1603_vm9, %v1600_v37, %v1602_v40 }
 0xc2f   : > { %v1607_v44 = vsel %vm1605_vm10, %v1606_v41, %v1604_v43 }
 0xc30   : > { %v1610_v45 = vmul.f32 %v1609_v42, %v1607_v44 }
 0xc32   : > { %v1611_v46 = vmul.f32 1.442695, %v1610_v45 }
 0xc34   : > { %2737 = vpow2.f32 %v1611_v46 }
 0xc41   : > { %v2738_v47 = vpop.eup %2737 }
 0xc42   : > { %v1613_v48 = vmax.f32 %v2738_v47, 1e-05 }
 0xc44   : > { %v1614_v49 = vmin.f32 %v1613_v48, 100000.0 }
 0xc46   : > { %v1615_v50 = vmul.f32 %v1614_v49, %v1509_v10 }
 0xc48   : > { %v1616_v51 = vsel %vm3009_vm4, %v1615_v50, -1e+32 }
 0xc49   : > { %v1617_v52 = vsel %vm743_vm2, %v1616_v51, -inf }
 0xc4a   : > { %1618 = vmax.xlane.f32.xlu1 %v1617_v52 }
 0xcd3   : > { %v1619_v53 = vpop.xlane.xlu1 %1618 }
 0xcd4   : > { %v1620_v54 = vsub.f32 %v1616_v51, %v1619_v53 }
 0xcd6   : > { %v1621_v55 = vmul.f32 1.442695, %v1620_v54 }
 0xcd8   : > { %2739 = vpow2.f32 %v1621_v55 }
 0xce5   : > { %v2740_v56 = vpop.eup %2739 }
 0xce6   : > { %v1623_v57 = vsel %vm743_vm2, %v2740_v56, 0.0 }
 0xce7   : > { %1624 = vadd.xlane.f32.xlu1 %v1623_v57 }
 0xcf8   : > { %1628 = vrot.lane.b32.xlu1 %v3061_v3, %s2819_s28 }
 0xd70   : > { %v1625_v58 = vpop.xlane.xlu1 %1624 }
 0xd71   : > { %2741 = vrcp.f32 %v1625_v58 }
 0xd74   : > { %v1629_v59 = vpop.permute.xlu1 %1628 }
 0xd75   : > { %2620 = vmatpush3.msra.mxu0 %v1629_v59 }
 0xd76   : > { %2629 = vmatprep.subr.mxu0 %v2815_v0 }
 0xd7e   : > { %v2742_v60 = vpop.eup %2741 }
 0xd7f   : > { %v1627_v61 = vmul.f32 %v2742_v60, %v2740_v56 }
 0xd81   : > { %2622 = vmatmul.mubr.msk.f32.vlgmr.msra.gmra.mxu0 %vm743_vm2, %v1627_v61 }
 0xd82   : > { %2630 = vmatpush3.xpose.msk.msra.mxu0 %vm743_vm2, %v1780_v62  ;;  %2631 = vmatprep.mubr.msk.f32.mxu0 %vm2816_vm0, %v2815_v0 }
 0xd83   : > { %2639 = vmatprep.subr.mxu0 %v2815_v0 }
 0xd85   : > { %2632 = vmatmul.mubr.msk.f32.vlgmr.msra.gmra.mxu0 %vm743_vm2, %v1780_v62 }
 0xd86   : > { %2641 = vmatprep.mubr.msk.f32.mxu0 %vm2816_vm0, %v2815_v0 }
 0xe41   : > { %v1700_v1 = vpop.f32.mrf.mxu0 }
 0xe42   : > { %2627 = vmatmul.mubr.msk.f32.vlgmr.msra.gmra.mxu1 %vm743_vm2, %v1700_v1  ;;  %v2156_v1 = vld [vmem:[#allocation4 + $0x10] sm:$0xff] }
 0xe43   : > { %v2623_v2 = vpop.f32.mrf.mxu0  ;;  %2635 = vmatpush3.msk.msra.mxu1 %vm734_vm3, %v2817_v22  ;;  %2636 = vmatprep.mubr.msk.f32.mxu1 %vm2816_vm0, %v2815_v0 }
 0xe44   : > { %2644 = vmatprep.subr.mxu1 %v2815_v0  ;;  %v2155_v2 = vld [vmem:[#allocation4 + $0x8] sm:$0xff] }
 0xe45   : > { %v1849_v4 = vpop.f32.mrf.mxu0 }
 0xe46   : > { %v1853_v6 = vmul.f32 0.35355338, %v1849_v4  ;;  %v2246_v4 = vld [vmem:[%s3272_s13 + $0x38] sm:$0xff] }
 0xe47   : > { %v2633_v7 = vpop.f32.mrf.mxu0 }
 0xe48   : > { %v1854_v9 = vsel %vm743_vm2, %v1853_v6, -inf  ;;  %v2244_v7 = vld [vmem:[%s3272_s13 + $0x28] sm:$0xff] }
 0xe49   : > { %1855 = vmax.xlane.f32.xlu1 %v1854_v9  ;;  %v2243_v9 = vld [vmem:[%s3272_s13 + $0x20] sm:$0xff] }
 0xed2   : > { %v1856_v10 = vpop.xlane.xlu1 %1855 }
 0xed3   : > { %v1857_v11 = vsub.f32 %v1853_v6, %v1856_v10  ;;  %v2242_v10 = vld [vmem:[%s3272_s13 + $0x18] sm:$0xff] }
 0xed5   : > { %v1858_v12 = vmul.f32 1.442695, %v1857_v11 }
 0xed7   : > { %2743 = vpow2.f32 %v1858_v12 }
 0xee4   : > { %v2744_v13 = vpop.eup %2743 }
 0xee5   : > { %v1860_v14 = vsel %vm743_vm2, %v2744_v13, 0.0 }
 0xee6   : > { %1861 = vadd.xlane.f32.xlu0 %v1860_v14 }
 0xf02   : > { %v1774_v20 = vpop.f32.mrf.mxu1 }
 0xf03   : > { %v1778_v21 = vadd.f32 %v1774_v20, %v3132_v25  ;;  %v2481_v20 = vld [vmem:[%s3268_s9] ss:$0 sm:$0xff] }
 0xf04   : > { %v2628_v22 = vpop.f32.mrf.mxu1 }
 0xf05   : > { %v2482_v22 = vld [vmem:[%s3285_s26] ss:$0 sm:$0xff] }
 0xf6f   : > { %v1862_v15 = vpop.xlane.xlu0 %1861 }
 0xf70   : > { %2745 = vrcp.f32 %v1862_v15 }
 0xf7d   : > { %v2746_v16 = vpop.eup %2745 }
 0xf7e   : > { %v1864_v17 = vmul.f32 %v2746_v16, %v2744_v13 }
 0xf80   : > { %v1865_v18 = vmul.f32 %v3016_v26, %v1864_v17  ;;  %v2241_v17 = vld [vmem:[%s3272_s13 + $0x10] sm:$0xff] }
 0xf82   : > { %2637 = vmatmul.mubr.msk.f32.vlgmr.msra.gmra.mxu1 %vm743_vm2, %v1865_v18  ;;  %v1939_v19 = vsel %vm743_vm2, %v1865_v18, 0.0  ;;  %v2240_v18 = vld [vmem:[%s3272_s13 + $0x8] sm:$0xff] }
 0xf83   : > { %1940 = vadd.xlane.f32.xlu1 %v1939_v19  ;;  %2646 = vmatprep.mubr.msk.f32.mxu1 %vm2816_vm0, %v2815_v0  ;;  %v2239_v19 = vld [vmem:[%s3272_s13] sm:$0xff] }
 0xf84   : > { %2645 = vmatpush3.msra.mxu1 %v2048_v24 }
 0xf85   : > { %2660 = vmatprep.subr.mxu1 %v2815_v0 }
0x100c   : > { %v1941_v23 = vpop.xlane.xlu1 %1940 }
0x1042   : > { %v1935_v27 = vpop.f32.mrf.mxu1 }
0x1043   : > { %v1942_v29 = vsub.f32 %v1941_v23, %v1935_v27  ;;  %v2483_v23 = vld [vmem:[%s3271_s12] ss:$0 sm:$0xff] }
0x1044   : > { %v2638_v8 = vpop.f32.mrf.mxu1 }
0x1045   : > { %v1943_v25 = vmul.f32 %v1942_v29, %v3048_v38 }
0x1047   : > { %v1944_v30 = vmax.f32 %v1943_v25, 0.0 }
0x1049   : > { %2747 = vrsqrt.f32 %v1944_v30  ;;  %vm1947_vm11 = vcmp.eq.f32.partialorder %v1944_v30, inf  ;;  %v1950_v26 = vand.u32 2147483648, %v1944_v30  ;;  %vm1949_vm12 = vcmp.eq.f32.partialorder %v1944_v30, 0.0 }
0x1056   : > { %v2748_v31 = vpop.eup %2747 }
0x1057   : > { %v1946_v32 = vmul.f32 %v2748_v31, %v1944_v30 }
0x1059   : > { %v1948_v28 = vsel %vm1947_vm11, %v1944_v30, %v1946_v32  ;;  %v2485_v30 = vld [vmem:[%s3273_s14] ss:$0 sm:$0xff] }
0x105a   : > { %v1951_v34 = vsel %vm1949_vm12, %v1950_v26, %v1948_v28 }
0x105b   : > { %v1954_v35 = vmul.f32 %v1953_v33, %v1951_v34 }
0x105d   : > { %v1955_v36 = vmul.f32 1.442695, %v1954_v35 }
0x105f   : > { %2749 = vpow2.f32 %v1955_v36 }
0x106c   : > { %v2750_v37 = vpop.eup %2749 }
0x106d   : > { %v1957_v39 = vmax.f32 %v2750_v37, 1e-05 }
0x106f   : > { %v1958_v40 = vmin.f32 %v1957_v39, 100000.0 }
0x1071   : > { %v1959_v41 = vmul.f32 %v1958_v40, %v1853_v6  ;;  %v2245_v6 = vld [vmem:[%s3272_s13 + $0x30] sm:$0xff] }
0x1073   : > { %v1960_v38 = vsel %vm3009_vm4, %v1959_v41, -1e+32 }
0x1074   : > { %v1961_v42 = vsel %vm743_vm2, %v1960_v38, -inf }
0x1075   : > { %1962 = vmax.xlane.f32.xlu1 %v1961_v42  ;;  %v2487_v42 = vld [vmem:[%s3274_s15] ss:$0 sm:$0xff] }
0x1086   : > { %1972 = vrot.lane.b32.xlu1 %v3061_v3, %s2820_s18 }
0x10fe   : > { %v1963_v43 = vpop.xlane.xlu1 %1962 }
0x10ff   : > { %v1964_v44 = vsub.f32 %v1960_v38, %v1963_v43 }
0x1101   : > { %v1965_v45 = vmul.f32 1.442695, %v1964_v44  ;;  %v2488_v44 = vld [vmem:[%s3275_s16] ss:$0 sm:$0xff] }
0x1102   : > { %v1973_v46 = vpop.permute.xlu1 %1972 }
0x1103   : > { %2751 = vpow2.f32 %v1965_v45  ;;  %2640 = vmatpush3.msra.mxu0 %v1973_v46 }
0x1104   : > { %2649 = vmatprep.subr.mxu0 %v2815_v0 }
0x1110   : > { %v2752_v47 = vpop.eup %2751 }
0x1111   : > { %v1967_v48 = vsel %vm743_vm2, %v2752_v47, 0.0 }
0x1112   : > { %1968 = vadd.xlane.f32.xlu0 %v1967_v48 }
0x119b   : > { %v1969_v3 = vpop.xlane.xlu0 %1968 }
0x119c   : > { %2753 = vrcp.f32 %v1969_v3 }
0x11a9   : > { %v2754_v49 = vpop.eup %2753 }
0x11aa   : > { %v1971_v50 = vmul.f32 %v2754_v49, %v2752_v47 }
0x11ac   : > { %2642 = vmatmul.mubr.msk.f32.vlgmr.msra.gmra.mxu0 %vm743_vm2, %v1971_v50 }
0x11ad   : > { %2657 = vmatprep.mubr.msk.f32.mxu0 %vm2816_vm0, %v2815_v0  ;;  %2650 = vmatpush3.msra.mxu0 %v2157_v63 }
0x11ae   : > { %2651 = vmatprep.subr.mxu0 %v2815_v0 }
0x11af   : > { %2652 = vmatpush3.msra.mxu0 %v2156_v1 }
0x11b0   : > { %2653 = vmatprep.subr.mxu0 %v2815_v0 }
0x11b1   : > { %2654 = vmatpush3.msra.mxu0 %v2155_v2 }
0x11b2   : > { %2655 = vmatprep.subr.mxu0 %v2815_v0 }
0x126c   : > { %v2044_v51 = vpop.f32.mrf.mxu0 }
0x126d   : > { %2647 = vmatmul.mubr.msk.f32.vlgmr.msra.gmra.mxu1 %vm743_vm2, %v2044_v51 }
0x126e   : > { %v2643_v52 = vpop.f32.mrf.mxu0  ;;  %2676 = vmatprep.mubr.msk.f32.mxu1 %vm2816_vm0, %v2815_v0  ;;  %2661 = vmatpush3.msra.mxu1 %v2246_v4 }
0x126f   : > { %2662 = vmatprep.subr.mxu1 %v2815_v0 }
0x1270   : > { %2663 = vmatpush3.msra.mxu1 %v2245_v6 }
0x1271   : > { %2664 = vmatprep.subr.mxu1 %v2815_v0 }
0x1272   : > { %2665 = vmatpush3.msra.mxu1 %v2244_v7 }
0x1273   : > { %2666 = vmatprep.subr.mxu1 %v2815_v0 }
0x1274   : > { %2667 = vmatpush3.msra.mxu1 %v2243_v9 }
0x1275   : > { %2668 = vmatprep.subr.mxu1 %v2815_v0 }
0x1276   : > { %2669 = vmatpush3.msra.mxu1 %v2242_v10 }
0x1277   : > { %2670 = vmatprep.subr.mxu1 %v2815_v0 }
0x1278   : > { %2671 = vmatpush3.msra.mxu1 %v2241_v17 }
0x1279   : > { %2672 = vmatprep.subr.mxu1 %v2815_v0 }
0x127a   : > { %2673 = vmatpush3.msra.mxu1 %v2240_v18 }
0x127b   : > { %2674 = vmatprep.subr.mxu1 %v2815_v0 }
0x127c   : > { %2675 = vmatpush3.msra.mxu1 %v2239_v19 }
0x132d   : > { %v2118_v53 = vpop.f32.mrf.mxu1 }
0x132e   : > { %v2122_v54 = vadd.f32 %v2118_v53, %v1778_v21 }
0x132f   : > { %v2648_v55 = vpop.f32.mrf.mxu1 }
0x1330   : > { %v2123_v56 = vadd.f32 %v2122_v54, %v2970_v5  ;;  %v2154_v5 = vld [vmem:[#allocation4] sm:$0xff] }
0x1331   : > { %2656 = vmatpush3.msra.mxu0 %v2154_v5 }
0x1332   : > { %v2126_v57 = vsel %vm569_vm1, %v2123_v56, 0.0 }
0x1333   : > { %2127 = vadd.xlane.f32.xlu0 %v2126_v57 }
0x13bc   : > { %v2128_v58 = vpop.xlane.xlu0 %2127 }
0x13bd   : > { %v2130_v59 = vmul.f32 0.03125, %v2128_v58 }
0x13bf   : > { %v2131_v60 = vsub.f32 %v2123_v56, %v2130_v59 }
0x13c1   : > { %v2132_v61 = vmul.f32 %v2131_v60, %v2131_v60 }
0x13c3   : > { %v2133_v62 = vsel %vm569_vm1, %v2132_v61, 0.0 }
0x13c4   : > { %2134 = vadd.xlane.f32.xlu0 %v2133_v62 }
0x144d   : > { %v2135_v11 = vpop.xlane.xlu0 %2134 }
0x144e   : > { %v2136_v12 = vmul.f32 0.03125, %v2135_v11 }
0x1450   : > { %v2137_v13 = vadd.f32 1e-05, %v2136_v12 }
0x1452   : > { %2755 = vrsqrt.f32 %v2137_v13 }
0x145f   : > { %v2756_v14 = vpop.eup %2755 }
0x1460   : > { %v2139_v21 = vmul.f32 %v2756_v14, %v2131_v60 }
0x1462   : > { %v2146_v15 = vmul.f32 %v2481_v20, %v2139_v21 }
0x1464   : > { %v2153_v16 = vadd.f32 %v2482_v22, %v2146_v15 }
0x1466   : > { %2658 = vmatmul.mubr.msk.f32.vlgmr.msra.gmra.mxu0 %vm569_vm1, %v2153_v16 }
0x1526   : > { %v2234_v27 = vpop.f32.mrf.mxu0 }
0x1527   : > { %v2235_v29 = vadd.f32 %v2483_v23, %v2234_v27 }
0x1528   : > { %v2659_v8 = vpop.f32.mrf.mxu0 }
0x1529   : > { %v2238_v25 = vmax.f32 %v2235_v29, 0.0 }
0x152b   : > { %2677 = vmatmul.mubr.msk.f32.vlgmr.msra.gmra.mxu1 %vm2254_vm13, %v2238_v25 }
0x15eb   : > { %v2324_v31 = vpop.f32.mrf.mxu1 }
0x15ec   : > { %v2325_v32 = vadd.f32 %v2485_v30, %v2324_v31 }
0x15ed   : > { %v2678_v26 = vpop.f32.mrf.mxu1 }
0x15ee   : > { %v2328_v33 = vadd.f32 %v2325_v32, %v2153_v16 }
0x15f0   : > { %v2331_v0 = vsel %vm569_vm1, %v2328_v33, 0.0 }
0x15f1   : > { %2332 = vadd.xlane.f32.xlu0 %v2331_v0 }
0x167a   : > { %v2333_v28 = vpop.xlane.xlu0 %2332 }
0x167b   : > { %v2334_v34 = vmul.f32 0.03125, %v2333_v28 }
0x167d   : > { %v2335_v35 = vsub.f32 %v2328_v33, %v2334_v34 }
0x167f   : > { %v2336_v36 = vmul.f32 %v2335_v35, %v2335_v35 }
0x1681   : > { %v2337_v37 = vsel %vm569_vm1, %v2336_v36, 0.0 }
0x1682   : > { %2338 = vadd.xlane.f32.xlu0 %v2337_v37 }
0x170b   : > { %v2339_v39 = vpop.xlane.xlu0 %2338 }
0x170c   : > { %v2340_v40 = vmul.f32 0.03125, %v2339_v39 }
0x170e   : > { %v2341_v41 = vadd.f32 1e-05, %v2340_v40 }
0x1710   : > { %2757 = vrsqrt.f32 %v2341_v41 }
0x171d   : > { %v2758_v38 = vpop.eup %2757 }
0x171e   : > { %v2343_v43 = vmul.f32 %v2758_v38, %v2335_v35 }
0x1720   : > { %v2350_v45 = vmul.f32 %v2487_v42, %v2343_v43 }
0x1722   : > { %v2357_v46 = vadd.f32 %v2488_v44, %v2350_v45 }
0x1724   : > { %2358 = vst.msk [vmem:[%s555_s10] sm:$0xff] %vm569_vm1, %v2357_v46 }
0x1725 PF: > { %s34_s29 = sadd.s32 1, %s2809_s29  }
0x1726   : > { %p31_p6 = scmp.ge.s32.totalorder %s34_s29, 4  }
0x1728   :  { %33 = sbr.rel (!%p31_p6) target bundleno = 25 (0x19), region = 122 }
0x172d   :  { %2378 = vsyncpa [#allocation5], 1 }
0x172e   :  { %2380 = vsyncpa [#allocation5 + $0x1], 1 }

// kernel: architecture_forward.5
= control target key start
LH: loop header
LB: loop body
LE: loop exit
PB: predicated region body
PF: predicated region fallthrough
CT: control target
= control target key end

     0   :  { %s3370_s0 = inlined_call_operand.vmem [shape: f32[4], index: 0, kind: input, shape index: {}]   ;;  %s3371_s1 = inlined_call_operand.vmem [shape: f32[2,8,32], index: 1, kind: input, shape index: {}]   ;;  %s3372_s2 = inlined_call_operand.vmem [shape: f32[2,8,32], index: 2, kind: input, shape index: {}]   ;;  %s3373_s3 = inlined_call_operand.vmem [shape: f32[32,32], index: 3, kind: input, shape index: {}]   ;;  %s3374_s4 = inlined_call_operand.vmem [shape: f32[1,32], index: 4, kind: input, shape index: {}]   ;;  %s3375_s5 = inlined_call_operand.vmem [shape: f32[32,32], index: 5, kind: input, shape index: {}]   ;;  %s3376_s6 = inlined_call_operand.vmem [shape: f32[1,32], index: 6, kind: input, shape index: {}]   ;;  %s3377_s7 = inlined_call_operand.vmem [shape: f32[32,32], index: 7, kind: input, shape index: {}]   ;;  %s3378_s8 = inlined_call_operand.vmem [shape: f32[1,32], index: 8, kind: input, shape index: {}]   ;;  %s3379_s9 = inlined_call_operand.vmem [shape: f32[1,32], index: 9, kind: input, shape index: {}]   ;;  %s3380_s10 = inlined_call_operand.vmem [shape: f32[1,32], index: 10, kind: input, shape index: {}]   ;;  %s3381_s11 = inlined_call_operand.vmem [shape: f32[32,64], index: 11, kind: input, shape index: {}]   ;;  %s3382_s12 = inlined_call_operand.vmem [shape: f32[1,64], index: 12, kind: input, shape index: {}]   ;;  %s3383_s13 = inlined_call_operand.vmem [shape: f32[64,32], index: 13, kind: input, shape index: {}]   ;;  %s3384_s14 = inlined_call_operand.vmem [shape: f32[1,32], index: 14, kind: input, shape index: {}]   ;;  %s3385_s15 = inlined_call_operand.vmem [shape: f32[1,32], index: 15, kind: input, shape index: {}]   ;;  %s3386_s16 = inlined_call_operand.vmem [shape: f32[1,32], index: 16, kind: input, shape index: {}]   ;;  %s3387_s17 = inlined_call_operand.hbm [shape: f32[2,8,32], index: 17, kind: output, shape index: {}]  }
   0x1   :  { %3391 = sst [smem:[#allocation11_spill]] %s3370_s0 }
   0x2   :  { %3392 = sst [smem:[#allocation12_spill]] %s3371_s1 }
   0x3   :  { %3393 = sst [smem:[#allocation13_spill]] %s3372_s2 }
   0x4   :  { %3394 = sst [smem:[#allocation14_spill]] %s3373_s3 }
   0x5   :  { %3395 = sst [smem:[#allocation15_spill]] %s3374_s4 }
   0x6   :  { %3396 = sst [smem:[#allocation16_spill]] %s3380_s10 }
   0x7   :  { %s3397_s26 = sld [smem:[#allocation11_spill]] }
   0xd   :  { %s22_s10 = sshll.u32 %s3397_s26, 4  ;;  %s23_s10 = int_to_ptr.vmem [resolvable:$true] %s22_s10 }
   0xe   :  { %s2774_s27 = scalar_lea.vmem %s23_s10, 16  ;;  %p2779_p1 = scmp.lt.s32.totalorder %s23_s10, %s23_s10 }
   0xf   :  { %p2775_p0 = scmp.ne.s32.totalorder %s23_s10, %s2774_s27  ;;  %p2780_p2 = scmp.lt.s32.totalorder %s2774_s27, %s2774_s27 }
  0x11   :  { %p2781_p3 = por %p2780_p2, %p2779_p1 }
  0x13   :  { %p2782_p4 = pnand %p2781_p3, %p2775_p0 }
  0x15   :  { %2785 = shalt.err (!%p2782_p4)  }
  0x16   :  { %s2850_s28 = smov [#allocation3]  }
  0x17   :  { %25 = dma.vmem_to_smem %s23_s10, 16, %s2850_s28, [#allocation2] }
  0x18   :  { %2828 = dma.done.wait [#allocation2], 16 }
  0x19   :  { %2829 = vsyncadd [#allocation2], 4294967280 }
  0x1a   :  { %27 = sfence }
  0x1b   :  { %28 = vsyncpa [#allocation5], 0 }
  0x1c   :  { %30 = vsyncpa [#allocation5 + $0x1], 0  ;;  %s2951_s29 = smov 0   ;;  %s2953_s0 = smov 0  }
  0x1d   :  { %s2955_s30 = smov 0   ;;  %s2957_s18 = smov 0  }
  0x1e LB: > { %3398 = sst [smem:[#allocation8_spill]] %s2844_s30  ;;  %s2972_s10 = sadd.s32 4294967295, %s2848_s18   ;;  %s2848_s18 = sphi %s2957_s18, %s3410_s18   ;;  %s2844_s30 = sphi %s2955_s30, %s3412_s30   ;;  %s2840_s0 = sphi %s2953_s0, %s3414_s0   ;;  %s2836_s29 = sphi %s2951_s29, %s3413_s29  }
  0x1f   : > { %s2434_s19 = sadd.s32 4294967294, %s2848_s18   ;;  %s2976_s1 = sadd.s32 1, %s2848_s18  }
  0x20   : > { %3399 = sst [smem:[#allocation9_spill]] %s2976_s1  ;;  %s389_s20 = sadd.s32 1, %s2844_s30 }
  0x21   : > { %s386_s21 = ssub.s32 %s2848_s18, %s2976_s1  ;;  %p399_p5 = scmp.ne.s32.totalorder %s2844_s30, %s2840_s0 }
  0x22   : > { %p387_p6 = scmp.eq.s32.totalorder %s386_s21, 0  ;;  %p400_p7 = scmp.eq.s32.totalorder %s2972_s10, 1 }
  0x23   : > { %p405_p8 = scmp.ne.s32.totalorder %s2840_s0, %s2836_s29  ;;  %p406_p9 = scmp.eq.s32.totalorder %s2434_s19, 1 }
  0x24   : > { %s2987_s22 = scalar_select %p387_p6, %s2844_s30, %s389_s20  }
  0x25   : > { %p2989_p10 = por %p400_p7, %p399_p5  ;;  %p2993_p11 = por %p406_p9, %p405_p8 }
  0x26   : > { %3400 = sst [smem:[#allocation10_spill]] %s2987_s22  ;;  %p2437_p12 = scmp.ge.s32.totalorder %s2848_s18, 1 }
  0x27   : > { %p480_p13 = scmp.lt.s32.totalorder %s2848_s18, 3 }
  0x29   : > { %p481_p0 = pnand %p2437_p12, %p480_p13 }
  0x2a   : > { %s3403_s3 = sld [smem:[#allocation14_spill]] (!%p481_p0)  ;;  %p533_p1 = scmp.lt.s32.totalorder (!%p481_p0), %s2972_s10, 1 }
  0x2b   : > { %484 = sbr.rel (%p481_p0) target bundleno = 5936 (0x1730), region = 84  ;;  %s3404_s30 = sld [smem:[#allocation12_spill]] (!%p481_p0) }
  0x2c   : > { %s3405_s4 = sld [smem:[#allocation15_spill]] (!%p481_p0)  ;;  %s2855_s20 = smov (!%p481_p0), 112  }
  0x2d   : > { %s3408_s2 = sld [smem:[#allocation13_spill]] (!%p481_p0)  ;;  %s2485_s22 = sshll.u32 (!%p481_p0), %s2972_s10, 7 }
  0x2e   : > { %s2459_s28 = sld [smem:[#allocation3 + $0x1]] (!%p481_p0) }
  0x2f   : > { %s2473_s27 = sld [smem:[#allocation3 + $0x3]] (!%p481_p0) }
  0x30   : > { %v546_v0 = vld [vmem:[%s3403_s3 + $0x18] sm:$0xff]  ;;  %v2851_v1 = vmov 0.0   ;;  %v545_v2 = vld [vmem:[%s3403_s3 + $0x10] sm:$0xff]  ;;  %vm2852_vm0 = vmmov 0   ;;  %s3010_s19 = scalar_select %p533_p1, %s2972_s10, 1  ;;  %v544_v3 = vld [vmem:[%s3403_s3 + $0x8] sm:$0xff]  ;;  %v712_v19 = vlaneseq }
  0x31   : > { %2544 = vmatprep.subr.mxu0 %v2851_v1  ;;  %2552 = vmatprep.mubr.msk.f32.mxu0 %vm2852_vm0, %v2851_v1  ;;  %v543_v4 = vld [vmem:[%s3403_s3] sm:$0xff]  ;;  %vm554_vm1 = vcmask 261120   ;;  %vm728_vm2 = vcmask 64512   ;;  %v2853_v22 = vmov 1.0   ;;  %v631_v30 = vld [vmem:[%s3375_s5 + $0x18] sm:$0xff]  ;;  %v630_v31 = vld [vmem:[%s3375_s5 + $0x10] sm:$0xff] }
  0x32   : > { %2545 = vmatpush3.msra.mxu0 %v546_v0  ;;  %2555 = vmatprep.subr.mxu1 %v2851_v1  ;;  %s2439_s25 = sshll.u32 %s3010_s19, 3  ;;  %v2441_v6 = vld [vmem:[%s3405_s4] ss:$0 sm:$0xff]  ;;  %v3055_v20 = vshrl.u32 %v712_v19, 7  ;;  %v3057_v21 = vand.u32 127, %v712_v19  ;;  %v629_v32 = vld [vmem:[%s3375_s5 + $0x8] sm:$0xff] }
  0x33   : > { %2546 = vmatprep.subr.mxu0 %v2851_v1  ;;  %2563 = vmatprep.mubr.msk.f32.mxu1 %vm2852_vm0, %v2851_v1  ;;  %s536_s1 = scalar_lea.vmem %s3404_s30, %s2439_s25  ;;  %s540_s3 = scalar_lea.vmem %s3408_s2, %s2439_s25  ;;  %v628_v33 = vld [vmem:[%s3375_s5] sm:$0xff]  ;;  %v2038_v24 = vld [vmem:[%s3377_s7 + $0x18] sm:$0xff]  ;;  %vm2244_vm14 = vcmask 523264  }
  0x34   : > { %2547 = vmatpush3.msra.mxu0 %v545_v2  ;;  %v3029_v5 = vld [vmem:[%s536_s1] sm:$0xff]  ;;  %vm719_vm3 = vcmp.le.s32.totalorder %v3055_v20, %v3057_v21  ;;  %vm3068_vm4 = vcmp.lt.s32.totalorder %v3057_v21, %v3055_v20  ;;  %2556 = vmatpush3.msra.mxu1 %v631_v30  ;;  %v722_v35 = vsub.s32 %v3057_v21, %v3055_v20  ;;  %s2854_s19 = smov 120   ;;  %vm921_vm7 = vcmp.eq.s32.totalorder %v3055_v20, 0  ;;  %s2856_s1 = smov 104  }
  0x35   : > { %2548 = vmatprep.subr.mxu0 %v2851_v1  ;;  %v3075_v26 = vsel %vm3068_vm4, 1.0, %v2851_v1  ;;  %2557 = vmatprep.subr.mxu1 %v2851_v1  ;;  %v542_v34 = vld [vmem:[%s540_s3] sm:$0xff]  ;;  %s901_s3 = sld [smem:[#allocation3]]  ;;  %s2361_s2 = scalar_lea.hbm %s3387_s17, %s2485_s22 }
  0x36   : > { %2549 = vmatpush3.msra.mxu0 %v544_v3  ;;  %2558 = vmatpush3.msra.mxu1 %v630_v31  ;;  %v724_v36 = vsub.s32 0, %v722_v35  ;;  %v2443_v0 = vld [vmem:[%s3376_s6] ss:$0 sm:$0xff]  ;;  %s2466_s25 = sld [smem:[#allocation3 + $0x2]] }
  0x37   : > { %2550 = vmatprep.subr.mxu0 %v2851_v1  ;;  %2559 = vmatprep.subr.mxu1 %v2851_v1  ;;  %s3409_s21 = sld [smem:[#allocation16_spill]] }
  0x38   : > { %2551 = vmatpush3.msra.mxu0 %v543_v4  ;;  %2560 = vmatpush3.msra.mxu1 %v629_v32  ;;  %v2447_v37 = vmin.u32 %v724_v36, %v722_v35 }
  0x39   : > { %2553 = vmatmul.mubr.msk.f32.vlgmr.msra.gmra.mxu0 %vm554_vm1, %v3029_v5  ;;  %2566 = vmatprep.subr.mxu0 %v2851_v1 }
  0x3a   : > { %2568 = vmatprep.mubr.msk.f32.mxu0 %vm2852_vm0, %v2851_v1  ;;  %2561 = vmatprep.subr.mxu1 %v2851_v1  ;;  %v3108_v38 = vcvt.s32.f32 %v2447_v37 }
  0x3b   : > { %2562 = vmatpush3.msra.mxu1 %v628_v33  ;;  %v902_v48 = vstv %s901_s3  ;;  %s2857_s3 = smov [#allocation4]  }
  0x3c   : > { %2564 = vmatmul.mubr.msk.f32.vlgmr.msra.gmra.mxu1 %vm554_vm1, %v542_v34  ;;  %2581 = vmatprep.subr.mxu1 %v2851_v1 }
  0x3d   : > { %2583 = vmatprep.mubr.msk.f32.mxu1 %vm2852_vm0, %v2851_v1 }
  0xf9   : > { %v624_v7 = vpop.f32.mrf.mxu0 }
  0xfa   : > { %v3040_v8 = vadd.f32 %v2441_v6, %v624_v7 }
  0xfb   : > { %v2554_v9 = vpop.f32.mrf.mxu0 }
  0xfc   : > { %2567 = vmatpush3.xpose.msk.msra.mxu0 %vm728_vm2, %v3040_v8  ;;  %v708_v2 = vpop.f32.mrf.mxu1 }
  0xfd   : > { %2571 = vmatprep.subr.mxu0 %v2851_v1  ;;  %v3121_v3 = vadd.f32 %v2443_v0, %v708_v2 }
  0xfe   : > { %v2565_v4 = vpop.f32.mrf.mxu1 }
  0xff   : > { %2569 = vmatmul.mubr.msk.f32.vlgmr.msra.gmra.mxu0 %vm728_vm2, %v3040_v8 }
 0x100   : > { %2573 = vmatprep.mubr.msk.f32.mxu0 %vm2852_vm0, %v2851_v1  ;;  %2572 = vmatpush3.msk.msra.mxu0 %vm719_vm3, %v2853_v22 }
 0x101   : > { %2576 = vmatprep.subr.mxu0 %v2851_v1 }
 0x1bf   : > { %v798_v10 = vpop.f32.mrf.mxu0 }
 0x1c0   : > { %v3049_v11 = vmul.f32 0.35355338, %v798_v10 }
 0x1c1   : > { %v2570_v12 = vpop.f32.mrf.mxu0 }
 0x1c2   : > { %v803_v13 = vsel %vm728_vm2, %v3049_v11, -inf  ;;  %v996_v12 = vld [vmem:[%s3377_s7] sm:$0xff] }
 0x1c3   : > { %804 = vmax.xlane.f32.xlu0 %v803_v13  ;;  %2582 = vmatpush3.msra.mxu1 %v996_v12 }
 0x1c4   : > { %2591 = vmatprep.subr.mxu1 %v2851_v1 }
 0x24c   : > { %v805_v14 = vpop.xlane.xlu0 %804 }
 0x24d   : > { %v806_v15 = vsub.f32 %v3049_v11, %v805_v14 }
 0x24f   : > { %v807_v16 = vmul.f32 1.442695, %v806_v15 }
 0x251   : > { %2722 = vpow2.f32 %v807_v16 }
 0x25e   : > { %v2723_v17 = vpop.eup %2722 }
 0x25f   : > { %v809_v18 = vsel %vm728_vm2, %v2723_v17, 0.0 }
 0x260   : > { %810 = vadd.xlane.f32.xlu0 %v809_v18 }
 0x2e9   : > { %v811_v23 = vpop.xlane.xlu0 %810 }
 0x2ea   : > { %2724 = vrcp.f32 %v811_v23 }
 0x2f7   : > { %v2725_v25 = vpop.eup %2724 }
 0x2f8   : > { %v813_v27 = vmul.f32 %v2725_v25, %v2723_v17 }
 0x2fa   : > { %v814_v28 = vmul.f32 %v3075_v26, %v813_v27 }
 0x2fc   : > { %2574 = vmatmul.mubr.msk.f32.vlgmr.msra.gmra.mxu0 %vm728_vm2, %v814_v28  ;;  %v888_v29 = vsel %vm728_vm2, %v814_v28, 0.0 }
 0x2fd   : > { %889 = vadd.xlane.f32.xlu1 %v888_v29  ;;  %2578 = vmatprep.mubr.msk.f32.mxu0 %vm2852_vm0, %v2851_v1 }
 0x2fe   : > { %2577 = vmatpush3.msra.mxu0 %v3121_v3 }
 0x2ff   : > { %2586 = vmatprep.subr.mxu0 %v2851_v1 }
 0x386   : > { %v890_v39 = vpop.xlane.xlu1 %889 }
 0x3bc   : > { %v884_v40 = vpop.f32.mrf.mxu0 }
 0x3bd   : > { %v891_v41 = vsub.f32 %v890_v39, %v884_v40 }
 0x3be   : > { %v2575_v42 = vpop.f32.mrf.mxu0 }
 0x3bf   : > { %v892_v43 = vmul.f32 %v891_v41, %v3108_v38 }
 0x3c1   : > { %v893_v44 = vmax.f32 %v892_v43, 0.0 }
 0x3c3   : > { %2726 = vrsqrt.f32 %v893_v44  ;;  %vm896_vm5 = vcmp.eq.f32.partialorder %v893_v44, inf  ;;  %v899_v47 = vand.u32 2147483648, %v893_v44  ;;  %vm898_vm6 = vcmp.eq.f32.partialorder %v893_v44, 0.0 }
 0x3d0   : > { %v2727_v45 = vpop.eup %2726 }
 0x3d1   : > { %v895_v46 = vmul.f32 %v2727_v45, %v893_v44 }
 0x3d3   : > { %v897_v49 = vsel %vm896_vm5, %v893_v44, %v895_v46  ;;  %v1251_v46 = vstv %s2459_s28 }
 0x3d4   : > { %v900_v50 = vsel %vm898_vm6, %v899_v47, %v897_v49 }
 0x3d5   : > { %v903_v51 = vmul.f32 %v902_v48, %v900_v50 }
 0x3d7   : > { %v904_v52 = vmul.f32 1.442695, %v903_v51 }
 0x3d9   : > { %2728 = vpow2.f32 %v904_v52 }
 0x3e6   : > { %v2729_v53 = vpop.eup %2728 }
 0x3e7   : > { %v906_v54 = vmax.f32 %v2729_v53, 1e-05 }
 0x3e9   : > { %v907_v55 = vmin.f32 %v906_v54, 100000.0 }
 0x3eb   : > { %v908_v56 = vmul.f32 %v907_v55, %v3049_v11 }
 0x3ed   : > { %v909_v57 = vsel %vm3068_vm4, %v908_v56, -1e+32 }
 0x3ee   : > { %v910_v58 = vsel %vm728_vm2, %v909_v57, -inf }
 0x3ef   : > { %911 = vmax.xlane.f32.xlu1 %v910_v58 }
 0x400   : > { %1077 = vrot.lane.b32.xlu1 %v3040_v8, %s2854_s19 }
 0x478   : > { %v912_v59 = vpop.xlane.xlu1 %911 }
 0x479   : > { %v913_v60 = vsub.f32 %v909_v57, %v912_v59 }
 0x47b   : > { %v914_v61 = vmul.f32 1.442695, %v913_v60 }
 0x47c   : > { %v1078_v11 = vpop.permute.xlu1 %1077 }
 0x47d   : > { %2730 = vpow2.f32 %v914_v61 }
 0x48a   : > { %v2731_v62 = vpop.eup %2730 }
 0x48b   : > { %v916_v63 = vsel %vm728_vm2, %v2731_v62, 0.0 }
 0x48c   : > { %917 = vadd.xlane.f32.xlu0 %v916_v63 }
 0x515   : > { %v918_v6 = vpop.xlane.xlu0 %917 }
 0x516   : > { %2732 = vrcp.f32 %v918_v6 }
 0x523   : > { %v2733_v7 = vpop.eup %2732 }
 0x524   : > { %v920_v9 = vmul.f32 %v2733_v7, %v2731_v62  ;;  %v1348_v7 = vld [vmem:[%s3377_s7 + $0x8] sm:$0xff] }
 0x526   : > { %v922_v10 = vsel %vm921_vm7, 0.0, %v920_v9 }
 0x527   : > { %2579 = vmatmul.mubr.msk.f32.vlgmr.msra.gmra.mxu0 %vm728_vm2, %v922_v10 }
 0x528   : > { %2587 = vmatpush3.xpose.msk.msra.mxu0 %vm728_vm2, %v1078_v11  ;;  %2588 = vmatprep.mubr.msk.f32.mxu0 %vm2852_vm0, %v2851_v1 }
 0x529   : > { %2596 = vmatprep.subr.mxu0 %v2851_v1 }
 0x52b   : > { %2589 = vmatmul.mubr.msk.f32.vlgmr.msra.gmra.mxu0 %vm728_vm2, %v1078_v11 }
 0x52c   : > { %2598 = vmatprep.mubr.msk.f32.mxu0 %vm2852_vm0, %v2851_v1 }
 0x5e7   : > { %v992_v13 = vpop.f32.mrf.mxu0 }
 0x5e8   : > { %2584 = vmatmul.mubr.msk.f32.vlgmr.msra.gmra.mxu1 %vm728_vm2, %v992_v13 }
 0x5e9   : > { %v2580_v14 = vpop.f32.mrf.mxu0  ;;  %2592 = vmatpush3.msk.msra.mxu1 %vm719_vm3, %v2853_v22  ;;  %2593 = vmatprep.mubr.msk.f32.mxu1 %vm2852_vm0, %v2851_v1 }
 0x5ea   : > { %2601 = vmatprep.subr.mxu1 %v2851_v1 }
 0x5eb   : > { %v1147_v15 = vpop.f32.mrf.mxu0 }
 0x5ec   : > { %v1151_v16 = vmul.f32 0.35355338, %v1147_v15 }
 0x5ed   : > { %v2590_v17 = vpop.f32.mrf.mxu0 }
 0x5ee   : > { %v1152_v18 = vsel %vm728_vm2, %v1151_v16, -inf }
 0x5ef   : > { %1153 = vmax.xlane.f32.xlu0 %v1152_v18 }
 0x678   : > { %v1154_v19 = vpop.xlane.xlu0 %1153 }
 0x679   : > { %v1155_v23 = vsub.f32 %v1151_v16, %v1154_v19 }
 0x67b   : > { %v1156_v25 = vmul.f32 1.442695, %v1155_v23  ;;  %v2454_v23 = vld [vmem:[%s3378_s8] ss:$0 sm:$0xff] }
 0x67d   : > { %2734 = vpow2.f32 %v1156_v25 }
 0x68a   : > { %v2735_v27 = vpop.eup %2734 }
 0x68b   : > { %v1158_v28 = vsel %vm728_vm2, %v2735_v27, 0.0 }
 0x68c   : > { %1159 = vadd.xlane.f32.xlu0 %v1158_v28 }
 0x6a8   : > { %v3150_v29 = vpop.f32.mrf.mxu1 }
 0x6a9   : > { %v1076_v25 = vadd.f32 %v2454_v23, %v3150_v29 }
 0x6aa   : > { %v2585_v30 = vpop.f32.mrf.mxu1 }
 0x715   : > { %v1160_v31 = vpop.xlane.xlu0 %1159 }
 0x716   : > { %2736 = vrcp.f32 %v1160_v31 }
 0x723   : > { %v2737_v32 = vpop.eup %2736 }
 0x724   : > { %v1162_v33 = vmul.f32 %v2737_v32, %v2735_v27 }
 0x726   : > { %v1163_v34 = vmul.f32 %v3075_v26, %v1162_v33 }
 0x728   : > { %2594 = vmatmul.mubr.msk.f32.vlgmr.msra.gmra.mxu1 %vm728_vm2, %v1163_v34  ;;  %v1237_v35 = vsel %vm728_vm2, %v1163_v34, 0.0 }
 0x729   : > { %1238 = vadd.xlane.f32.xlu0 %v1237_v35  ;;  %2603 = vmatprep.mubr.msk.f32.mxu1 %vm2852_vm0, %v2851_v1 }
 0x72a   : > { %2602 = vmatpush3.msra.mxu1 %v1348_v7 }
 0x72b   : > { %2611 = vmatprep.subr.mxu1 %v2851_v1 }
 0x7b2   : > { %v1239_v36 = vpop.xlane.xlu0 %1238 }
 0x7e8   : > { %v1233_v37 = vpop.f32.mrf.mxu1 }
 0x7e9   : > { %v1240_v39 = vsub.f32 %v1239_v36, %v1233_v37 }
 0x7ea   : > { %v2595_v40 = vpop.f32.mrf.mxu1 }
 0x7eb   : > { %v1241_v41 = vmul.f32 %v1240_v39, %v3108_v38 }
 0x7ed   : > { %v1242_v42 = vmax.f32 %v1241_v41, 0.0 }
 0x7ef   : > { %2738 = vrsqrt.f32 %v1242_v42  ;;  %vm1245_vm8 = vcmp.eq.f32.partialorder %v1242_v42, inf  ;;  %v1248_v45 = vand.u32 2147483648, %v1242_v42  ;;  %vm1247_vm9 = vcmp.eq.f32.partialorder %v1242_v42, 0.0 }
 0x7fc   : > { %v2739_v43 = vpop.eup %2738 }
 0x7fd   : > { %v1244_v44 = vmul.f32 %v2739_v43, %v1242_v42 }
 0x7ff   : > { %v1246_v47 = vsel %vm1245_vm8, %v1242_v42, %v1244_v44  ;;  %v1597_v44 = vstv %s2466_s25 }
 0x800   : > { %v1249_v48 = vsel %vm1247_vm9, %v1248_v45, %v1246_v47 }
 0x801   : > { %v1252_v49 = vmul.f32 %v1251_v46, %v1249_v48 }
 0x803   : > { %v1253_v50 = vmul.f32 1.442695, %v1252_v49 }
 0x805   : > { %2740 = vpow2.f32 %v1253_v50 }
 0x812   : > { %v2741_v51 = vpop.eup %2740 }
 0x813   : > { %v1255_v52 = vmax.f32 %v2741_v51, 1e-05 }
 0x815   : > { %v1256_v53 = vmin.f32 %v1255_v52, 100000.0 }
 0x817   : > { %v1257_v54 = vmul.f32 %v1256_v53, %v1151_v16 }
 0x819   : > { %v1258_v55 = vsel %vm3068_vm4, %v1257_v54, -1e+32 }
 0x81a   : > { %v1259_v56 = vsel %vm728_vm2, %v1258_v55, -inf }
 0x81b   : > { %1260 = vmax.xlane.f32.xlu0 %v1259_v56 }
 0x831   : > { %1272 = vrot.lane.b32.xlu0 %v3121_v3, %s2854_s19  ;;  %s2790_s19 = sshll.u32 %s2857_s3, 4  ;;  %s2791_s19 = int_to_ptr.vmem [resolvable:$false] %s2790_s19 }
 0x832   : > { %s2792_s10 = scalar_lea.vmem %s2791_s19, 256 }
 0x835   : > { %1423 = vrot.lane.b32.xlu0 %v3040_v8, %s2855_s20 }
 0x8a4   : > { %v1261_v57 = vpop.xlane.xlu0 %1260 }
 0x8a5   : > { %v1262_v58 = vsub.f32 %v1258_v55, %v1261_v57 }
 0x8a7   : > { %v1263_v59 = vmul.f32 1.442695, %v1262_v58 }
 0x8a8   : > { %v1273_v60 = vpop.permute.xlu0 %1272 }
 0x8a9   : > { %2742 = vpow2.f32 %v1263_v59  ;;  %2597 = vmatpush3.msra.mxu0 %v1273_v60 }
 0x8aa   : > { %2606 = vmatprep.subr.mxu0 %v2851_v1 }
 0x8ac   : > { %v1424_v6 = vpop.permute.xlu0 %1423 }
 0x8b6   : > { %v2743_v61 = vpop.eup %2742 }
 0x8b7   : > { %v1265_v62 = vsel %vm728_vm2, %v2743_v61, 0.0 }
 0x8b8   : > { %1266 = vadd.xlane.f32.xlu1 %v1265_v62 }
 0x941   : > { %v1267_v63 = vpop.xlane.xlu1 %1266 }
 0x942   : > { %2744 = vrcp.f32 %v1267_v63 }
 0x94f   : > { %v2745_v0 = vpop.eup %2744 }
 0x950   : > { %v1269_v2 = vmul.f32 %v2745_v0, %v2743_v61 }
 0x952   : > { %v1270_v4 = vsel %vm921_vm7, 0.0, %v1269_v2 }
 0x953   : > { %2599 = vmatmul.mubr.msk.f32.vlgmr.msra.gmra.mxu0 %vm728_vm2, %v1270_v4  ;;  %v1693_v4 = vld [vmem:[%s3377_s7 + $0x10] sm:$0xff] }
 0x954   : > { %2607 = vmatpush3.xpose.msk.msra.mxu0 %vm728_vm2, %v1424_v6  ;;  %2608 = vmatprep.mubr.msk.f32.mxu0 %vm2852_vm0, %v2851_v1 }
 0x955   : > { %2616 = vmatprep.subr.mxu0 %v2851_v1 }
 0x957   : > { %2609 = vmatmul.mubr.msk.f32.vlgmr.msra.gmra.mxu0 %vm728_vm2, %v1424_v6 }
 0x958   : > { %2618 = vmatprep.mubr.msk.f32.mxu0 %vm2852_vm0, %v2851_v1 }
 0xa13   : > { %v1344_v9 = vpop.f32.mrf.mxu0 }
 0xa14   : > { %2604 = vmatmul.mubr.msk.f32.vlgmr.msra.gmra.mxu1 %vm728_vm2, %v1344_v9 }
 0xa15   : > { %v2600_v10 = vpop.f32.mrf.mxu0  ;;  %2612 = vmatpush3.msk.msra.mxu1 %vm719_vm3, %v2853_v22  ;;  %2613 = vmatprep.mubr.msk.f32.mxu1 %vm2852_vm0, %v2851_v1 }
 0xa16   : > { %2621 = vmatprep.subr.mxu1 %v2851_v1 }
 0xa17   : > { %v1493_v11 = vpop.f32.mrf.mxu0 }
 0xa18   : > { %v1497_v12 = vmul.f32 0.35355338, %v1493_v11 }
 0xa19   : > { %v2610_v13 = vpop.f32.mrf.mxu0 }
 0xa1a   : > { %v1498_v14 = vsel %vm728_vm2, %v1497_v12, -inf }
 0xa1b   : > { %1499 = vmax.xlane.f32.xlu0 %v1498_v14 }
 0xa31   : > { %1768 = vrot.lane.b32.xlu0 %v3040_v8, %s2856_s1 }
 0xaa4   : > { %v1500_v15 = vpop.xlane.xlu0 %1499 }
 0xaa5   : > { %v1501_v16 = vsub.f32 %v1497_v12, %v1500_v15 }
 0xaa7   : > { %v1502_v17 = vmul.f32 1.442695, %v1501_v16 }
 0xaa8   : > { %v1769_v2 = vpop.permute.xlu0 %1768 }
 0xaa9   : > { %2746 = vpow2.f32 %v1502_v17 }
 0xab6   : > { %v2747_v18 = vpop.eup %2746 }
 0xab7   : > { %v1504_v19 = vsel %vm728_vm2, %v2747_v18, 0.0 }
 0xab8   : > { %1505 = vadd.xlane.f32.xlu1 %v1504_v19 }
 0xad4   : > { %v1418_v27 = vpop.f32.mrf.mxu1 }
 0xad5   : > { %v3197_v28 = vadd.f32 %v1418_v27, %v1076_v25 }
 0xad6   : > { %v2605_v30 = vpop.f32.mrf.mxu1 }
 0xb41   : > { %v1506_v31 = vpop.xlane.xlu1 %1505 }
 0xb42   : > { %2748 = vrcp.f32 %v1506_v31 }
 0xb4f   : > { %v2749_v8 = vpop.eup %2748 }
 0xb50   : > { %v1508_v32 = vmul.f32 %v2749_v8, %v2747_v18 }
 0xb52   : > { %v1509_v33 = vmul.f32 %v3075_v26, %v1508_v32 }
 0xb54   : > { %2614 = vmatmul.mubr.msk.f32.vlgmr.msra.gmra.mxu1 %vm728_vm2, %v1509_v33  ;;  %v1583_v34 = vsel %vm728_vm2, %v1509_v33, 0.0 }
 0xb55   : > { %1584 = vadd.xlane.f32.xlu1 %v1583_v34  ;;  %2623 = vmatprep.mubr.msk.f32.mxu1 %vm2852_vm0, %v2851_v1 }
 0xb56   : > { %2622 = vmatpush3.msra.mxu1 %v1693_v4 }
 0xb57   : > { %2631 = vmatprep.subr.mxu1 %v2851_v1 }
 0xbde   : > { %v1585_v35 = vpop.xlane.xlu1 %1584 }
 0xc14   : > { %v1579_v29 = vpop.f32.mrf.mxu1 }
 0xc15   : > { %v1586_v36 = vsub.f32 %v1585_v35, %v1579_v29 }
 0xc16   : > { %v2615_v37 = vpop.f32.mrf.mxu1 }
 0xc17   : > { %v1587_v39 = vmul.f32 %v1586_v36, %v3108_v38  ;;  %v1942_v36 = vstv %s2473_s27 }
 0xc19   : > { %v1588_v40 = vmax.f32 %v1587_v39, 0.0 }
 0xc1b   : > { %2750 = vrsqrt.f32 %v1588_v40  ;;  %vm1591_vm10 = vcmp.eq.f32.partialorder %v1588_v40, inf  ;;  %v1594_v43 = vand.u32 2147483648, %v1588_v40  ;;  %vm1593_vm11 = vcmp.eq.f32.partialorder %v1588_v40, 0.0 }
 0xc28   : > { %v2751_v41 = vpop.eup %2750 }
 0xc29   : > { %v1590_v42 = vmul.f32 %v2751_v41, %v1588_v40 }
 0xc2b   : > { %v1592_v45 = vsel %vm1591_vm10, %v1588_v40, %v1590_v42 }
 0xc2c   : > { %v1595_v46 = vsel %vm1593_vm11, %v1594_v43, %v1592_v45 }
 0xc2d   : > { %v1598_v47 = vmul.f32 %v1597_v44, %v1595_v46 }
 0xc2f   : > { %v1599_v48 = vmul.f32 1.442695, %v1598_v47 }
 0xc31   : > { %2752 = vpow2.f32 %v1599_v48 }
 0xc3e   : > { %v2753_v49 = vpop.eup %2752 }
 0xc3f   : > { %v1601_v50 = vmax.f32 %v2753_v49, 1e-05 }
 0xc41   : > { %v1602_v51 = vmin.f32 %v1601_v50, 100000.0 }
 0xc43   : > { %v1603_v52 = vmul.f32 %v1602_v51, %v1497_v12 }
 0xc45   : > { %v1604_v53 = vsel %vm3068_vm4, %v1603_v52, -1e+32 }
 0xc46   : > { %v1605_v54 = vsel %vm728_vm2, %v1604_v53, -inf }
 0xc47   : > { %1606 = vmax.xlane.f32.xlu1 %v1605_v54 }
 0xcd0   : > { %v1607_v55 = vpop.xlane.xlu1 %1606 }
 0xcd1   : > { %v1608_v56 = vsub.f32 %v1604_v53, %v1607_v55 }
 0xcd3   : > { %v1609_v57 = vmul.f32 1.442695, %v1608_v56 }
 0xcd5   : > { %2754 = vpow2.f32 %v1609_v57 }
 0xce2   : > { %v2755_v58 = vpop.eup %2754 }
 0xce3   : > { %v1611_v59 = vsel %vm728_vm2, %v2755_v58, 0.0 }
 0xce4   : > { %1612 = vadd.xlane.f32.xlu1 %v1611_v59 }
 0xcf5   : > { %1617 = vrot.lane.b32.xlu1 %v3121_v3, %s2855_s20 }
 0xd6d   : > { %v1613_v60 = vpop.xlane.xlu1 %1612 }
 0xd6e   : > { %2756 = vrcp.f32 %v1613_v60 }
 0xd71   : > { %v1618_v61 = vpop.permute.xlu1 %1617 }
 0xd72   : > { %2617 = vmatpush3.msra.mxu0 %v1618_v61 }
 0xd73   : > { %2626 = vmatprep.subr.mxu0 %v2851_v1 }
 0xd7b   : > { %v2757_v62 = vpop.eup %2756 }
 0xd7c   : > { %v1615_v63 = vmul.f32 %v2757_v62, %v2755_v58 }
 0xd7e   : > { %v1616_v0 = vsel %vm921_vm7, 0.0, %v1615_v63 }
 0xd7f   : > { %2619 = vmatmul.mubr.msk.f32.vlgmr.msra.gmra.mxu0 %vm728_vm2, %v1616_v0 }
 0xd80   : > { %2627 = vmatpush3.xpose.msk.msra.mxu0 %vm728_vm2, %v1769_v2  ;;  %2628 = vmatprep.mubr.msk.f32.mxu0 %vm2852_vm0, %v2851_v1 }
 0xd81   : > { %2636 = vmatprep.subr.mxu0 %v2851_v1 }
 0xd83   : > { %2629 = vmatmul.mubr.msk.f32.vlgmr.msra.gmra.mxu0 %vm728_vm2, %v1769_v2 }
 0xd84   : > { %2638 = vmatprep.mubr.msk.f32.mxu0 %vm2852_vm0, %v2851_v1 }
 0xe3f   : > { %v1689_v6 = vpop.f32.mrf.mxu0 }
 0xe40   : > { %2624 = vmatmul.mubr.msk.f32.vlgmr.msra.gmra.mxu1 %vm728_vm2, %v1689_v6  ;;  %v2147_v6 = vld [vmem:[%s3381_s11 + $0x18] sm:$0xff] }
 0xe41   : > { %v2620_v7 = vpop.f32.mrf.mxu0  ;;  %2632 = vmatpush3.msk.msra.mxu1 %vm719_vm3, %v2853_v22  ;;  %2633 = vmatprep.mubr.msk.f32.mxu1 %vm2852_vm0, %v2851_v1 }
 0xe42   : > { %2641 = vmatprep.subr.mxu1 %v2851_v1  ;;  %v2146_v7 = vld [vmem:[%s3381_s11 + $0x10] sm:$0xff] }
 0xe43   : > { %v1838_v9 = vpop.f32.mrf.mxu0 }
 0xe44   : > { %v1842_v10 = vmul.f32 0.35355338, %v1838_v9  ;;  %v2144_v9 = vld [vmem:[%s3381_s11] sm:$0xff] }
 0xe45   : > { %v2630_v11 = vpop.f32.mrf.mxu0 }
 0xe46   : > { %v1843_v12 = vsel %vm728_vm2, %v1842_v10, -inf  ;;  %v2235_v11 = vld [vmem:[%s3383_s13 + $0x30] sm:$0xff] }
 0xe47   : > { %1844 = vmax.xlane.f32.xlu1 %v1843_v12  ;;  %v2234_v12 = vld [vmem:[%s3383_s13 + $0x28] sm:$0xff] }
 0xed0   : > { %v1845_v13 = vpop.xlane.xlu1 %1844 }
 0xed1   : > { %v1846_v14 = vsub.f32 %v1842_v10, %v1845_v13  ;;  %v2233_v13 = vld [vmem:[%s3383_s13 + $0x20] sm:$0xff] }
 0xed3   : > { %v1847_v15 = vmul.f32 1.442695, %v1846_v14  ;;  %v2232_v14 = vld [vmem:[%s3383_s13 + $0x18] sm:$0xff] }
 0xed5   : > { %2758 = vpow2.f32 %v1847_v15 }
 0xee2   : > { %v2759_v16 = vpop.eup %2758 }
 0xee3   : > { %v1849_v17 = vsel %vm728_vm2, %v2759_v16, 0.0 }
 0xee4   : > { %1850 = vadd.xlane.f32.xlu0 %v1849_v17 }
 0xf00   : > { %v1763_v21 = vpop.f32.mrf.mxu1 }
 0xf01   : > { %v3237_v22 = vadd.f32 %v1763_v21, %v3197_v28 }
 0xf02   : > { %v2625_v18 = vpop.f32.mrf.mxu1 }
 0xf6d   : > { %v1851_v19 = vpop.xlane.xlu0 %1850 }
 0xf6e   : > { %2760 = vrcp.f32 %v1851_v19  ;;  %v2477_v19 = vld [vmem:[%s3409_s21] ss:$0 sm:$0xff]  ;;  %s530_s21 = sand.u32 1, %s2840_s0  }
 0xf6f   : > { %s2438_s30 = sshll.u32 %s530_s21, 3  ;;  %s2350_s4 = scalar_lea.sflag [#allocation5], %s530_s21 }
 0xf70   : > { %s532_s26 = scalar_lea.vmem [#allocation4], %s2438_s30 }
 0xf71   : > { %s2363_s27 = sshll.u32 %s532_s26, 4  ;;  %s2364_s27 = int_to_ptr.vmem [resolvable:$true] %s2363_s27 }
 0xf72   : > { %p2793_p5 = scmp.lt.s32.totalorder %s2364_s27, %s2791_s19 }
 0xf7b   : > { %v2761_v23 = vpop.eup %2760 }
 0xf7c   : > { %v1853_v25 = vmul.f32 %v2761_v23, %v2759_v16 }
 0xf7e   : > { %v1854_v27 = vmul.f32 %v3075_v26, %v1853_v25 }
 0xf80   : > { %2634 = vmatmul.mubr.msk.f32.vlgmr.msra.gmra.mxu1 %vm728_vm2, %v1854_v27  ;;  %v1928_v30 = vsel %vm728_vm2, %v1854_v27, 0.0  ;;  %v2231_v27 = vld [vmem:[%s3383_s13 + $0x10] sm:$0xff] }
 0xf81   : > { %1929 = vadd.xlane.f32.xlu1 %v1928_v30  ;;  %2643 = vmatprep.mubr.msk.f32.mxu1 %vm2852_vm0, %v2851_v1  ;;  %v2230_v30 = vld [vmem:[%s3383_s13 + $0x8] sm:$0xff] }
 0xf82   : > { %2642 = vmatpush3.msra.mxu1 %v2038_v24 }
 0xf83   : > { %2657 = vmatprep.subr.mxu1 %v2851_v1 }
0x100a   : > { %v1930_v31 = vpop.xlane.xlu1 %1929 }
0x1040   : > { %v1924_v8 = vpop.f32.mrf.mxu1 }
0x1041   : > { %v1931_v32 = vsub.f32 %v1930_v31, %v1924_v8  ;;  %v2229_v31 = vld [vmem:[%s3383_s13] sm:$0xff] }
0x1042   : > { %v2635_v28 = vpop.f32.mrf.mxu1  ;;  %v2478_v8 = vld [vmem:[%s3382_s12] ss:$0 sm:$0xff] }
0x1043   : > { %v1932_v33 = vmul.f32 %v1931_v32, %v3108_v38 }
0x1045   : > { %v1933_v34 = vmax.f32 %v1932_v33, 0.0 }
0x1047   : > { %2762 = vrsqrt.f32 %v1933_v34  ;;  %vm1936_vm12 = vcmp.eq.f32.partialorder %v1933_v34, inf  ;;  %v1939_v26 = vand.u32 2147483648, %v1933_v34  ;;  %vm1938_vm13 = vcmp.eq.f32.partialorder %v1933_v34, 0.0 }
0x1054   : > { %v2763_v35 = vpop.eup %2762 }
0x1055   : > { %v1935_v29 = vmul.f32 %v2763_v35, %v1933_v34  ;;  %v2480_v35 = vld [vmem:[%s3384_s14] ss:$0 sm:$0xff] }
0x1057   : > { %v1937_v37 = vsel %vm1936_vm12, %v1933_v34, %v1935_v29 }
0x1058   : > { %v1940_v39 = vsel %vm1938_vm13, %v1939_v26, %v1937_v37 }
0x1059   : > { %v1943_v40 = vmul.f32 %v1942_v36, %v1940_v39 }
0x105b   : > { %v1944_v41 = vmul.f32 1.442695, %v1943_v40 }
0x105d   : > { %2764 = vpow2.f32 %v1944_v41 }
0x106a   : > { %v2765_v42 = vpop.eup %2764 }
0x106b   : > { %v1946_v43 = vmax.f32 %v2765_v42, 1e-05 }
0x106d   : > { %v1947_v44 = vmin.f32 %v1946_v43, 100000.0 }
0x106f   : > { %v1948_v45 = vmul.f32 %v1947_v44, %v1842_v10  ;;  %v2236_v10 = vld [vmem:[%s3383_s13 + $0x38] sm:$0xff] }
0x1071   : > { %v1949_v38 = vsel %vm3068_vm4, %v1948_v45, -1e+32 }
0x1072   : > { %v1950_v46 = vsel %vm728_vm2, %v1949_v38, -inf }
0x1073   : > { %1951 = vmax.xlane.f32.xlu1 %v1950_v46 }
0x1084   : > { %1962 = vrot.lane.b32.xlu1 %v3121_v3, %s2856_s1  ;;  %s2786_s1 = scalar_lea.vmem %s2364_s27, 128 }
0x1085   : > { %p2787_p2 = scmp.ne.s32.totalorder %s2364_s27, %s2786_s1  ;;  %p2794_p6 = scmp.lt.s32.totalorder %s2792_s10, %s2786_s1 }
0x1087   : > { %p2788_p3 = pnand %p2787_p2, %p2989_p10  ;;  %p2795_p7 = por %p2794_p6, %p2793_p5 }
0x1089   : > { %p2789_p4 = pneg %p2788_p3 }
0x108b   : > { %p2796_p8 = pnand %p2795_p7, %p2789_p4 }
0x10fc   : > { %v1952_v47 = vpop.xlane.xlu1 %1951 }
0x10fd   : > { %v1953_v48 = vsub.f32 %v1949_v38, %v1952_v47  ;;  %v2482_v47 = vld [vmem:[%s3385_s15] ss:$0 sm:$0xff] }
0x10ff   : > { %v1954_v49 = vmul.f32 1.442695, %v1953_v48 }
0x1100   : > { %v1963_v50 = vpop.permute.xlu1 %1962 }
0x1101   : > { %2766 = vpow2.f32 %v1954_v49  ;;  %2637 = vmatpush3.msra.mxu0 %v1963_v50  ;;  %v2483_v49 = vld [vmem:[%s3386_s16] ss:$0 sm:$0xff] }
0x1102   : > { %2646 = vmatprep.subr.mxu0 %v2851_v1 }
0x110e   : > { %v2767_v51 = vpop.eup %2766 }
0x110f   : > { %v1956_v52 = vsel %vm728_vm2, %v2767_v51, 0.0 }
0x1110   : > { %1957 = vadd.xlane.f32.xlu0 %v1956_v52 }
0x1199   : > { %v1958_v3 = vpop.xlane.xlu0 %1957 }
0x119a   : > { %2768 = vrcp.f32 %v1958_v3 }
0x11a7   : > { %v2769_v53 = vpop.eup %2768 }
0x11a8   : > { %v1960_v54 = vmul.f32 %v2769_v53, %v2767_v51 }
0x11aa   : > { %v1961_v55 = vsel %vm921_vm7, 0.0, %v1960_v54 }
0x11ab   : > { %2639 = vmatmul.mubr.msk.f32.vlgmr.msra.gmra.mxu0 %vm728_vm2, %v1961_v55 }
0x11ac   : > { %2654 = vmatprep.mubr.msk.f32.mxu0 %vm2852_vm0, %v2851_v1  ;;  %2647 = vmatpush3.msra.mxu0 %v2147_v6 }
0x11ad   : > { %2648 = vmatprep.subr.mxu0 %v2851_v1 }
0x11ae   : > { %2649 = vmatpush3.msra.mxu0 %v2146_v7 }
0x11af   : > { %2650 = vmatprep.subr.mxu0 %v2851_v1 }
0x126b   : > { %v2034_v56 = vpop.f32.mrf.mxu0 }
0x126c   : > { %2644 = vmatmul.mubr.msk.f32.vlgmr.msra.gmra.mxu1 %vm728_vm2, %v2034_v56 }
0x126d   : > { %v2640_v57 = vpop.f32.mrf.mxu0  ;;  %2673 = vmatprep.mubr.msk.f32.mxu1 %vm2852_vm0, %v2851_v1  ;;  %2658 = vmatpush3.msra.mxu1 %v2236_v10 }
0x126e   : > { %2659 = vmatprep.subr.mxu1 %v2851_v1 }
0x126f   : > { %2660 = vmatpush3.msra.mxu1 %v2235_v11 }
0x1270   : > { %2661 = vmatprep.subr.mxu1 %v2851_v1 }
0x1271   : > { %2662 = vmatpush3.msra.mxu1 %v2234_v12 }
0x1272   : > { %2663 = vmatprep.subr.mxu1 %v2851_v1 }
0x1273   : > { %2664 = vmatpush3.msra.mxu1 %v2233_v13 }
0x1274   : > { %2665 = vmatprep.subr.mxu1 %v2851_v1 }
0x1275   : > { %2666 = vmatpush3.msra.mxu1 %v2232_v14 }
0x1276   : > { %2667 = vmatprep.subr.mxu1 %v2851_v1 }
0x1277   : > { %2668 = vmatpush3.msra.mxu1 %v2231_v27 }
0x1278   : > { %2669 = vmatprep.subr.mxu1 %v2851_v1 }
0x1279   : > { %2670 = vmatpush3.msra.mxu1 %v2230_v30 }
0x127a   : > { %2671 = vmatprep.subr.mxu1 %v2851_v1 }
0x127b   : > { %2672 = vmatpush3.msra.mxu1 %v2229_v31 }
0x132c   : > { %v2108_v58 = vpop.f32.mrf.mxu1 }
0x132d   : > { %v2112_v59 = vadd.f32 %v2108_v58, %v3237_v22  ;;  %v2476_v22 = vld [vmem:[%s3379_s9] ss:$0 sm:$0xff] }
0x132e   : > { %v2645_v60 = vpop.f32.mrf.mxu1 }
0x132f   : > { %v2113_v61 = vadd.f32 %v2112_v59, %v3029_v5  ;;  %v2145_v5 = vld [vmem:[%s3381_s11 + $0x8] sm:$0xff] }
0x1330   : > { %2651 = vmatpush3.msra.mxu0 %v2145_v5 }
0x1331   : > { %v2116_v20 = vsel %vm554_vm1, %v2113_v61, 0.0  ;;  %2652 = vmatprep.subr.mxu0 %v2851_v1 }
0x1332   : > { %2117 = vadd.xlane.f32.xlu0 %v2116_v20  ;;  %2653 = vmatpush3.msra.mxu0 %v2144_v9 }
0x13bb   : > { %v2118_v62 = vpop.xlane.xlu0 %2117 }
0x13bc   : > { %v2120_v63 = vmul.f32 0.03125, %v2118_v62 }
0x13be   : > { %v2121_v0 = vsub.f32 %v2113_v61, %v2120_v63 }
0x13c0   : > { %v2122_v2 = vmul.f32 %v2121_v0, %v2121_v0 }
0x13c2   : > { %v2123_v4 = vsel %vm554_vm1, %v2122_v2, 0.0 }
0x13c3   : > { %2124 = vadd.xlane.f32.xlu0 %v2123_v4 }
0x144c   : > { %v2125_v15 = vpop.xlane.xlu0 %2124 }
0x144d   : > { %v2126_v16 = vmul.f32 0.03125, %v2125_v15 }
0x144f   : > { %v2127_v17 = vadd.f32 1e-05, %v2126_v16 }
0x1451   : > { %2770 = vrsqrt.f32 %v2127_v17 }
0x145e   : > { %v2771_v21 = vpop.eup %2770 }
0x145f   : > { %v2129_v18 = vmul.f32 %v2771_v21, %v2121_v0 }
0x1461   : > { %v2136_v23 = vmul.f32 %v2476_v22, %v2129_v18 }
0x1463   : > { %v2143_v25 = vadd.f32 %v2477_v19, %v2136_v23 }
0x1465   : > { %2655 = vmatmul.mubr.msk.f32.vlgmr.msra.gmra.mxu0 %vm554_vm1, %v2143_v25 }
0x1525   : > { %v2224_v32 = vpop.f32.mrf.mxu0 }
0x1526   : > { %v2225_v28 = vadd.f32 %v2478_v8, %v2224_v32 }
0x1527   : > { %v2656_v33 = vpop.f32.mrf.mxu0 }
0x1528   : > { %v2228_v34 = vmax.f32 %v2225_v28, 0.0 }
0x152a   : > { %2674 = vmatmul.mubr.msk.f32.vlgmr.msra.gmra.mxu1 %vm2244_vm14, %v2228_v34 }
0x15ea   : > { %v2314_v29 = vpop.f32.mrf.mxu1 }
0x15eb   : > { %v2315_v26 = vadd.f32 %v2480_v35, %v2314_v29 }
0x15ec   : > { %v2675_v36 = vpop.f32.mrf.mxu1 }
0x15ed   : > { %v2318_v1 = vadd.f32 %v2315_v26, %v2143_v25 }
0x15ef   : > { %v2321_v37 = vsel %vm554_vm1, %v2318_v1, 0.0 }
0x15f0   : > { %2322 = vadd.xlane.f32.xlu0 %v2321_v37 }
0x1679   : > { %v2323_v39 = vpop.xlane.xlu0 %2322 }
0x167a   : > { %v2324_v40 = vmul.f32 0.03125, %v2323_v39 }
0x167c   : > { %v2325_v41 = vsub.f32 %v2318_v1, %v2324_v40 }
0x167e   : > { %v2326_v42 = vmul.f32 %v2325_v41, %v2325_v41 }
0x1680   : > { %v2327_v43 = vsel %vm554_vm1, %v2326_v42, 0.0 }
0x1681   : > { %2328 = vadd.xlane.f32.xlu0 %v2327_v43 }
0x170a   : > { %v2329_v44 = vpop.xlane.xlu0 %2328 }
0x170b   : > { %v2330_v45 = vmul.f32 0.03125, %v2329_v44 }
0x170d   : > { %v2331_v38 = vadd.f32 1e-05, %v2330_v45 }
0x170f   : > { %2772 = vrsqrt.f32 %v2331_v38 }
0x171c   : > { %v2773_v46 = vpop.eup %2772 }
0x171d   : > { %v2333_v48 = vmul.f32 %v2773_v46, %v2325_v41 }
0x171f   : > { %v2340_v50 = vmul.f32 %v2482_v47, %v2333_v48 }
0x1721   : > { %v2347_v51 = vadd.f32 %v2483_v49, %v2340_v50 }
0x1723   : > { %2348 = vst.msk [vmem:[%s532_s26] sm:$0xff] %vm554_vm1, %v2347_v51 }
0x1724   : > { %2799 = shalt.err (!%p2796_p8)
}
0x1725   : > { %s2800_s30 = scalar_lea.hbm %s2361_s2, 128  ;;  %s2804_s22 = scalar_lea.hbm %s3387_s17, 256 }
0x1726   : > { %p2801_p9 = scmp.ne.s32.totalorder %s2361_s2, %s2800_s30  ;;  %p2805_p0 = scmp.lt.s32.totalorder %s2361_s2, %s3387_s17 }
0x1727   : > { %p2806_p1 = scmp.lt.s32.totalorder %s2804_s22, %s2800_s30 }
0x1728   : > { %p2802_p12 = pnand %p2801_p9, %p2989_p10 }
0x1729   : > { %p2807_p2 = por %p2806_p1, %p2805_p0 }
0x172a   : > { %p2803_p13 = pneg %p2802_p12 }
0x172c   : > { %p2808_p3 = pnand %p2807_p2, %p2803_p13 }
0x172e   : > { %2811 = shalt.err (!%p2808_p3)
}
0x172f   : > { %2676 = dma.vmem_to_hbm [thread:$0]  (%p2989_p10), %s2364_s27, 128, %s2361_s2, %s2350_s4  }
0x1730 PF: > { %p2682_p4 = scmp.ge.s32.totalorder %s2848_s18, 2  ;;  %s2375_s20 = sand.u32 1, %s2836_s29  }
0x1731   : > { %s2376_s1 = scalar_lea.sflag [#allocation5], %s2375_s20 }
0x1732   : > { %p2679_p5 = pnand %p2682_p4, %p2993_p11 }
0x1734   : > { %p2680_p6 = pneg %p2679_p5 }
0x1736   : > { %2831 = dma.done.wait (%p2680_p6), %s2376_s1, 128  }
0x1737   : > { %2833 = vsyncadd (%p2680_p6), %s2376_s1, 4294967168  ;;  %s3410_s18 = sld [smem:[#allocation9_spill]]  ;;  %s3413_s29 = smov %s2840_s0 }
0x1738   : > { %s3411_s3 = sld [smem:[#allocation8_spill]] }
0x1739   : > { %s3412_s30 = sld [smem:[#allocation10_spill]] }
0x173d   : > { %p33_p7 = scmp.ge.s32.totalorder %s3410_s18, 4  }
0x173e   : > { %s3414_s0 = smov %s3411_s3 }
0x173f   :  { %35 = sbr.rel (!%p33_p7) target bundleno = 30 (0x1e), region = 122 }
0x1744   :  { %2381 = vsyncpa [#allocation5], 1 }
0x1745   :  { %2383 = vsyncpa [#allocation5 + $0x1], 1 }

</bundles_post_ra>
